<compile_context>
chip_gen: v7x
topology: tpu7x:2x2x1
jax: 0.10.0
libtpu: 0.0.40
codegen_flags: <defaults>
</compile_context>

<pallas_src>
import jax
import jax.numpy as jnp
from jax.experimental import pallas as pl
from jax.experimental.pallas import tpu as pltpu


def _round_up(x, m):
    return (x + m - 1) // m * m


def _cdiv(a, b):
    return -(-a // b)


def _vmem_capacity_bytes():
    """Physical VMEM per TensorCore; conservative 64 MiB (v7x) fallback."""
    try:
        cap = int(getattr(pltpu.get_tpu_info(), "vmem_capacity_bytes", 0))
        if cap > 0:
            return cap
    except Exception:
        pass
    return 64 << 20


def head_kernel(x_ref, w_ref, b_ref, out_ref):
    """AdaptiveAvgPool2d((1,1)) + flatten + fc for one batch tile.

    x_ref  : (tb, C, H*W) float32   layer4 feature-map tile
    w_ref  : (C, Np)      bfloat16  fc weight, transposed + lane-padded (Np % 128 == 0)
    b_ref  : (1, Np)      float32   fc bias, lane-padded
    out_ref: (tb, Np)     float32   logits (padded columns sliced off by the wrapper)
    """
    x = x_ref[...].astype(jnp.float32)
    # avgpool + flatten: spatial mean kept in f32 for accuracy.
    pooled = jnp.sum(x, axis=-1) * (1.0 / x.shape[-1])            # (tb, C)
    # fc: bf16 x bf16 on the MXU, f32 accumulation.
    logits = jnp.dot(pooled.astype(jnp.bfloat16), w_ref[...],
                     preferred_element_type=jnp.float32)
    out_ref[...] = logits + b_ref[...]


def head_forward(feat_nchw, params, *, max_block_b=256):
    """feat_nchw: (B, C, H, W) layer4 feature map. Returns (B, n_classes) float32 logits."""
    w_bf, bias, n_classes = params["w_bf16"], params["b"], params["n_classes"]
    B, C, H, W = feat_nchw.shape
    HW = H * W
    Np = w_bf.shape[1]
    bpe = jnp.dtype(feat_nchw.dtype).itemsize

    x3d = feat_nchw.reshape(B, C, HW)          # free (contiguous) reshape; dtype untouched

    # ---- VMEM-aware batch-tile selection -------------------------------------------------
    vmem_budget = int(0.85 * _vmem_capacity_bytes())

    def est_vmem(tb):
        # Pallas double-buffers every blocked operand by default -> count x2 everywhere.
        return (2 * tb * C * HW * bpe          # feature tiles (input dtype, cast in-kernel)
                + 2 * tb * Np * 4              # output tiles (f32)
                + 2 * C * Np * 2               # fc weight (bf16), grid-invariant
                + 2 * Np * 4)                  # fc bias (f32)

    # Largest tile (multiple of 8, <= max_block_b) whose working set fits the budget.
    tb_cap = _round_up(min(max_block_b, max(B, 8)), 8)
    while tb_cap > 8 and est_vmem(tb_cap) > vmem_budget:
        tb_cap -= 8

    # Step count: balanced (minimal padding); >= 2 and even when B >= 16 so both v7x
    # TensorCores get work on the "parallel" grid axis.
    n_tiles = _cdiv(B, tb_cap)
    if B >= 16:
        n_tiles = max(2, n_tiles)
        n_tiles += n_tiles % 2
    tb = _round_up(_cdiv(B, n_tiles), 8)
    b_pad = n_tiles * tb

    if b_pad != B:
        x3d = jnp.pad(x3d, ((0, b_pad - B), (0, 0), (0, 0)))

    vmem_limit = int(min(vmem_budget, max(8 << 20, est_vmem(tb) + (4 << 20))))

    flops = 2 * b_pad * C * Np + b_pad * C * HW
    bytes_accessed = b_pad * C * HW * bpe + C * Np * 2 + Np * 4 + b_pad * Np * 4

    out = pl.pallas_call(
        head_kernel,
        out_shape=jax.ShapeDtypeStruct((b_pad, Np), jnp.float32),
        grid=(n_tiles,),
        in_specs=[
            pl.BlockSpec((tb, C, HW), lambda i: (i, 0, 0)),   # feature tiles, batch-tiled
            pl.BlockSpec((C, Np), lambda i: (0, 0)),          # fc weight (bf16), VMEM-resident
            pl.BlockSpec((1, Np), lambda i: (0, 0)),          # fc bias, VMEM-resident
        ],
        out_specs=pl.BlockSpec((tb, Np), lambda i: (i, 0)),   # lane-dense (Np % 128 == 0)
        compiler_params=pltpu.CompilerParams(
            dimension_semantics=("parallel",),
            vmem_limit_bytes=vmem_limit,
        ),
        cost_estimate=pl.CostEstimate(
            flops=flops, transcendentals=0, bytes_accessed=bytes_accessed),
    )(x3d, w_bf, bias)

    return out[:B, :n_classes]


def make_params(key, in_features, n_classes, *, lane=128):
    """Synthetic nn.Linear(in_features, n_classes) params (torch layout), kernel-prepped:
    weight transposed to (in_features, Np), zero-padded to lane-dense Np and stored bf16
    (halves weight DMA/VMEM; MXU is bf16-native).  f32 master copy kept for the reference."""
    kw, kb = jax.random.split(key)
    w = jax.random.normal(kw, (n_classes, in_features), jnp.float32) / jnp.sqrt(in_features)
    b = jax.random.normal(kb, (n_classes,), jnp.float32) * 0.01
    out_p = _round_up(n_classes, lane)
    w_pad = jnp.zeros((in_features, out_p), jnp.float32).at[:, :n_classes].set(w.T)
    b_pad = jnp.zeros((1, out_p), jnp.float32).at[0, :n_classes].set(b)
    return {"w_f32": w_pad, "w_bf16": w_pad.astype(jnp.bfloat16),
            "b": b_pad, "n_classes": n_classes}


def reference_forward_f32(feat, params):
    """Module semantics in full f32 (avgpool -> flatten -> fc) with the f32 master weights."""
    pooled = feat.astype(jnp.float32).mean(axis=(2, 3))
    out = pooled @ params["w_f32"] + params["b"]
    return out[:, :params["n_classes"]]


def reference_forward_kernel_dtypes(feat, params):
    """Same numerics as the kernel (f32 pooling, bf16 GEMM, f32 accumulation) in plain JAX."""
    pooled = feat.astype(jnp.float32).mean(axis=(2, 3)).astype(jnp.bfloat16)
    out = jnp.dot(pooled, params["w_bf16"], preferred_element_type=jnp.float32) + params["b"]
    return out[:, :params["n_classes"]]


if __name__ == "__main__":
    # Small stand-in for the layer4 feature map (a real ResNet50 produces (B, 2048, 7, 7)).
    B, C, H, W = 16, 256, 8, 8
    n_classes = 10

    key = jax.random.PRNGKey(0)
    kx, kp = jax.random.split(key)
    feat = jax.random.normal(kx, (B, C, H, W), jnp.float32)
    params = make_params(kp, C, n_classes)

    out = jax.block_until_ready(head_forward(feat, params))
    assert out.shape == (B, n_classes)

    # Numerics check against the identical bf16 math in plain JAX ...
    ref_same = reference_forward_kernel_dtypes(feat, params)
    assert jnp.allclose(out, ref_same, atol=2e-3, rtol=2e-3), "mismatch vs bf16 JAX reference"
    # ... and an accuracy check against the full-f32 module semantics (catches bf16 drift).
    ref_f32 = reference_forward_f32(feat, params)
    assert jnp.allclose(out, ref_f32, atol=2e-2, rtol=2e-2), "drift vs f32 module reference"

    print("KERNEL_OK")
</pallas_src>

<mosaic_0001>
module attributes {stable_mosaic.version = 11 : i64} {
  func.func @head_kernel(%arg0: i32, %arg1: memref<8x256x64xf32, #tpu.memory_space<vmem>>, %arg2: memref<256x128xbf16, #tpu.memory_space<vmem>>, %arg3: memref<1x128xf32, #tpu.memory_space<vmem>>, %arg4: memref<8x128xf32, #tpu.memory_space<vmem>>) attributes {dimension_semantics = [#tpu.dimension_semantics<parallel>], iteration_bounds = array<i64: 2>, scalar_prefetch = 0 : i64, scratch_operands = 0 : i64, tpu.core_type = #tpu.core_type<tc>, window_params = [{transform_indices = @transform_0, window_bounds = array<i64: 8, 256, 64>}, {pipeline_mode = #tpu.pipeline_mode<synchronous>, transform_indices = @transform_1, window_bounds = array<i64: 256, 128>}, {pipeline_mode = #tpu.pipeline_mode<synchronous>, transform_indices = @transform_2, window_bounds = array<i64: 1, 128>}, {transform_indices = @transform_3, window_bounds = array<i64: 8, 128>}]} {
    %c0 = arith.constant 0 : index
    %c0_0 = arith.constant 0 : index
    %c0_1 = arith.constant 0 : index
    %0 = vector.load %arg1[%c0, %c0_0, %c0_1] : memref<8x256x64xf32, #tpu.memory_space<vmem>>, vector<8x256x64xf32>
    %cst = arith.constant dense<0.000000e+00> : vector<8x256xf32>
    %1 = vector.multi_reduction <add>, %0, %cst [2] : vector<8x256x64xf32> to vector<8x256xf32>
    %cst_2 = arith.constant 1.562500e-02 : f32
    %2 = vector.broadcast %cst_2 : f32 to vector<8x256xf32>
    %3 = arith.mulf %1, %2 : vector<8x256xf32>
    %4 = arith.truncf %3 : vector<8x256xf32> to vector<8x256xbf16>
    %c0_3 = arith.constant 0 : index
    %c0_4 = arith.constant 0 : index
    %5 = vector.load %arg2[%c0_3, %c0_4] : memref<256x128xbf16, #tpu.memory_space<vmem>>, vector<256x128xbf16>
    %cst_5 = arith.constant dense<0.000000e+00> : vector<8x128xf32>
    %6 = tpu.matmul %4, %5, %cst_5 {dimension_numbers = #tpu.dot_dimension_numbers<[1], [0], [0], [1], [0, 0, 1, 1], [], []>} : vector<8x256xbf16>, vector<256x128xbf16>, vector<8x128xf32> -> vector<8x128xf32>
    %c0_6 = arith.constant 0 : index
    %c0_7 = arith.constant 0 : index
    %7 = vector.load %arg3[%c0_6, %c0_7] : memref<1x128xf32, #tpu.memory_space<vmem>>, vector<1x128xf32>
    %8 = vector.broadcast %7 : vector<1x128xf32> to vector<8x128xf32>
    %9 = arith.addf %6, %8 : vector<8x128xf32>
    %c0_8 = arith.constant 0 : index
    %c0_9 = arith.constant 0 : index
    %10 = vector.load %arg4[%c0_8, %c0_9] : memref<8x128xf32, #tpu.memory_space<vmem>>, vector<8x128xf32>
    tpu.vector_store %arg4[%c0_8, %c0_9], %9 {strides = array<i32>} : memref<8x128xf32, #tpu.memory_space<vmem>>, vector<8x128xf32>,
    return
  }
  func.func @transform_0(%arg0: i32) -> (i32, i32, i32) {
    %c0_i32 = arith.constant 0 : i32
    %c0_i32_0 = arith.constant 0 : i32
    %c0_i32_1 = arith.constant 0 : i32
    return %arg0, %c0_i32, %c0_i32_0 : i32, i32, i32
  }
  func.func @transform_1(%arg0: i32) -> (i32, i32) {
    %c0_i32 = arith.constant 0 : i32
    %c0_i32_0 = arith.constant 0 : i32
    %c0_i32_1 = arith.constant 0 : i32
    return %c0_i32, %c0_i32_0 : i32, i32
  }
  func.func @transform_2(%arg0: i32) -> (i32, i32) {
    %c0_i32 = arith.constant 0 : i32
    %c0_i32_0 = arith.constant 0 : i32
    %c0_i32_1 = arith.constant 0 : i32
    return %c0_i32, %c0_i32_0 : i32, i32
  }
  func.func @transform_3(%arg0: i32) -> (i32, i32) {
    %c0_i32 = arith.constant 0 : i32
    %c0_i32_0 = arith.constant 0 : i32
    return %arg0, %c0_i32 : i32, i32
  }
}

</mosaic_0001>

<bundles_post_ra>
// kernel: tpu_custom_call.1
= control target key start
LH: loop header
LB: loop body
LE: loop exit
PB: predicated region body
PF: predicated region fallthrough
CT: control target
= control target key end

     0   :  { %8 = vsyncpa [#allocation3], 0  ;;  %s5191_s0 = inlined_call_operand.vmem [shape: f32[16,256,64], index: 0, kind: input, shape index: {}]   ;;  %s5192_s1 = inlined_call_operand.vmem [shape: bf16[256,128], index: 1, kind: input, shape index: {}]   ;;  %s5193_s2 = inlined_call_operand.vmem [shape: f32[1,128], index: 2, kind: input, shape index: {}]   ;;  %s5194_s3 = inlined_call_operand.hbm [shape: f32[16,128], index: 3, kind: output, shape index: {}]  }
   0x1   :  { %10 = vsyncpa [#allocation3 + $0x1], 0  ;;  %s3730_s12 = smov 0   ;;  %s3732_s13 = smov 0  }
   0x2   :  { %s3734_s14 = smov 0   ;;  %s3736_s15 = smov 0  }
   0x3 LB: > { %s3751_s16 = sadd.s32 4294967295, %s3707_s15   ;;  %s3538_s17 = sadd.s32 4294967294, %s3707_s15   ;;  %s3707_s15 = sphi %s3736_s15, %s5227_s15   ;;  %s3703_s14 = sphi %s3734_s14, %s5226_s14   ;;  %s3699_s13 = sphi %s3732_s13, %s5225_s13   ;;  %s3695_s12 = sphi %s3730_s12, %s5224_s12  }
   0x4   : > { %s3755_s18 = sadd.s32 1, %s3707_s15   ;;  %s91_s19 = sadd.s32 1, %s3703_s14 }
   0x5   : > { %s88_s20 = ssub.s32 %s3707_s15, %s3755_s18  ;;  %p101_p0 = scmp.ne.s32.totalorder %s3703_s14, %s3699_s13 }
   0x6   : > { %p89_p1 = scmp.eq.s32.totalorder %s88_s20, 0  ;;  %p102_p2 = scmp.eq.s32.totalorder %s3751_s16, 1 }
   0x7   : > { %p107_p3 = scmp.ne.s32.totalorder %s3699_s13, %s3695_s12  ;;  %p108_p4 = scmp.eq.s32.totalorder %s3538_s17, 1 }
   0x8   : > { %s3766_s21 = scalar_select %p89_p1, %s3703_s14, %s91_s19  }
   0x9   : > { %p3768_p5 = por %p102_p2, %p101_p0  ;;  %p3772_p6 = por %p108_p4, %p107_p3 }
   0xa   : > { %p3541_p7 = scmp.ge.s32.totalorder %s3707_s15, 1  ;;  %p142_p8 = scmp.lt.s32.totalorder %s3707_s15, 3 }
   0xc   : > { %p143_p9 = pnand %p3541_p7, %p142_p8 }
   0xd   : > { %s3543_s24 = sshll.u32 (!%p143_p9), %s3751_s16, 3  ;;  %vm431_vm0 = vcmask (!%p143_p9), 523264   ;;  %vm2018_vm1 = vcmask (!%p143_p9), 130112   ;;  %vm2025_vm2 = vcmask (!%p143_p9), 195712   ;;  %vm2032_vm3 = vcmask (!%p143_p9), 261312   ;;  %s3564_s29 = sshll.u32 (!%p143_p9), %s3751_s16, 7 }
   0xe   : > { %146 = sbr.rel (%p143_p9) target bundleno = 921 (0x399), region = 32  ;;  %p168_p10 = scmp.lt.s32.totalorder (!%p143_p9), %s3543_s24, 15  ;;  %vm2039_vm4 = vcmask (!%p143_p9), 326912   ;;  %vm2046_vm5 = vcmask (!%p143_p9), 392512   ;;  %vm2053_vm6 = vcmask (!%p143_p9), 458112   ;;  %vm2060_vm7 = vcmask (!%p143_p9), 523712  }
   0xf   : > { %vm2067_vm8 = vcmask (!%p143_p9), 589312   ;;  %vm5196_vm9 = vcmask (!%p143_p9), 654912   ;;  %vm2081_vm10 = vcmask (!%p143_p9), 720512   ;;  %vm5195_vm11 = vcmask (!%p143_p9), 786112   ;;  %s5149_s7 = scalar_lea.hbm (!%p143_p9), %s5194_s3, %s3564_s29  ;;  %s3709_s16 = smov (!%p143_p9), [#allocation2]  }
  0x10   : > { %vm2095_vm12 = vcmask (!%p143_p9), 851712   ;;  %vm2102_vm13 = vcmask (!%p143_p9), 917312   ;;  %vm2109_vm14 = vcmask (!%p143_p9), 982912   ;;  %vm2116_vm15 = vcmask (!%p143_p9), 1048512   ;;  %s3649_s10 = sshll.u32 (!%p143_p9), %s3709_s16, 4  ;;  %s3650_s10 = int_to_ptr.vmem [resolvable:$false] %s3649_s10 }
  0x11   : > { %s3651_s11 = scalar_lea.vmem (!%p143_p9), %s3650_s10, 256 }
  0x15   : > { %s5229_s24 = smov (!%p168_p10, %s3543_s24), 15 }
  0x16   : > { %s3567_s25 = sshll.u32 %s5229_s24, 8 }
  0x17   : > { %s3782_s28 = scalar_lea.vmem %s5191_s0, %s3567_s25  ;;  %s164_s25 = sand.u32 1, %s3699_s13  }
  0x18   : > { %v177_v0 = vld [vmem:[%s3782_s28 + $0x10] sm:$0xff]  ;;  %v175_v1 = vld [vmem:[%s3782_s28] sm:$0xff]  ;;  %v178_v2 = vld [vmem:[%s3782_s28 + $0x18] sm:$0xff]  ;;  %s3542_s26 = sshll.u32 %s164_s25, 3  ;;  %s3466_s8 = scalar_lea.sflag [#allocation3], %s164_s25 }
  0x19   : > { %v438_v3 = vsel %vm431_vm0, %v177_v0, 0.0  ;;  %v432_v4 = vsel %vm431_vm0, %v175_v1, 0.0  ;;  %v176_v5 = vld [vmem:[%s3782_s28 + $0x8] sm:$0xff]  ;;  %v441_v6 = vsel %vm431_vm0, %v178_v2, 0.0  ;;  %v179_v9 = vld [vmem:[%s3782_s28 + $0x20] sm:$0xff]  ;;  %v182_v12 = vld [vmem:[%s3782_s28 + $0x38] sm:$0xff] }
  0x1a   : > { %439 = vadd.xlane.f32.xlu1 %v438_v3  ;;  %433 = vadd.xlane.f32.xlu0 %v432_v4  ;;  %v435_v7 = vsel %vm431_vm0, %v176_v5, 0.0  ;;  %v180_v8 = vld [vmem:[%s3782_s28 + $0x28] sm:$0xff]  ;;  %v444_v11 = vsel %vm431_vm0, %v179_v9, 0.0  ;;  %v181_v13 = vld [vmem:[%s3782_s28 + $0x30] sm:$0xff]  ;;  %v453_v14 = vsel %vm431_vm0, %v182_v12, 0.0  ;;  %v183_v17 = vld [vmem:[%s3782_s28 + $0x40] sm:$0xff] }
  0x1b   : > { %v447_v10 = vsel %vm431_vm0, %v180_v8, 0.0  ;;  %v450_v15 = vsel %vm431_vm0, %v181_v13, 0.0  ;;  %v184_v16 = vld [vmem:[%s3782_s28 + $0x48] sm:$0xff]  ;;  %v456_v19 = vsel %vm431_vm0, %v183_v17, 0.0  ;;  %v186_v20 = vld [vmem:[%s3782_s28 + $0x58] sm:$0xff]  ;;  %v185_v21 = vld [vmem:[%s3782_s28 + $0x50] sm:$0xff] }
  0x1c   : > { %v459_v18 = vsel %vm431_vm0, %v184_v16, 0.0  ;;  %v465_v22 = vsel %vm431_vm0, %v186_v20, 0.0  ;;  %v462_v23 = vsel %vm431_vm0, %v185_v21, 0.0  ;;  %v188_v24 = vld [vmem:[%s3782_s28 + $0x68] sm:$0xff]  ;;  %v187_v25 = vld [vmem:[%s3782_s28 + $0x60] sm:$0xff]  ;;  %v190_v28 = vld [vmem:[%s3782_s28 + $0x78] sm:$0xff] }
  0x1d   : > { %v471_v26 = vsel %vm431_vm0, %v188_v24, 0.0  ;;  %v468_v27 = vsel %vm431_vm0, %v187_v25, 0.0  ;;  %v189_v29 = vld [vmem:[%s3782_s28 + $0x70] sm:$0xff]  ;;  %v477_v30 = vsel %vm431_vm0, %v190_v28, 0.0  ;;  %v192_v32 = vld [vmem:[%s3782_s28 + $0x88] sm:$0xff]  ;;  %v191_v33 = vld [vmem:[%s3782_s28 + $0x80] sm:$0xff] }
  0x1e   : > { %442 = vadd.xlane.f32.xlu1 %v441_v6  ;;  %436 = vadd.xlane.f32.xlu0 %v435_v7  ;;  %v474_v31 = vsel %vm431_vm0, %v189_v29, 0.0  ;;  %v483_v34 = vsel %vm431_vm0, %v192_v32, 0.0  ;;  %v480_v35 = vsel %vm431_vm0, %v191_v33, 0.0  ;;  %v194_v36 = vld [vmem:[%s3782_s28 + $0x98] sm:$0xff]  ;;  %v193_v37 = vld [vmem:[%s3782_s28 + $0x90] sm:$0xff]  ;;  %v196_v39 = vld [vmem:[%s3782_s28 + $0xa8] sm:$0xff] }
  0x1f   : > { %v489_v38 = vsel %vm431_vm0, %v194_v36, 0.0  ;;  %v486_v40 = vsel %vm431_vm0, %v193_v37, 0.0  ;;  %v195_v41 = vld [vmem:[%s3782_s28 + $0xa0] sm:$0xff]  ;;  %v495_v42 = vsel %vm431_vm0, %v196_v39, 0.0  ;;  %v198_v44 = vld [vmem:[%s3782_s28 + $0xb8] sm:$0xff]  ;;  %v197_v45 = vld [vmem:[%s3782_s28 + $0xb0] sm:$0xff] }
  0x20   : > { %v492_v43 = vsel %vm431_vm0, %v195_v41, 0.0  ;;  %v501_v46 = vsel %vm431_vm0, %v198_v44, 0.0  ;;  %v498_v47 = vsel %vm431_vm0, %v197_v45, 0.0  ;;  %v200_v48 = vld [vmem:[%s3782_s28 + $0xc8] sm:$0xff]  ;;  %v199_v49 = vld [vmem:[%s3782_s28 + $0xc0] sm:$0xff]  ;;  %v202_v52 = vld [vmem:[%s3782_s28 + $0xd8] sm:$0xff] }
  0x21   : > { %v507_v50 = vsel %vm431_vm0, %v200_v48, 0.0  ;;  %v504_v51 = vsel %vm431_vm0, %v199_v49, 0.0  ;;  %v201_v53 = vld [vmem:[%s3782_s28 + $0xd0] sm:$0xff]  ;;  %v513_v54 = vsel %vm431_vm0, %v202_v52, 0.0  ;;  %v204_v56 = vld [vmem:[%s3782_s28 + $0xe8] sm:$0xff]  ;;  %v203_v57 = vld [vmem:[%s3782_s28 + $0xe0] sm:$0xff] }
  0x22   : > { %448 = vadd.xlane.f32.xlu1 %v447_v10  ;;  %445 = vadd.xlane.f32.xlu0 %v444_v11  ;;  %v510_v55 = vsel %vm431_vm0, %v201_v53, 0.0  ;;  %v519_v58 = vsel %vm431_vm0, %v204_v56, 0.0  ;;  %v516_v59 = vsel %vm431_vm0, %v203_v57, 0.0  ;;  %v206_v60 = vld [vmem:[%s3782_s28 + $0xf8] sm:$0xff]  ;;  %v205_v61 = vld [vmem:[%s3782_s28 + $0xf0] sm:$0xff]  ;;  %v208_v0 = vld [vmem:[%s3782_s28 + $0x108] sm:$0xff] }
  0x23   : > { %v525_v62 = vsel %vm431_vm0, %v206_v60, 0.0  ;;  %v522_v63 = vsel %vm431_vm0, %v205_v61, 0.0  ;;  %v207_v1 = vld [vmem:[%s3782_s28 + $0x100] sm:$0xff]  ;;  %v531_v2 = vsel %vm431_vm0, %v208_v0, 0.0  ;;  %v210_v4 = vld [vmem:[%s3782_s28 + $0x118] sm:$0xff]  ;;  %v209_v5 = vld [vmem:[%s3782_s28 + $0x110] sm:$0xff] }
  0x24   : > { %v528_v3 = vsel %vm431_vm0, %v207_v1, 0.0  ;;  %v537_v6 = vsel %vm431_vm0, %v210_v4, 0.0  ;;  %v534_v7 = vsel %vm431_vm0, %v209_v5, 0.0  ;;  %v212_v8 = vld [vmem:[%s3782_s28 + $0x128] sm:$0xff]  ;;  %v211_v9 = vld [vmem:[%s3782_s28 + $0x120] sm:$0xff]  ;;  %v214_v12 = vld [vmem:[%s3782_s28 + $0x138] sm:$0xff] }
  0x25   : > { %v543_v10 = vsel %vm431_vm0, %v212_v8, 0.0  ;;  %v540_v11 = vsel %vm431_vm0, %v211_v9, 0.0  ;;  %v213_v13 = vld [vmem:[%s3782_s28 + $0x130] sm:$0xff]  ;;  %v216_v16 = vld [vmem:[%s3782_s28 + $0x148] sm:$0xff]  ;;  %v215_v17 = vld [vmem:[%s3782_s28 + $0x140] sm:$0xff]  ;;  %s166_s30 = scalar_lea.vmem [#allocation2], %s3542_s26 }
  0x26   : > { %454 = vadd.xlane.f32.xlu1 %v453_v14  ;;  %451 = vadd.xlane.f32.xlu0 %v450_v15  ;;  %v549_v14 = vsel %vm431_vm0, %v214_v12, 0.0  ;;  %v546_v15 = vsel %vm431_vm0, %v213_v13, 0.0  ;;  %v218_v20 = vld [vmem:[%s3782_s28 + $0x158] sm:$0xff]  ;;  %v217_v21 = vld [vmem:[%s3782_s28 + $0x150] sm:$0xff]  ;;  %v220_v24 = vld [vmem:[%s3782_s28 + $0x168] sm:$0xff]  ;;  %v2007_v12 = vlaneseq  ;;  %s3479_s4 = sshll.u32 %s166_s30, 4  ;;  %s5151_s4 = int_to_ptr.vmem [resolvable:$true] %s3479_s4 }
  0x27   : > { %v219_v25 = vld [vmem:[%s3782_s28 + $0x160] sm:$0xff]  ;;  %v222_v28 = vld [vmem:[%s3782_s28 + $0x178] sm:$0xff]  ;;  %v221_v29 = vld [vmem:[%s3782_s28 + $0x170] sm:$0xff]  ;;  %s3645_s9 = scalar_lea.vmem %s5151_s4, 128  ;;  %p3652_p0 = scmp.lt.s32.totalorder %s5151_s4, %s3650_s10 }
  0x28   : > { %v224_v32 = vld [vmem:[%s3782_s28 + $0x188] sm:$0xff]  ;;  %v223_v33 = vld [vmem:[%s3782_s28 + $0x180] sm:$0xff]  ;;  %v226_v36 = vld [vmem:[%s3782_s28 + $0x198] sm:$0xff]  ;;  %p3646_p11 = scmp.ne.s32.totalorder %s5151_s4, %s3645_s9  ;;  %p3653_p1 = scmp.lt.s32.totalorder %s3651_s11, %s3645_s9 }
  0x29   : > { %v225_v37 = vld [vmem:[%s3782_s28 + $0x190] sm:$0xff]  ;;  %v227_v41 = vld [vmem:[%s3782_s28 + $0x1a0] sm:$0xff]  ;;  %v230_v44 = vld [vmem:[%s3782_s28 + $0x1b8] sm:$0xff] }
  0x2a   : > { %460 = vadd.xlane.f32.xlu1 %v459_v18  ;;  %457 = vadd.xlane.f32.xlu0 %v456_v19  ;;  %v555_v18 = vsel %vm431_vm0, %v216_v16, 0.0  ;;  %v552_v19 = vsel %vm431_vm0, %v215_v17, 0.0  ;;  %v582_v39 = vsel %vm431_vm0, %v225_v37, 0.0  ;;  %v229_v45 = vld [vmem:[%s3782_s28 + $0x1b0] sm:$0xff]  ;;  %v232_v48 = vld [vmem:[%s3782_s28 + $0x1c8] sm:$0xff]  ;;  %v231_v49 = vld [vmem:[%s3782_s28 + $0x1c0] sm:$0xff]  ;;  %p3647_p12 = pnand %p3646_p11, %p3768_p5  ;;  %p3654_p2 = por %p3653_p1, %p3652_p0 }
  0x2b   : > { %v234_v52 = vld [vmem:[%s3782_s28 + $0x1d8] sm:$0xff]  ;;  %v233_v53 = vld [vmem:[%s3782_s28 + $0x1d0] sm:$0xff]  ;;  %v236_v56 = vld [vmem:[%s3782_s28 + $0x1e8] sm:$0xff] }
  0x2c   : > { %v235_v57 = vld [vmem:[%s3782_s28 + $0x1e0] sm:$0xff]  ;;  %v238_v60 = vld [vmem:[%s3782_s28 + $0x1f8] sm:$0xff]  ;;  %v237_v61 = vld [vmem:[%s3782_s28 + $0x1f0] sm:$0xff]  ;;  %p3648_p13 = pneg %p3647_p12 }
  0x2d   : > { %v240_v0 = vld [vmem:[%s3782_s28 + $0x208] sm:$0xff]  ;;  %v239_v1 = vld [vmem:[%s3782_s28 + $0x200] sm:$0xff]  ;;  %v242_v4 = vld [vmem:[%s3782_s28 + $0x218] sm:$0xff] }
  0x2e   : > { %466 = vadd.xlane.f32.xlu1 %v465_v22  ;;  %463 = vadd.xlane.f32.xlu0 %v462_v23  ;;  %v561_v22 = vsel %vm431_vm0, %v218_v20, 0.0  ;;  %v558_v23 = vsel %vm431_vm0, %v217_v21, 0.0  ;;  %v241_v5 = vld [vmem:[%s3782_s28 + $0x210] sm:$0xff]  ;;  %v244_v8 = vld [vmem:[%s3782_s28 + $0x228] sm:$0xff]  ;;  %v243_v9 = vld [vmem:[%s3782_s28 + $0x220] sm:$0xff]  ;;  %v3932_v20 = vshrl.u32 %v2007_v12, 7  ;;  %p3655_p3 = pnand %p3654_p2, %p3648_p13 }
  0x2f   : > { %v246_v13 = vld [vmem:[%s3782_s28 + $0x238] sm:$0xff]  ;;  %v248_v17 = vld [vmem:[%s3782_s28 + $0x248] sm:$0xff] }
  0x30   : > { %v651_v21 = vsel %vm431_vm0, %v248_v17, 0.0 }
  0x32   : > { %472 = vadd.xlane.f32.xlu1 %v471_v26  ;;  %469 = vadd.xlane.f32.xlu0 %v468_v27  ;;  %v567_v26 = vsel %vm431_vm0, %v220_v24, 0.0  ;;  %v564_v27 = vsel %vm431_vm0, %v219_v25, 0.0 }
  0x36   : > { %478 = vadd.xlane.f32.xlu1 %v477_v30  ;;  %475 = vadd.xlane.f32.xlu0 %v474_v31  ;;  %v573_v30 = vsel %vm431_vm0, %v222_v28, 0.0  ;;  %v570_v31 = vsel %vm431_vm0, %v221_v29, 0.0  ;;  %v250_v28 = vld [vmem:[%s3782_s28 + $0x258] sm:$0xff]  ;;  %v249_v29 = vld [vmem:[%s3782_s28 + $0x250] sm:$0xff] }
  0x3a   : > { %484 = vadd.xlane.f32.xlu1 %v483_v34  ;;  %481 = vadd.xlane.f32.xlu0 %v480_v35  ;;  %v579_v34 = vsel %vm431_vm0, %v224_v32, 0.0  ;;  %v576_v35 = vsel %vm431_vm0, %v223_v33, 0.0  ;;  %v654_v32 = vsel %vm431_vm0, %v249_v29, 0.0 }
  0x3e   : > { %490 = vadd.xlane.f32.xlu1 %v489_v38  ;;  %487 = vadd.xlane.f32.xlu0 %v486_v40  ;;  %v585_v38 = vsel %vm431_vm0, %v226_v36, 0.0  ;;  %v228_v40 = vld [vmem:[%s3782_s28 + $0x1a8] sm:$0xff] }
  0x42   : > { %496 = vadd.xlane.f32.xlu1 %v495_v42  ;;  %493 = vadd.xlane.f32.xlu0 %v492_v43  ;;  %v591_v42 = vsel %vm431_vm0, %v228_v40, 0.0  ;;  %v588_v43 = vsel %vm431_vm0, %v227_v41, 0.0 }
  0x46   : > { %502 = vadd.xlane.f32.xlu1 %v501_v46  ;;  %499 = vadd.xlane.f32.xlu0 %v498_v47  ;;  %v597_v46 = vsel %vm431_vm0, %v230_v44, 0.0  ;;  %v594_v47 = vsel %vm431_vm0, %v229_v45, 0.0 }
  0x4a   : > { %508 = vadd.xlane.f32.xlu1 %v507_v50  ;;  %505 = vadd.xlane.f32.xlu0 %v504_v51  ;;  %v603_v50 = vsel %vm431_vm0, %v232_v48, 0.0  ;;  %v600_v51 = vsel %vm431_vm0, %v231_v49, 0.0 }
  0x4e   : > { %514 = vadd.xlane.f32.xlu1 %v513_v54  ;;  %511 = vadd.xlane.f32.xlu0 %v510_v55  ;;  %v609_v54 = vsel %vm431_vm0, %v234_v52, 0.0  ;;  %v606_v55 = vsel %vm431_vm0, %v233_v53, 0.0 }
  0x52   : > { %520 = vadd.xlane.f32.xlu1 %v519_v58  ;;  %517 = vadd.xlane.f32.xlu0 %v516_v59  ;;  %v615_v58 = vsel %vm431_vm0, %v236_v56, 0.0  ;;  %v612_v59 = vsel %vm431_vm0, %v235_v57, 0.0 }
  0x56   : > { %526 = vadd.xlane.f32.xlu1 %v525_v62  ;;  %523 = vadd.xlane.f32.xlu0 %v522_v63  ;;  %v621_v62 = vsel %vm431_vm0, %v238_v60, 0.0  ;;  %v618_v63 = vsel %vm431_vm0, %v237_v61, 0.0 }
  0x5a   : > { %532 = vadd.xlane.f32.xlu1 %v531_v2  ;;  %529 = vadd.xlane.f32.xlu0 %v528_v3  ;;  %v627_v2 = vsel %vm431_vm0, %v240_v0, 0.0  ;;  %v624_v3 = vsel %vm431_vm0, %v239_v1, 0.0 }
  0x5e   : > { %538 = vadd.xlane.f32.xlu1 %v537_v6  ;;  %535 = vadd.xlane.f32.xlu0 %v534_v7  ;;  %v633_v6 = vsel %vm431_vm0, %v242_v4, 0.0  ;;  %v630_v7 = vsel %vm431_vm0, %v241_v5, 0.0 }
  0x62   : > { %544 = vadd.xlane.f32.xlu1 %v543_v10  ;;  %541 = vadd.xlane.f32.xlu0 %v540_v11  ;;  %v639_v10 = vsel %vm431_vm0, %v244_v8, 0.0  ;;  %v636_v11 = vsel %vm431_vm0, %v243_v9, 0.0 }
  0x66   : > { %550 = vadd.xlane.f32.xlu1 %v549_v14  ;;  %547 = vadd.xlane.f32.xlu0 %v546_v15  ;;  %v245_v14 = vld [vmem:[%s3782_s28 + $0x230] sm:$0xff]  ;;  %v645_v15 = vsel %vm431_vm0, %v246_v13, 0.0 }
  0x67   : > { %v642_v16 = vsel %vm431_vm0, %v245_v14, 0.0 }
  0x6a   : > { %556 = vadd.xlane.f32.xlu1 %v555_v18  ;;  %553 = vadd.xlane.f32.xlu0 %v552_v19  ;;  %v3929_v18 = vand.u32 127, %v2007_v12  ;;  %v247_v19 = vld [vmem:[%s3782_s28 + $0x240] sm:$0xff] }
  0x6b   : > { %v648_v24 = vsel %vm431_vm0, %v247_v19, 0.0  ;;  %v255_v12 = vld [vmem:[%s3782_s28 + $0x280] sm:$0xff] }
  0x6c   : > { %v2020_v25 = vadd.s32 4294967280, %v3929_v18  ;;  %v2034_v33 = vadd.s32 4294967264, %v3929_v18  ;;  %v2041_v41 = vadd.s32 4294967256, %v3929_v18  ;;  %v2048_v49 = vadd.s32 4294967248, %v3929_v18 }
  0x6d   : > { %v2055_v53 = vadd.s32 4294967240, %v3929_v18 }
  0x6e   : > { %562 = vadd.xlane.f32.xlu1 %v561_v22  ;;  %559 = vadd.xlane.f32.xlu0 %v558_v23  ;;  %v3951_v36 = vsub.s32 %v2020_v25, %v3932_v20  ;;  %v3965_v52 = vsub.s32 %v2034_v33, %v3932_v20  ;;  %v3970_v56 = vsub.s32 %v2041_v41, %v3932_v20  ;;  %v2076_v33 = vadd.s32 4294967216, %v3929_v18  ;;  %v258_v41 = vld [vmem:[%s3782_s28 + $0x298] sm:$0xff] }
  0x6f   : > { %v3974_v1 = vsub.s32 %v2048_v49, %v3932_v20 }
  0x72   : > { %568 = vadd.xlane.f32.xlu1 %v567_v26  ;;  %565 = vadd.xlane.f32.xlu0 %v564_v27  ;;  %v2027_v26 = vadd.s32 4294967272, %v3929_v18  ;;  %v2013_v27 = vadd.s32 4294967288, %v3929_v18 }
  0x74   : > { %v3954_v37 = vsub.s32 %v2027_v26, %v3932_v20  ;;  %v672_v26 = vsel %vm431_vm0, %v255_v12, 0.0 }
  0x76   : > { %574 = vadd.xlane.f32.xlu1 %v573_v30  ;;  %571 = vadd.xlane.f32.xlu0 %v570_v31  ;;  %v3943_v30 = vsub.s32 %v3929_v18, %v3932_v20  ;;  %v657_v31 = vsel %vm431_vm0, %v250_v28, 0.0 }
  0x7a   : > { %580 = vadd.xlane.f32.xlu1 %v579_v34  ;;  %577 = vadd.xlane.f32.xlu0 %v576_v35  ;;  %v252_v34 = vld [vmem:[%s3782_s28 + $0x268] sm:$0xff]  ;;  %v251_v35 = vld [vmem:[%s3782_s28 + $0x260] sm:$0xff] }
  0x7b   : > { %v660_v48 = vsel %vm431_vm0, %v251_v35, 0.0 }
  0x7e   : > { %586 = vadd.xlane.f32.xlu1 %v585_v38  ;;  %583 = vadd.xlane.f32.xlu0 %v582_v39  ;;  %v3957_v39 = vsub.s32 %v2013_v27, %v3932_v20 }
  0x82   : > { %592 = vadd.xlane.f32.xlu1 %v591_v42  ;;  %589 = vadd.xlane.f32.xlu0 %v588_v43 }
  0x86   : > { %598 = vadd.xlane.f32.xlu1 %v597_v46  ;;  %595 = vadd.xlane.f32.xlu0 %v594_v47  ;;  %v254_v46 = vld [vmem:[%s3782_s28 + $0x278] sm:$0xff]  ;;  %v663_v47 = vsel %vm431_vm0, %v252_v34, 0.0 }
  0x8a   : > { %604 = vadd.xlane.f32.xlu1 %v603_v50  ;;  %601 = vadd.xlane.f32.xlu0 %v600_v51 }
  0x8e   : > { %610 = vadd.xlane.f32.xlu1 %v609_v54  ;;  %607 = vadd.xlane.f32.xlu0 %v606_v55  ;;  %v253_v54 = vld [vmem:[%s3782_s28 + $0x270] sm:$0xff] }
  0x92   : > { %616 = vadd.xlane.f32.xlu1 %v615_v58  ;;  %613 = vadd.xlane.f32.xlu0 %v612_v59  ;;  %v669_v58 = vsel %vm431_vm0, %v254_v46, 0.0 }
  0x96   : > { %622 = vadd.xlane.f32.xlu1 %v621_v62  ;;  %619 = vadd.xlane.f32.xlu0 %v618_v63 }
  0x9a   : > { %628 = vadd.xlane.f32.xlu1 %v627_v2  ;;  %625 = vadd.xlane.f32.xlu0 %v624_v3  ;;  %v666_v2 = vsel %vm431_vm0, %v253_v54, 0.0  ;;  %v681_v54 = vsel %vm431_vm0, %v258_v41, 0.0 }
  0x9e   : > { %634 = vadd.xlane.f32.xlu1 %v633_v6  ;;  %631 = vadd.xlane.f32.xlu0 %v630_v7  ;;  %v3981_v6 = vsub.s32 %v2055_v53, %v3932_v20 }
  0xa2   : > { %640 = vadd.xlane.f32.xlu1 %v639_v10  ;;  %637 = vadd.xlane.f32.xlu0 %v636_v11  ;;  %v2062_v10 = vadd.s32 4294967232, %v3929_v18  ;;  %v256_v11 = vld [vmem:[%s3782_s28 + $0x288] sm:$0xff] }
  0xa3   : > { %v675_v25 = vsel %vm431_vm0, %v256_v11, 0.0 }
  0xa6   : > { %646 = vadd.xlane.f32.xlu1 %v645_v15  ;;  %643 = vadd.xlane.f32.xlu0 %v642_v16 }
  0xa7   : > { %v440_v22 = vpop.xlane.xlu1 %439  ;;  %v434_v23 = vpop.xlane.xlu0 %433 }
  0xa8   : > { %v1202_v42 = vmul.f32 0.015625, %v440_v22  ;;  %v1200_v43 = vmul.f32 0.015625, %v434_v23  ;;  %v2069_v22 = vadd.s32 4294967224, %v3929_v18 }
  0xaa   : > { %652 = vadd.xlane.f32.xlu1 %v651_v21  ;;  %649 = vadd.xlane.f32.xlu0 %v648_v24 }
  0xab   : > { %v443_v38 = vpop.xlane.xlu1 %442  ;;  %v437_v40 = vpop.xlane.xlu0 %436 }
  0xac   : > { %v1203_v44 = vmul.f32 0.015625, %v443_v38  ;;  %v1201_v45 = vmul.f32 0.015625, %v437_v40 }
  0xae   : > { %v1457_v50 = vpack.c.bf16 %v1203_v44, %v1202_v42  ;;  %v1456_v51 = vpack.c.bf16 %v1201_v45, %v1200_v43  ;;  %658 = vadd.xlane.f32.xlu1 %v657_v31  ;;  %655 = vadd.xlane.f32.xlu0 %v654_v32  ;;  %v3996_v31 = vsub.s32 %v2062_v10, %v3932_v20  ;;  %v257_v42 = vld [vmem:[%s3782_s28 + $0x290] sm:$0xff]  ;;  %v2083_v45 = vadd.s32 4294967208, %v3929_v18 }
  0xaf   : > { %v449_v55 = vpop.xlane.xlu1 %448  ;;  %v446_v57 = vpop.xlane.xlu0 %445  ;;  %v4003_v44 = vsub.s32 %v2069_v22, %v3932_v20 }
  0xb0   : > { %v1753_v59 = vunpack.c.l.b16 %v1457_v50  ;;  %v1754_v60 = vunpack.c.h.b16 %v1457_v50  ;;  %v1751_v61 = vunpack.c.l.b16 %v1456_v51  ;;  %v1752_v62 = vunpack.c.h.b16 %v1456_v51 }
  0xb1   : > { %v1205_v63 = vmul.f32 0.015625, %v449_v55  ;;  %v1204_v0 = vmul.f32 0.015625, %v446_v57  ;;  %v4010_v51 = vsub.s32 %v2076_v33, %v3932_v20  ;;  %v678_v55 = vsel %vm431_vm0, %v257_v42, 0.0  ;;  %v264_v42 = vld [vmem:[%s3782_s28 + $0x2c8] sm:$0xff] }
  0xb2   : > { %v2024_v3 = vrot.slane %v1753_v59, %v3951_v36  ;;  %v2012_v4 = vrot.slane %v1751_v61, %v3943_v30  ;;  %v2017_v5 = vrot.slane %v1752_v62, %v3957_v39  ;;  %664 = vadd.xlane.f32.xlu1 %v663_v47  ;;  %661 = vadd.xlane.f32.xlu0 %v660_v48  ;;  %v260_v61 = vld [vmem:[%s3782_s28 + $0x2a8] sm:$0xff]  ;;  %v259_v62 = vld [vmem:[%s3782_s28 + $0x2a0] sm:$0xff] }
  0xb3   : > { %v1458_v7 = vpack.c.bf16 %v1205_v63, %v1204_v0  ;;  %v455_v8 = vpop.xlane.xlu1 %454  ;;  %v452_v9 = vpop.xlane.xlu0 %451  ;;  %v2031_v13 = vrot.slane %v1754_v60, %v3954_v37  ;;  %v4019_v0 = vsub.s32 %v2083_v45, %v3932_v20  ;;  %v687_v11 = vsel %vm431_vm0, %v260_v61, 0.0 }
  0xb4   : > { %v2019_v14 = vsel %vm2018_vm1, %v2017_v5, %v2012_v4  ;;  %v1207_v15 = vmul.f32 0.015625, %v455_v8  ;;  %v1206_v16 = vmul.f32 0.015625, %v452_v9  ;;  %v2090_v5 = vadd.s32 4294967200, %v3929_v18 }
  0xb5   : > { %v2026_v17 = vsel %vm2025_vm2, %v2024_v3, %v2019_v14  ;;  %v1755_v19 = vunpack.c.l.b16 %v1458_v7  ;;  %v1756_v21 = vunpack.c.h.b16 %v1458_v7  ;;  %v2097_v7 = vadd.s32 4294967192, %v3929_v18 }
  0xb6   : > { %v2033_v23 = vsel %vm2032_vm3, %v2031_v13, %v2026_v17  ;;  %v1459_v24 = vpack.c.bf16 %v1207_v15, %v1206_v16  ;;  %670 = vadd.xlane.f32.xlu1 %v669_v58  ;;  %667 = vadd.xlane.f32.xlu0 %v666_v2  ;;  %v684_v12 = vsel %vm431_vm0, %v259_v62, 0.0  ;;  %v2104_v16 = vadd.s32 4294967184, %v3929_v18  ;;  %v262_v17 = vld [vmem:[%s3782_s28 + $0x2b8] sm:$0xff] }
  0xb7   : > { %v2038_v27 = vrot.slane %v1755_v19, %v3965_v52  ;;  %v2045_v28 = vrot.slane %v1756_v21, %v3970_v56  ;;  %v461_v29 = vpop.xlane.xlu1 %460  ;;  %v458_v32 = vpop.xlane.xlu0 %457  ;;  %v261_v19 = vld [vmem:[%s3782_s28 + $0x2b0] sm:$0xff]  ;;  %v266_v62 = vld [vmem:[%s3782_s28 + $0x2d8] sm:$0xff] }
  0xb8   : > { %v1757_v34 = vunpack.c.l.b16 %v1459_v24  ;;  %v1758_v35 = vunpack.c.h.b16 %v1459_v24  ;;  %v1209_v38 = vmul.f32 0.015625, %v461_v29  ;;  %v1208_v40 = vmul.f32 0.015625, %v458_v32 }
  0xb9   : > { %v2040_v43 = vsel %vm2039_vm4, %v2038_v27, %v2033_v23  ;;  %v2111_v24 = vadd.s32 4294967176, %v3929_v18  ;;  %v693_v18 = vsel %vm431_vm0, %v262_v17, 0.0 }
  0xba   : > { %v2047_v46 = vsel %vm2046_vm5, %v2045_v28, %v2040_v43  ;;  %v2052_v47 = vrot.slane %v1757_v34, %v3974_v1  ;;  %v2059_v48 = vrot.slane %v1758_v35, %v3981_v6  ;;  %v1460_v49 = vpack.c.bf16 %v1209_v38, %v1208_v40  ;;  %676 = vadd.xlane.f32.xlu1 %v675_v25  ;;  %v263_v43 = vld [vmem:[%s3782_s28 + $0x2c0] sm:$0xff] }
  0xbb   : > { %673 = vadd.xlane.f32.xlu0 %v672_v26  ;;  %v467_v50 = vpop.xlane.xlu1 %466  ;;  %v464_v53 = vpop.xlane.xlu0 %463  ;;  %v4034_v25 = vsub.s32 %v2090_v5, %v3932_v20  ;;  %v4037_v26 = vsub.s32 %v2097_v7, %v3932_v20  ;;  %v690_v34 = vsel %vm431_vm0, %v261_v19, 0.0 }
  0xbc   : > { %v2054_v57 = vsel %vm2053_vm6, %v2052_v47, %v2047_v46  ;;  %v1759_v58 = vunpack.c.l.b16 %v1460_v49  ;;  %v1760_v59 = vunpack.c.h.b16 %v1460_v49  ;;  %v1211_v60 = vmul.f32 0.015625, %v467_v50 }
  0xbd   : > { %v2061_v63 = vsel %vm2060_vm7, %v2059_v48, %v2054_v57  ;;  %v1210_v2 = vmul.f32 0.015625, %v464_v53  ;;  %v4047_v46 = vsub.s32 %v2104_v16, %v3932_v20  ;;  %v4050_v47 = vsub.s32 %v2111_v24, %v3932_v20  ;;  %v267_v16 = vld [vmem:[%s3782_s28 + $0x2e0] sm:$0xff] }
  0xbe   : > { %v2066_v3 = vrot.slane %v1759_v58, %v3996_v31  ;;  %v2073_v4 = vrot.slane %v1760_v59, %v4003_v44  ;;  %682 = vadd.xlane.f32.xlu1 %v681_v54  ;;  %v699_v57 = vsel %vm431_vm0, %v264_v42, 0.0  ;;  %v696_v58 = vsel %vm431_vm0, %v263_v43, 0.0 }
  0xbf   : > { %v1461_v8 = vpack.c.bf16 %v1211_v60, %v1210_v2  ;;  %679 = vadd.xlane.f32.xlu0 %v678_v55  ;;  %v473_v9 = vpop.xlane.xlu1 %472  ;;  %v470_v10 = vpop.xlane.xlu0 %469 }
  0xc0   : > { %v2068_v13 = vsel %vm2067_vm8, %v2066_v3, %v2061_v63  ;;  %v1213_v14 = vmul.f32 0.015625, %v473_v9  ;;  %v1212_v15 = vmul.f32 0.015625, %v470_v10  ;;  %v265_v3 = vld [vmem:[%s3782_s28 + $0x2d0] sm:$0xff]  ;;  %v705_v10 = vsel %vm431_vm0, %v266_v62, 0.0 }
  0xc1   : > { %v2075_v21 = vsel %vm5196_vm9, %v2073_v4, %v2068_v13  ;;  %v1761_v22 = vunpack.c.l.b16 %v1461_v8  ;;  %v1762_v23 = vunpack.c.h.b16 %v1461_v8 }
  0xc2   : > { %v1462_v27 = vpack.c.bf16 %v1213_v14, %v1212_v15  ;;  %688 = vadd.xlane.f32.xlu1 %v687_v11  ;;  %v702_v14 = vsel %vm431_vm0, %v265_v3, 0.0  ;;  %v268_v15 = vld [vmem:[%s3782_s28 + $0x2e8] sm:$0xff] }
  0xc3   : > { %v2080_v28 = vrot.slane %v1761_v22, %v4010_v51  ;;  %v2087_v29 = vrot.slane %v1762_v23, %v4019_v0  ;;  %685 = vadd.xlane.f32.xlu0 %v684_v12  ;;  %v479_v32 = vpop.xlane.xlu1 %478  ;;  %v476_v33 = vpop.xlane.xlu0 %475 }
  0xc4   : > { %v1763_v35 = vunpack.c.l.b16 %v1462_v27  ;;  %v1764_v38 = vunpack.c.h.b16 %v1462_v27  ;;  %v1215_v40 = vmul.f32 0.015625, %v479_v32  ;;  %v1214_v41 = vmul.f32 0.015625, %v476_v33 }
  0xc5   : > { %v2082_v45 = vsel %vm2081_vm10, %v2080_v28, %v2075_v21  ;;  %v708_v32 = vsel %vm431_vm0, %v267_v16, 0.0 }
  0xc6   : > { %v2089_v48 = vsel %vm5195_vm11, %v2087_v29, %v2082_v45  ;;  %v2094_v49 = vrot.slane %v1763_v35, %v4034_v25  ;;  %v2101_v50 = vrot.slane %v1764_v38, %v4037_v26  ;;  %v1463_v53 = vpack.c.bf16 %v1215_v40, %v1214_v41  ;;  %694 = vadd.xlane.f32.xlu1 %v693_v18  ;;  %v270_v38 = vld [vmem:[%s3782_s28 + $0x2f8] sm:$0xff]  ;;  %v269_v40 = vld [vmem:[%s3782_s28 + $0x2f0] sm:$0xff] }
  0xc7   : > { %691 = vadd.xlane.f32.xlu0 %v690_v34  ;;  %v485_v54 = vpop.xlane.xlu1 %484  ;;  %v482_v55 = vpop.xlane.xlu0 %481  ;;  %v711_v29 = vsel %vm431_vm0, %v268_v15, 0.0 }
  0xc8   : > { %v2096_v59 = vsel %vm2095_vm12, %v2094_v49, %v2089_v48  ;;  %v1765_v20 = vunpack.c.l.b16 %v1463_v53  ;;  %v1766_v60 = vunpack.c.h.b16 %v1463_v53  ;;  %v1217_v61 = vmul.f32 0.015625, %v485_v54 }
  0xc9   : > { %v2103_v63 = vsel %vm2102_vm13, %v2101_v50, %v2096_v59  ;;  %v1216_v2 = vmul.f32 0.015625, %v482_v55  ;;  %v717_v50 = vsel %vm431_vm0, %v270_v38, 0.0  ;;  %v714_v53 = vsel %vm431_vm0, %v269_v40, 0.0  ;;  %v288_v59 = vld [vmem:[%s3782_s28 + $0x388] sm:$0xff] }
  0xca   : > { %v2108_v4 = vrot.slane %v1765_v20, %v4047_v46  ;;  %v2115_v5 = vrot.slane %v1766_v60, %v4050_v47  ;;  %700 = vadd.xlane.f32.xlu1 %v699_v57 }
  0xcb   : > { %v1464_v7 = vpack.c.bf16 %v1217_v61, %v1216_v2  ;;  %697 = vadd.xlane.f32.xlu0 %v696_v58  ;;  %v491_v8 = vpop.xlane.xlu1 %490  ;;  %v488_v9 = vpop.xlane.xlu0 %487  ;;  %v287_v61 = vld [vmem:[%s3782_s28 + $0x380] sm:$0xff] }
  0xcc   : > { %v2110_v11 = vsel %vm2109_vm14, %v2108_v4, %v2103_v63  ;;  %v1219_v12 = vmul.f32 0.015625, %v491_v8  ;;  %v1218_v13 = vmul.f32 0.015625, %v488_v9 }
  0xcd   : > { %v4069_v17 = vsel %vm2116_vm15, %v2115_v5, %v2110_v11  ;;  %v1767_v19 = vunpack.c.l.b16 %v1464_v7  ;;  %v1768_v21 = vunpack.c.h.b16 %v1464_v7  ;;  %v771_v5 = vsel %vm431_vm0, %v288_v59, 0.0  ;;  %v272_v11 = vld [vmem:[%s3782_s28 + $0x308] sm:$0xff] }
  0xce   : > { %v1465_v22 = vpack.c.bf16 %v1219_v12, %v1218_v13  ;;  %706 = vadd.xlane.f32.xlu1 %v705_v10  ;;  %v768_v10 = vsel %vm431_vm0, %v287_v61, 0.0  ;;  %v271_v12 = vld [vmem:[%s3782_s28 + $0x300] sm:$0xff] }
  0xcf   : > { %v2121_v23 = vrot.slane %v1767_v19, %v3943_v30  ;;  %v2125_v24 = vrot.slane %v1768_v21, %v3957_v39  ;;  %703 = vadd.xlane.f32.xlu0 %v702_v14  ;;  %v497_v27 = vpop.xlane.xlu1 %496  ;;  %v494_v28 = vpop.xlane.xlu0 %493 }
  0xd0   : > { %v1769_v33 = vunpack.c.l.b16 %v1465_v22  ;;  %v1770_v18 = vunpack.c.h.b16 %v1465_v22  ;;  %v1221_v34 = vmul.f32 0.015625, %v497_v27  ;;  %v1220_v35 = vmul.f32 0.015625, %v494_v28 }
  0xd1   : > { %v2126_v45 = vsel %vm2018_vm1, %v2125_v24, %v2121_v23  ;;  %v723_v24 = vsel %vm431_vm0, %v272_v11, 0.0  ;;  %v720_v27 = vsel %vm431_vm0, %v271_v12, 0.0 }
  0xd2   : > { %v2130_v41 = vrot.slane %v1769_v33, %v3951_v36  ;;  %v2135_v42 = vrot.slane %v1770_v18, %v3954_v37  ;;  %v1466_v43 = vpack.c.bf16 %v1221_v34, %v1220_v35  ;;  %712 = vadd.xlane.f32.xlu1 %v711_v29  ;;  %v290_v18 = vld [vmem:[%s3782_s28 + $0x398] sm:$0xff]  ;;  %v289_v34 = vld [vmem:[%s3782_s28 + $0x390] sm:$0xff] }
  0xd3   : > { %709 = vadd.xlane.f32.xlu0 %v708_v32  ;;  %v503_v48 = vpop.xlane.xlu1 %502  ;;  %v500_v49 = vpop.xlane.xlu0 %499 }
  0xd4   : > { %v2131_v54 = vsel %vm2025_vm2, %v2130_v41, %v2126_v45  ;;  %v1771_v55 = vunpack.c.l.b16 %v1466_v43  ;;  %v1772_v57 = vunpack.c.h.b16 %v1466_v43  ;;  %v1223_v58 = vmul.f32 0.015625, %v503_v48 }
  0xd5   : > { %v2136_v20 = vsel %vm2032_vm3, %v2135_v42, %v2131_v54  ;;  %v1222_v60 = vmul.f32 0.015625, %v500_v49  ;;  %v777_v48 = vsel %vm431_vm0, %v290_v18, 0.0  ;;  %v774_v49 = vsel %vm431_vm0, %v289_v34, 0.0 }
  0xd6   : > { %v2140_v62 = vrot.slane %v1771_v55, %v3965_v52  ;;  %v2145_v63 = vrot.slane %v1772_v57, %v3970_v56  ;;  %718 = vadd.xlane.f32.xlu1 %v717_v50  ;;  %v320_v57 = vld [vmem:[%s3782_s28 + $0x488] sm:$0xff] }
  0xd7   : > { %v1467_v2 = vpack.c.bf16 %v1223_v58, %v1222_v60  ;;  %715 = vadd.xlane.f32.xlu0 %v714_v53  ;;  %v509_v3 = vpop.xlane.xlu1 %508  ;;  %v506_v4 = vpop.xlane.xlu0 %505 }
  0xd8   : > { %v2141_v7 = vsel %vm2039_vm4, %v2140_v62, %v2136_v20  ;;  %v1225_v8 = vmul.f32 0.015625, %v509_v3  ;;  %v1224_v9 = vmul.f32 0.015625, %v506_v4  ;;  %v319_v20 = vld [vmem:[%s3782_s28 + $0x480] sm:$0xff]  ;;  %v867_v3 = vsel %vm431_vm0, %v320_v57, 0.0 }
  0xd9   : > { %v2146_v13 = vsel %vm2046_vm5, %v2145_v63, %v2141_v7  ;;  %v1773_v14 = vunpack.c.l.b16 %v1467_v2  ;;  %v1774_v15 = vunpack.c.h.b16 %v1467_v2 }
  0xda   : > { %v1468_v16 = vpack.c.bf16 %v1225_v8, %v1224_v9  ;;  %772 = vadd.xlane.f32.xlu1 %v771_v5  ;;  %v864_v8 = vsel %vm431_vm0, %v319_v20, 0.0  ;;  %v274_v9 = vld [vmem:[%s3782_s28 + $0x318] sm:$0xff] }
  0xdb   : > { %v2150_v19 = vrot.slane %v1773_v14, %v3974_v1  ;;  %v2155_v21 = vrot.slane %v1774_v15, %v3981_v6  ;;  %769 = vadd.xlane.f32.xlu0 %v768_v10  ;;  %v515_v22 = vpop.xlane.xlu1 %514  ;;  %v512_v23 = vpop.xlane.xlu0 %511  ;;  %v273_v10 = vld [vmem:[%s3782_s28 + $0x310] sm:$0xff] }
  0xdc   : > { %v1775_v28 = vunpack.c.l.b16 %v1468_v16  ;;  %v1776_v29 = vunpack.c.h.b16 %v1468_v16  ;;  %v1227_v32 = vmul.f32 0.015625, %v515_v22  ;;  %v1226_v33 = vmul.f32 0.015625, %v512_v23 }
  0xdd   : > { %v2151_v35 = vsel %vm2053_vm6, %v2150_v19, %v2146_v13  ;;  %v729_v22 = vsel %vm431_vm0, %v274_v9, 0.0  ;;  %v726_v23 = vsel %vm431_vm0, %v273_v10, 0.0 }
  0xde   : > { %v2156_v38 = vsel %vm2060_vm7, %v2155_v21, %v2151_v35  ;;  %v2160_v40 = vrot.slane %v1775_v28, %v3996_v31  ;;  %v2165_v41 = vrot.slane %v1776_v29, %v4003_v44  ;;  %v1469_v42 = vpack.c.bf16 %v1227_v32, %v1226_v33  ;;  %724 = vadd.xlane.f32.xlu1 %v723_v24  ;;  %v304_v32 = vld [vmem:[%s3782_s28 + $0x408] sm:$0xff]  ;;  %v303_v33 = vld [vmem:[%s3782_s28 + $0x400] sm:$0xff] }
  0xdf   : > { %721 = vadd.xlane.f32.xlu0 %v720_v27  ;;  %v521_v43 = vpop.xlane.xlu1 %520  ;;  %v518_v45 = vpop.xlane.xlu0 %517 }
  0xe0   : > { %v2161_v50 = vsel %vm2067_vm8, %v2160_v40, %v2156_v38  ;;  %v1777_v53 = vunpack.c.l.b16 %v1469_v42  ;;  %v1778_v54 = vunpack.c.h.b16 %v1469_v42  ;;  %v1229_v55 = vmul.f32 0.015625, %v521_v43 }
  0xe1   : > { %v2166_v58 = vsel %vm5196_vm9, %v2165_v41, %v2161_v50  ;;  %v1228_v59 = vmul.f32 0.015625, %v518_v45  ;;  %v819_v43 = vsel %vm431_vm0, %v304_v32, 0.0  ;;  %v816_v45 = vsel %vm431_vm0, %v303_v33, 0.0 }
  0xe2   : > { %v2170_v60 = vrot.slane %v1777_v53, %v4010_v51  ;;  %v2175_v61 = vrot.slane %v1778_v54, %v4019_v0  ;;  %778 = vadd.xlane.f32.xlu1 %v777_v48  ;;  %v322_v54 = vld [vmem:[%s3782_s28 + $0x498] sm:$0xff] }
  0xe3   : > { %v1470_v62 = vpack.c.bf16 %v1229_v55, %v1228_v59  ;;  %775 = vadd.xlane.f32.xlu0 %v774_v49  ;;  %v527_v63 = vpop.xlane.xlu1 %526  ;;  %v524_v2 = vpop.xlane.xlu0 %523 }
  0xe4   : > { %v2171_v4 = vsel %vm2081_vm10, %v2170_v60, %v2166_v58  ;;  %v1231_v5 = vmul.f32 0.015625, %v527_v63  ;;  %v1230_v7 = vmul.f32 0.015625, %v524_v2  ;;  %v321_v58 = vld [vmem:[%s3782_s28 + $0x490] sm:$0xff]  ;;  %v873_v63 = vsel %vm431_vm0, %v322_v54, 0.0  ;;  %v352_v2 = vld [vmem:[%s3782_s28 + $0x588] sm:$0xff] }
  0xe5   : > { %v2176_v11 = vsel %vm5195_vm11, %v2175_v61, %v2171_v4  ;;  %v1779_v12 = vunpack.c.l.b16 %v1470_v62  ;;  %v1780_v13 = vunpack.c.h.b16 %v1470_v62  ;;  %v305_v54 = vld [vmem:[%s3782_s28 + $0x410] sm:$0xff] }
  0xe6   : > { %v1471_v14 = vpack.c.bf16 %v1231_v5, %v1230_v7  ;;  %868 = vadd.xlane.f32.xlu1 %v867_v3  ;;  %v870_v5 = vsel %vm431_vm0, %v321_v58, 0.0  ;;  %v351_v7 = vld [vmem:[%s3782_s28 + $0x580] sm:$0xff] }
  0xe7   : > { %v2180_v15 = vrot.slane %v1779_v12, %v4034_v25  ;;  %v2185_v16 = vrot.slane %v1780_v13, %v4037_v26  ;;  %865 = vadd.xlane.f32.xlu0 %v864_v8  ;;  %v533_v19 = vpop.xlane.xlu1 %532  ;;  %v530_v21 = vpop.xlane.xlu0 %529 }
  0xe8   : > { %v1781_v24 = vunpack.c.l.b16 %v1471_v14  ;;  %v1782_v27 = vunpack.c.h.b16 %v1471_v14  ;;  %v1233_v28 = vmul.f32 0.015625, %v533_v19  ;;  %v1232_v29 = vmul.f32 0.015625, %v530_v21 }
  0xe9   : > { %v2181_v18 = vsel %vm2095_vm12, %v2180_v15, %v2176_v11  ;;  %v963_v11 = vsel %vm431_vm0, %v352_v2, 0.0  ;;  %v960_v19 = vsel %vm431_vm0, %v351_v7, 0.0 }
  0xea   : > { %v2186_v34 = vsel %vm2102_vm13, %v2185_v16, %v2181_v18  ;;  %v2190_v35 = vrot.slane %v1781_v24, %v4047_v46  ;;  %v2195_v38 = vrot.slane %v1782_v27, %v4050_v47  ;;  %v1472_v40 = vpack.c.bf16 %v1233_v28, %v1232_v29  ;;  %730 = vadd.xlane.f32.xlu1 %v729_v22  ;;  %v292_v27 = vld [vmem:[%s3782_s28 + $0x3a8] sm:$0xff]  ;;  %v291_v28 = vld [vmem:[%s3782_s28 + $0x3a0] sm:$0xff] }
  0xeb   : > { %727 = vadd.xlane.f32.xlu0 %v726_v23  ;;  %v539_v41 = vpop.xlane.xlu1 %538  ;;  %v536_v42 = vpop.xlane.xlu0 %535 }
  0xec   : > { %v2191_v48 = vsel %vm2109_vm14, %v2190_v35, %v2186_v34  ;;  %v1783_v49 = vunpack.c.l.b16 %v1472_v40  ;;  %v1784_v50 = vunpack.c.h.b16 %v1472_v40  ;;  %v1235_v53 = vmul.f32 0.015625, %v539_v41 }
  0xed   : > { %v4133_v55 = vsel %vm2116_vm15, %v2195_v38, %v2191_v48  ;;  %v1234_v57 = vmul.f32 0.015625, %v536_v42  ;;  %v783_v40 = vsel %vm431_vm0, %v292_v27, 0.0  ;;  %v780_v41 = vsel %vm431_vm0, %v291_v28, 0.0  ;;  %v353_v27 = vld [vmem:[%s3782_s28 + $0x590] sm:$0xff] }
  0xee   : > { %820 = vadd.xlane.f32.xlu1 %v819_v43  ;;  %v2200_v59 = vrot.slane %v1783_v49, %v3943_v30  ;;  %v2204_v20 = vrot.slane %v1784_v50, %v3957_v39  ;;  %v306_v49 = vld [vmem:[%s3782_s28 + $0x418] sm:$0xff] }
  0xef   : > { %v1473_v60 = vpack.c.bf16 %v1235_v53, %v1234_v57  ;;  %817 = vadd.xlane.f32.xlu0 %v816_v45  ;;  %v545_v61 = vpop.xlane.xlu1 %544  ;;  %v542_v62 = vpop.xlane.xlu0 %541 }
  0xf0   : > { %v1237_v3 = vmul.f32 0.015625, %v545_v61  ;;  %v1236_v4 = vmul.f32 0.015625, %v542_v62  ;;  %v2205_v12 = vsel %vm2018_vm1, %v2204_v20, %v2200_v59  ;;  %v825_v61 = vsel %vm431_vm0, %v306_v49, 0.0 }
  0xf1   : > { %v1785_v8 = vunpack.c.l.b16 %v1473_v60  ;;  %v1786_v9 = vunpack.c.h.b16 %v1473_v60 }
  0xf2   : > { %v1474_v10 = vpack.c.bf16 %v1237_v3, %v1236_v4  ;;  %874 = vadd.xlane.f32.xlu1 %v873_v63  ;;  %v822_v3 = vsel %vm431_vm0, %v305_v54, 0.0  ;;  %v336_v4 = vld [vmem:[%s3782_s28 + $0x508] sm:$0xff] }
  0xf3   : > { %v2209_v13 = vrot.slane %v1785_v8, %v3951_v36  ;;  %v2214_v14 = vrot.slane %v1786_v9, %v3954_v37  ;;  %871 = vadd.xlane.f32.xlu0 %v870_v5  ;;  %v551_v15 = vpop.xlane.xlu1 %550  ;;  %v548_v16 = vpop.xlane.xlu0 %547  ;;  %v335_v5 = vld [vmem:[%s3782_s28 + $0x500] sm:$0xff] }
  0xf4   : > { %v1787_v21 = vunpack.c.l.b16 %v1474_v10  ;;  %v1788_v22 = vunpack.c.h.b16 %v1474_v10  ;;  %v1239_v23 = vmul.f32 0.015625, %v551_v15  ;;  %v1238_v24 = vmul.f32 0.015625, %v548_v16 }
  0xf5   : > { %v2210_v29 = vsel %vm2025_vm2, %v2209_v13, %v2205_v12  ;;  %v915_v15 = vsel %vm431_vm0, %v336_v4, 0.0  ;;  %v912_v16 = vsel %vm431_vm0, %v335_v5, 0.0  ;;  %v275_v4 = vld [vmem:[%s3782_s28 + $0x320] sm:$0xff] }
  0xf6   : > { %v2215_v32 = vsel %vm2032_vm3, %v2214_v14, %v2210_v29  ;;  %v2219_v33 = vrot.slane %v1787_v21, %v3965_v52  ;;  %v2224_v18 = vrot.slane %v1788_v22, %v3970_v56  ;;  %v1475_v34 = vpack.c.bf16 %v1239_v23, %v1238_v24  ;;  %964 = vadd.xlane.f32.xlu1 %v963_v11  ;;  %v354_v24 = vld [vmem:[%s3782_s28 + $0x598] sm:$0xff] }
  0xf7   : > { %961 = vadd.xlane.f32.xlu0 %v960_v19  ;;  %v557_v35 = vpop.xlane.xlu1 %556  ;;  %v554_v38 = vpop.xlane.xlu0 %553 }
  0xf8   : > { %v2220_v42 = vsel %vm2039_vm4, %v2219_v33, %v2215_v32  ;;  %v1789_v43 = vunpack.c.l.b16 %v1475_v34  ;;  %v1790_v45 = vunpack.c.h.b16 %v1475_v34  ;;  %v1241_v48 = vmul.f32 0.015625, %v557_v35 }
  0xf9   : > { %v2225_v50 = vsel %vm2046_vm5, %v2224_v18, %v2220_v42  ;;  %v1240_v53 = vmul.f32 0.015625, %v554_v38  ;;  %v969_v38 = vsel %vm431_vm0, %v354_v24, 0.0 }
  0xfa   : > { %v2229_v57 = vrot.slane %v1789_v43, %v3974_v1  ;;  %v2234_v58 = vrot.slane %v1790_v45, %v3981_v6  ;;  %784 = vadd.xlane.f32.xlu1 %v783_v40  ;;  %v966_v40 = vsel %vm431_vm0, %v353_v27, 0.0  ;;  %v323_v27 = vld [vmem:[%s3782_s28 + $0x4a0] sm:$0xff] }
  0xfb   : > { %v1476_v59 = vpack.c.bf16 %v1241_v48, %v1240_v53  ;;  %781 = vadd.xlane.f32.xlu0 %v780_v41  ;;  %v563_v20 = vpop.xlane.xlu1 %562  ;;  %v560_v60 = vpop.xlane.xlu0 %559  ;;  %v384_v48 = vld [vmem:[%s3782_s28 + $0x688] sm:$0xff]  ;;  %v383_v53 = vld [vmem:[%s3782_s28 + $0x680] sm:$0xff] }
  0xfc   : > { %v2230_v62 = vsel %vm2053_vm6, %v2229_v57, %v2225_v50  ;;  %v1243_v63 = vmul.f32 0.015625, %v563_v20  ;;  %v1242_v2 = vmul.f32 0.015625, %v560_v60  ;;  %v1059_v60 = vsel %vm431_vm0, %v384_v48, 0.0 }
  0xfd   : > { %v2235_v7 = vsel %vm2060_vm7, %v2234_v58, %v2230_v62  ;;  %v1791_v8 = vunpack.c.l.b16 %v1476_v59  ;;  %v1792_v9 = vunpack.c.h.b16 %v1476_v59 }
  0xfe   : > { %v1477_v10 = vpack.c.bf16 %v1243_v63, %v1242_v2  ;;  %826 = vadd.xlane.f32.xlu1 %v825_v61  ;;  %v1056_v2 = vsel %vm431_vm0, %v383_v53, 0.0 }
  0xff   : > { %v2239_v11 = vrot.slane %v1791_v8, %v3996_v31  ;;  %v2244_v12 = vrot.slane %v1792_v9, %v4003_v44  ;;  %823 = vadd.xlane.f32.xlu0 %v822_v3  ;;  %v569_v13 = vpop.xlane.xlu1 %568  ;;  %v566_v14 = vpop.xlane.xlu0 %565  ;;  %v276_v3 = vld [vmem:[%s3782_s28 + $0x328] sm:$0xff] }
 0x100   : > { %v1793_v19 = vunpack.c.l.b16 %v1477_v10  ;;  %v1794_v21 = vunpack.c.h.b16 %v1477_v10  ;;  %v1245_v22 = vmul.f32 0.015625, %v569_v13  ;;  %v1244_v23 = vmul.f32 0.015625, %v566_v14 }
 0x101   : > { %v2240_v28 = vsel %vm2067_vm8, %v2239_v11, %v2235_v7  ;;  %v735_v14 = vsel %vm431_vm0, %v276_v3, 0.0 }
 0x102   : > { %v2245_v29 = vsel %vm5196_vm9, %v2244_v12, %v2240_v28  ;;  %v2249_v32 = vrot.slane %v1793_v19, %v4010_v51  ;;  %v2254_v33 = vrot.slane %v1794_v21, %v4019_v0  ;;  %v1478_v18 = vpack.c.bf16 %v1245_v22, %v1244_v23  ;;  %916 = vadd.xlane.f32.xlu1 %v915_v15  ;;  %v324_v23 = vld [vmem:[%s3782_s28 + $0x4a8] sm:$0xff] }
 0x103   : > { %913 = vadd.xlane.f32.xlu0 %v912_v16  ;;  %v575_v34 = vpop.xlane.xlu1 %574  ;;  %v572_v35 = vpop.xlane.xlu0 %571  ;;  %v732_v15 = vsel %vm431_vm0, %v275_v4, 0.0 }
 0x104   : > { %v2250_v41 = vsel %vm2081_vm10, %v2249_v32, %v2245_v29  ;;  %v1795_v42 = vunpack.c.l.b16 %v1478_v18  ;;  %v1796_v43 = vunpack.c.h.b16 %v1478_v18  ;;  %v1247_v45 = vmul.f32 0.015625, %v575_v34 }
 0x105   : > { %v2255_v49 = vsel %vm5195_vm11, %v2254_v33, %v2250_v41  ;;  %v1246_v50 = vmul.f32 0.015625, %v572_v35  ;;  %vm3303_vm11 = vcmask 1041409  }
 0x106   : > { %v2259_v54 = vrot.slane %v1795_v42, %v4034_v25  ;;  %v2264_v57 = vrot.slane %v1796_v43, %v4037_v26  ;;  %970 = vadd.xlane.f32.xlu1 %v969_v38  ;;  %v879_v38 = vsel %vm431_vm0, %v324_v23, 0.0  ;;  %v876_v43 = vsel %vm431_vm0, %v323_v27, 0.0 }
 0x107   : > { %v1479_v58 = vpack.c.bf16 %v1247_v45, %v1246_v50  ;;  %967 = vadd.xlane.f32.xlu0 %v966_v40  ;;  %v581_v59 = vpop.xlane.xlu1 %580  ;;  %v578_v20 = vpop.xlane.xlu0 %577  ;;  %v338_v45 = vld [vmem:[%s3782_s28 + $0x518] sm:$0xff] }
 0x108   : > { %v2260_v61 = vsel %vm2095_vm12, %v2259_v54, %v2255_v49  ;;  %v1249_v62 = vmul.f32 0.015625, %v581_v59  ;;  %v1248_v63 = vmul.f32 0.015625, %v578_v20  ;;  %v921_v59 = vsel %vm431_vm0, %v338_v45, 0.0 }
 0x109   : > { %v2265_v5 = vsel %vm2102_vm13, %v2264_v57, %v2260_v61  ;;  %v1797_v7 = vunpack.c.l.b16 %v1479_v58  ;;  %v1798_v8 = vunpack.c.h.b16 %v1479_v58 }
 0x10a   : > { %v1480_v9 = vpack.c.bf16 %v1249_v62, %v1248_v63  ;;  %1060 = vadd.xlane.f32.xlu1 %v1059_v60  ;;  %v368_v63 = vld [vmem:[%s3782_s28 + $0x608] sm:$0xff] }
 0x10b   : > { %v2269_v10 = vrot.slane %v1797_v7, %v4047_v46  ;;  %v2274_v11 = vrot.slane %v1798_v8, %v4050_v47  ;;  %1057 = vadd.xlane.f32.xlu0 %v1056_v2  ;;  %v587_v12 = vpop.xlane.xlu1 %586  ;;  %v584_v13 = vpop.xlane.xlu0 %583  ;;  %v367_v2 = vld [vmem:[%s3782_s28 + $0x600] sm:$0xff] }
 0x10c   : > { %v1799_v16 = vunpack.c.l.b16 %v1480_v9  ;;  %v1800_v19 = vunpack.c.h.b16 %v1480_v9  ;;  %v1251_v21 = vmul.f32 0.015625, %v587_v12  ;;  %v1250_v22 = vmul.f32 0.015625, %v584_v13 }
 0x10d   : > { %v2270_v24 = vsel %vm2109_vm14, %v2269_v10, %v2265_v5  ;;  %v1011_v12 = vsel %vm431_vm0, %v368_v63, 0.0  ;;  %v1008_v13 = vsel %vm431_vm0, %v367_v2, 0.0  ;;  %v293_v63 = vld [vmem:[%s3782_s28 + $0x3b0] sm:$0xff] }
 0x10e   : > { %v2275_v28 = vsel %vm2116_vm15, %v2274_v11, %v2270_v24  ;;  %v1481_v29 = vpack.c.bf16 %v1251_v21, %v1250_v22  ;;  %736 = vadd.xlane.f32.xlu1 %v735_v14  ;;  %v2279_v33 = vrot.slane %v1799_v16, %v3943_v30  ;;  %v2283_v18 = vrot.slane %v1800_v19, %v3957_v39  ;;  %v386_v21 = vld [vmem:[%s3782_s28 + $0x698] sm:$0xff]  ;;  %v385_v22 = vld [vmem:[%s3782_s28 + $0x690] sm:$0xff] }
 0x10f   : > { %v4201_v32 = vsel %vm3303_vm11, %v2275_v28, %v4069_v17  ;;  %733 = vadd.xlane.f32.xlu0 %v732_v15  ;;  %v593_v34 = vpop.xlane.xlu1 %592  ;;  %v590_v35 = vpop.xlane.xlu0 %589  ;;  %v337_v17 = vld [vmem:[%s3782_s28 + $0x510] sm:$0xff] }
 0x110   : > { %v1801_v40 = vunpack.c.l.b16 %v1481_v29  ;;  %v1802_v41 = vunpack.c.h.b16 %v1481_v29  ;;  %v1253_v42 = vmul.f32 0.015625, %v593_v34  ;;  %v1252_v48 = vmul.f32 0.015625, %v590_v35 }
 0x111   : > { %v2284_v53 = vsel %vm2018_vm1, %v2283_v18, %v2279_v33  ;;  %v918_v62 = vsel %vm431_vm0, %v337_v17, 0.0  ;;  %v1065_v34 = vsel %vm431_vm0, %v386_v21, 0.0  ;;  %v1062_v35 = vsel %vm431_vm0, %v385_v22, 0.0  ;;  %v415_v17 = vld [vmem:[%s3782_s28 + $0x780] sm:$0xff] }
 0x112   : > { %v2288_v49 = vrot.slane %v1801_v40, %v3951_v36  ;;  %v2293_v50 = vrot.slane %v1802_v41, %v3954_v37  ;;  %880 = vadd.xlane.f32.xlu1 %v879_v38  ;;  %v1482_v54 = vpack.c.bf16 %v1253_v42, %v1252_v48  ;;  %v307_v21 = vld [vmem:[%s3782_s28 + $0x420] sm:$0xff] }
 0x113   : > { %877 = vadd.xlane.f32.xlu0 %v876_v43  ;;  %v599_v57 = vpop.xlane.xlu1 %598  ;;  %v596_v58 = vpop.xlane.xlu0 %595  ;;  %v416_v43 = vld [vmem:[%s3782_s28 + $0x788] sm:$0xff] }
 0x114   : > { %v2289_v20 = vsel %vm2025_vm2, %v2288_v49, %v2284_v53  ;;  %v1255_v60 = vmul.f32 0.015625, %v599_v57  ;;  %v1254_v61 = vmul.f32 0.015625, %v596_v58  ;;  %v1803_v4 = vunpack.c.l.b16 %v1482_v54 }
 0x115   : > { %v2294_v3 = vsel %vm2032_vm3, %v2293_v50, %v2289_v20  ;;  %v1804_v5 = vunpack.c.h.b16 %v1482_v54  ;;  %v1155_v58 = vsel %vm431_vm0, %v416_v43, 0.0 }
 0x116   : > { %v1483_v7 = vpack.c.bf16 %v1255_v60, %v1254_v61  ;;  %922 = vadd.xlane.f32.xlu1 %v921_v59  ;;  %v2298_v8 = vrot.slane %v1803_v4, %v3965_v52  ;;  %v1152_v61 = vsel %vm431_vm0, %v415_v17, 0.0 }
 0x117   : > { %v2303_v9 = vrot.slane %v1804_v5, %v3970_v56  ;;  %919 = vadd.xlane.f32.xlu0 %v918_v62  ;;  %v605_v10 = vpop.xlane.xlu1 %604  ;;  %v602_v11 = vpop.xlane.xlu0 %601  ;;  %v294_v62 = vld [vmem:[%s3782_s28 + $0x3b8] sm:$0xff] }
 0x118   : > { %v1805_v14 = vunpack.c.l.b16 %v1483_v7  ;;  %v1806_v15 = vunpack.c.h.b16 %v1483_v7  ;;  %v1257_v16 = vmul.f32 0.015625, %v605_v10  ;;  %v1256_v19 = vmul.f32 0.015625, %v602_v11 }
 0x119   : > { %v2299_v23 = vsel %vm2039_vm4, %v2298_v8, %v2294_v3  ;;  %v789_v11 = vsel %vm431_vm0, %v294_v62, 0.0  ;;  %v369_v62 = vld [vmem:[%s3782_s28 + $0x610] sm:$0xff] }
 0x11a   : > { %v2304_v24 = vsel %vm2046_vm5, %v2303_v9, %v2299_v23  ;;  %v2308_v27 = vrot.slane %v1805_v14, %v3974_v1  ;;  %v2313_v28 = vrot.slane %v1806_v15, %v3981_v6  ;;  %v1484_v29 = vpack.c.bf16 %v1257_v16, %v1256_v19  ;;  %1012 = vadd.xlane.f32.xlu1 %v1011_v12  ;;  %v308_v19 = vld [vmem:[%s3782_s28 + $0x428] sm:$0xff] }
 0x11b   : > { %1009 = vadd.xlane.f32.xlu0 %v1008_v13  ;;  %v611_v33 = vpop.xlane.xlu1 %610  ;;  %v608_v18 = vpop.xlane.xlu0 %607  ;;  %v786_v12 = vsel %vm431_vm0, %v293_v63, 0.0 }
 0x11c   : > { %v2309_v38 = vsel %vm2053_vm6, %v2308_v27, %v2304_v24  ;;  %v1807_v40 = vunpack.c.l.b16 %v1484_v29  ;;  %v1808_v41 = vunpack.c.h.b16 %v1484_v29  ;;  %v1259_v42 = vmul.f32 0.015625, %v611_v33 }
 0x11d   : > { %v2314_v45 = vsel %vm2060_vm7, %v2313_v28, %v2309_v38  ;;  %v1258_v48 = vmul.f32 0.015625, %v608_v18  ;;  %v831_v18 = vsel %vm431_vm0, %v308_v19, 0.0  ;;  %v400_v19 = vld [vmem:[%s3782_s28 + $0x708] sm:$0xff] }
 0x11e   : > { %v2318_v49 = vrot.slane %v1807_v40, %v3996_v31  ;;  %v2323_v50 = vrot.slane %v1808_v41, %v4003_v44  ;;  %1066 = vadd.xlane.f32.xlu1 %v1065_v34  ;;  %v828_v34 = vsel %vm431_vm0, %v307_v21, 0.0  ;;  %v399_v21 = vld [vmem:[%s3782_s28 + $0x700] sm:$0xff] }
 0x11f   : > { %v1485_v53 = vpack.c.bf16 %v1259_v42, %v1258_v48  ;;  %1063 = vadd.xlane.f32.xlu0 %v1062_v35  ;;  %v617_v54 = vpop.xlane.xlu1 %616  ;;  %v614_v57 = vpop.xlane.xlu0 %613  ;;  %v356_v42 = vld [vmem:[%s3782_s28 + $0x5a8] sm:$0xff]  ;;  %v355_v48 = vld [vmem:[%s3782_s28 + $0x5a0] sm:$0xff] }
 0x120   : > { %v2319_v59 = vsel %vm2067_vm8, %v2318_v49, %v2314_v45  ;;  %v1261_v20 = vmul.f32 0.015625, %v617_v54  ;;  %v1260_v60 = vmul.f32 0.015625, %v614_v57  ;;  %v975_v57 = vsel %vm431_vm0, %v356_v42, 0.0 }
 0x121   : > { %v2324_v2 = vsel %vm5196_vm9, %v2323_v50, %v2319_v59  ;;  %v1809_v3 = vunpack.c.l.b16 %v1485_v53  ;;  %v1810_v4 = vunpack.c.h.b16 %v1485_v53  ;;  %vm5199_vm9 = vcmask 786112  }
 0x122   : > { %v1486_v5 = vpack.c.bf16 %v1261_v20, %v1260_v60  ;;  %1156 = vadd.xlane.f32.xlu1 %v1155_v58  ;;  %v972_v60 = vsel %vm431_vm0, %v355_v48, 0.0 }
 0x123   : > { %v2328_v7 = vrot.slane %v1809_v3, %v4010_v51  ;;  %v2333_v8 = vrot.slane %v1810_v4, %v4019_v0  ;;  %1153 = vadd.xlane.f32.xlu0 %v1152_v61  ;;  %v623_v9 = vpop.xlane.xlu1 %622  ;;  %v620_v10 = vpop.xlane.xlu0 %619  ;;  %v370_v61 = vld [vmem:[%s3782_s28 + $0x618] sm:$0xff] }
 0x124   : > { %v1811_v13 = vunpack.c.l.b16 %v1486_v5  ;;  %v1812_v14 = vunpack.c.h.b16 %v1486_v5  ;;  %v1263_v15 = vmul.f32 0.015625, %v623_v9  ;;  %v1262_v16 = vmul.f32 0.015625, %v620_v10 }
 0x125   : > { %v2329_v22 = vsel %vm2081_vm10, %v2328_v7, %v2324_v2 }
 0x126   : > { %v2334_v23 = vsel %vm5199_vm9, %v2333_v8, %v2329_v22  ;;  %v2338_v24 = vrot.slane %v1811_v13, %v4034_v25  ;;  %v2343_v27 = vrot.slane %v1812_v14, %v4037_v26  ;;  %v1487_v28 = vpack.c.bf16 %v1263_v15, %v1262_v16  ;;  %790 = vadd.xlane.f32.xlu1 %v789_v11 }
 0x127   : > { %787 = vadd.xlane.f32.xlu0 %v786_v12  ;;  %v629_v29 = vpop.xlane.xlu1 %628  ;;  %v626_v33 = vpop.xlane.xlu0 %625  ;;  %v1017_v11 = vsel %vm431_vm0, %v370_v61, 0.0  ;;  %v1014_v12 = vsel %vm431_vm0, %v369_v62, 0.0  ;;  %vm5200_vm9 = vcmask 654912  }
 0x128   : > { %v2339_v35 = vsel %vm2095_vm12, %v2338_v24, %v2334_v23  ;;  %v1813_v38 = vunpack.c.l.b16 %v1487_v28  ;;  %v1814_v40 = vunpack.c.h.b16 %v1487_v28  ;;  %v1265_v41 = vmul.f32 0.015625, %v629_v29 }
 0x129   : > { %v2344_v43 = vsel %vm2102_vm13, %v2343_v27, %v2339_v35  ;;  %v1264_v45 = vmul.f32 0.015625, %v626_v33  ;;  %v1107_v29 = vsel %vm431_vm0, %v400_v19, 0.0  ;;  %v1104_v33 = vsel %vm431_vm0, %v399_v21, 0.0 }
 0x12a   : > { %v2348_v17 = vrot.slane %v1813_v38, %v4047_v46  ;;  %v2353_v49 = vrot.slane %v1814_v40, %v4050_v47  ;;  %832 = vadd.xlane.f32.xlu1 %v831_v18  ;;  %v418_v40 = vld [vmem:[%s3782_s28 + $0x798] sm:$0xff] }
 0x12b   : > { %v1488_v50 = vpack.c.bf16 %v1265_v41, %v1264_v45  ;;  %829 = vadd.xlane.f32.xlu0 %v828_v34  ;;  %v635_v53 = vpop.xlane.xlu1 %634  ;;  %v632_v54 = vpop.xlane.xlu0 %631 }
 0x12c   : > { %v2349_v58 = vsel %vm2109_vm14, %v2348_v17, %v2344_v43  ;;  %v1267_v59 = vmul.f32 0.015625, %v635_v53  ;;  %v1266_v20 = vmul.f32 0.015625, %v632_v54  ;;  %v417_v43 = vld [vmem:[%s3782_s28 + $0x790] sm:$0xff]  ;;  %v1161_v53 = vsel %vm431_vm0, %v418_v40, 0.0 }
 0x12d   : > { %v2354_v63 = vsel %vm2116_vm15, %v2353_v49, %v2349_v58  ;;  %v1815_v2 = vunpack.c.l.b16 %v1488_v50  ;;  %v1816_v3 = vunpack.c.h.b16 %v1488_v50 }
 0x12e   : > { %v1489_v4 = vpack.c.bf16 %v1267_v59, %v1266_v20  ;;  %976 = vadd.xlane.f32.xlu1 %v975_v57  ;;  %v4268_v5 = vsel %vm3303_vm11, %v2354_v63, %v4133_v55  ;;  %v1158_v59 = vsel %vm431_vm0, %v417_v43, 0.0  ;;  %v278_v20 = vld [vmem:[%s3782_s28 + $0x338] sm:$0xff]  ;;  %vm5201_vm11 = vcmask 786112  }
 0x12f   : > { %v2358_v7 = vrot.slane %v1815_v2, %v3943_v30  ;;  %v2362_v8 = vrot.slane %v1816_v3, %v3957_v39  ;;  %973 = vadd.xlane.f32.xlu0 %v972_v60  ;;  %v641_v9 = vpop.xlane.xlu1 %640  ;;  %v638_v10 = vpop.xlane.xlu0 %637  ;;  %v277_v60 = vld [vmem:[%s3782_s28 + $0x330] sm:$0xff] }
 0x130   : > { %v1817_v13 = vunpack.c.l.b16 %v1489_v4  ;;  %v1818_v14 = vunpack.c.h.b16 %v1489_v4  ;;  %v1269_v15 = vmul.f32 0.015625, %v641_v9  ;;  %v1268_v16 = vmul.f32 0.015625, %v638_v10 }
 0x131   : > { %v2363_v24 = vsel %vm2018_vm1, %v2362_v8, %v2358_v7  ;;  %v741_v9 = vsel %vm431_vm0, %v278_v20, 0.0  ;;  %v738_v10 = vsel %vm431_vm0, %v277_v60, 0.0 }
 0x132   : > { %v2367_v55 = vrot.slane %v1817_v13, %v3951_v36  ;;  %v2372_v22 = vrot.slane %v1818_v14, %v3954_v37  ;;  %v1490_v23 = vpack.c.bf16 %v1269_v15, %v1268_v16  ;;  %1018 = vadd.xlane.f32.xlu1 %v1017_v11  ;;  %v326_v15 = vld [vmem:[%s3782_s28 + $0x4b8] sm:$0xff]  ;;  %v325_v16 = vld [vmem:[%s3782_s28 + $0x4b0] sm:$0xff] }
 0x133   : > { %1015 = vadd.xlane.f32.xlu0 %v1014_v12  ;;  %v647_v27 = vpop.xlane.xlu1 %646  ;;  %v644_v28 = vpop.xlane.xlu0 %643 }
 0x134   : > { %v2368_v18 = vsel %vm2025_vm2, %v2367_v55, %v2363_v24  ;;  %v1819_v34 = vunpack.c.l.b16 %v1490_v23  ;;  %v1820_v35 = vunpack.c.h.b16 %v1490_v23  ;;  %v1271_v38 = vmul.f32 0.015625, %v647_v27 }
 0x135   : > { %v2373_v41 = vsel %vm2032_vm3, %v2372_v22, %v2368_v18  ;;  %v1270_v42 = vmul.f32 0.015625, %v644_v28  ;;  %v885_v27 = vsel %vm431_vm0, %v326_v15, 0.0  ;;  %v882_v28 = vsel %vm431_vm0, %v325_v16, 0.0  ;;  %v401_v16 = vld [vmem:[%s3782_s28 + $0x710] sm:$0xff] }
 0x136   : > { %v2377_v45 = vrot.slane %v1819_v34, %v3965_v52  ;;  %v2382_v48 = vrot.slane %v1820_v35, %v3970_v56  ;;  %1108 = vadd.xlane.f32.xlu1 %v1107_v29 }
 0x137   : > { %v1491_v17 = vpack.c.bf16 %v1271_v38, %v1270_v42  ;;  %1105 = vadd.xlane.f32.xlu0 %v1104_v33  ;;  %v653_v49 = vpop.xlane.xlu1 %652  ;;  %v650_v50 = vpop.xlane.xlu0 %649  ;;  %v340_v38 = vld [vmem:[%s3782_s28 + $0x528] sm:$0xff]  ;;  %v339_v42 = vld [vmem:[%s3782_s28 + $0x520] sm:$0xff] }
 0x138   : > { %v2378_v54 = vsel %vm2039_vm4, %v2377_v45, %v2373_v41  ;;  %v1273_v57 = vmul.f32 0.015625, %v653_v49  ;;  %v1272_v58 = vmul.f32 0.015625, %v650_v50  ;;  %v927_v49 = vsel %vm431_vm0, %v340_v38, 0.0 }
 0x139   : > { %v2383_v61 = vsel %vm2046_vm5, %v2382_v48, %v2378_v54  ;;  %v1821_v62 = vunpack.c.l.b16 %v1491_v17  ;;  %v1822_v63 = vunpack.c.h.b16 %v1491_v17 }
 0x13a   : > { %v1492_v2 = vpack.c.bf16 %v1273_v57, %v1272_v58  ;;  %1162 = vadd.xlane.f32.xlu1 %v1161_v53  ;;  %v924_v57 = vsel %vm431_vm0, %v339_v42, 0.0  ;;  %v388_v58 = vld [vmem:[%s3782_s28 + $0x6a8] sm:$0xff] }
 0x13b   : > { %v2387_v3 = vrot.slane %v1821_v62, %v3974_v1  ;;  %v2392_v4 = vrot.slane %v1822_v63, %v3981_v6  ;;  %1159 = vadd.xlane.f32.xlu0 %v1158_v59  ;;  %v659_v7 = vpop.xlane.xlu1 %658  ;;  %v656_v8 = vpop.xlane.xlu0 %655  ;;  %v387_v62 = vld [vmem:[%s3782_s28 + $0x6a0] sm:$0xff] }
 0x13c   : > { %v1823_v11 = vunpack.c.l.b16 %v1492_v2  ;;  %v1824_v12 = vunpack.c.h.b16 %v1492_v2  ;;  %v1275_v13 = vmul.f32 0.015625, %v659_v7  ;;  %v1274_v14 = vmul.f32 0.015625, %v656_v8 }
 0x13d   : > { %v2388_v19 = vsel %vm2053_vm6, %v2387_v3, %v2383_v61  ;;  %v1071_v7 = vsel %vm431_vm0, %v388_v58, 0.0 }
 0x13e   : > { %v2393_v21 = vsel %vm2060_vm7, %v2392_v4, %v2388_v19  ;;  %v2397_v55 = vrot.slane %v1823_v11, %v3996_v31  ;;  %v2402_v22 = vrot.slane %v1824_v12, %v4003_v44  ;;  %v1493_v23 = vpack.c.bf16 %v1275_v13, %v1274_v14  ;;  %742 = vadd.xlane.f32.xlu1 %v741_v9  ;;  %v402_v11 = vld [vmem:[%s3782_s28 + $0x718] sm:$0xff] }
 0x13f   : > { %739 = vadd.xlane.f32.xlu0 %v738_v10  ;;  %v665_v24 = vpop.xlane.xlu1 %664  ;;  %v662_v35 = vpop.xlane.xlu0 %661  ;;  %v1068_v10 = vsel %vm431_vm0, %v387_v62, 0.0 }
 0x140   : > { %v2398_v29 = vsel %vm2067_vm8, %v2397_v55, %v2393_v21  ;;  %v1825_v33 = vunpack.c.l.b16 %v1493_v23  ;;  %v1826_v18 = vunpack.c.h.b16 %v1493_v23  ;;  %v1277_v34 = vmul.f32 0.015625, %v665_v24 }
 0x141   : > { %v2403_v40 = vsel %vm5200_vm9, %v2402_v22, %v2398_v29  ;;  %v1276_v41 = vmul.f32 0.015625, %v662_v35  ;;  %v1113_v24 = vsel %vm431_vm0, %v402_v11, 0.0  ;;  %v1110_v29 = vsel %vm431_vm0, %v401_v16, 0.0 }
 0x142   : > { %v2407_v43 = vrot.slane %v1825_v33, %v4010_v51  ;;  %v2412_v45 = vrot.slane %v1826_v18, %v4019_v0  ;;  %886 = vadd.xlane.f32.xlu1 %v885_v27  ;;  %v296_v33 = vld [vmem:[%s3782_s28 + $0x3c8] sm:$0xff]  ;;  %vm3305_vm9 = vcmask 1042434  }
 0x143   : > { %v1494_v48 = vpack.c.bf16 %v1277_v34, %v1276_v41  ;;  %883 = vadd.xlane.f32.xlu0 %v882_v28  ;;  %v671_v17 = vpop.xlane.xlu1 %670  ;;  %v668_v54 = vpop.xlane.xlu0 %667 }
 0x144   : > { %v2408_v50 = vsel %vm2081_vm10, %v2407_v43, %v2403_v40  ;;  %v1279_v53 = vmul.f32 0.015625, %v671_v17  ;;  %v1278_v61 = vmul.f32 0.015625, %v668_v54  ;;  %v295_v40 = vld [vmem:[%s3782_s28 + $0x3c0] sm:$0xff] }
 0x145   : > { %v2413_v59 = vsel %vm5201_vm11, %v2412_v45, %v2408_v50  ;;  %v1827_v20 = vunpack.c.l.b16 %v1494_v48  ;;  %v1828_v60 = vunpack.c.h.b16 %v1494_v48  ;;  %v795_v45 = vsel %vm431_vm0, %v296_v33, 0.0 }
 0x146   : > { %928 = vadd.xlane.f32.xlu1 %v927_v49  ;;  %v1495_v3 = vpack.c.bf16 %v1279_v53, %v1278_v61  ;;  %v792_v54 = vsel %vm431_vm0, %v295_v40, 0.0  ;;  %vm5202_vm11 = vcmask 654912  }
 0x147   : > { %v2417_v63 = vrot.slane %v1827_v20, %v4034_v25  ;;  %v2422_v2 = vrot.slane %v1828_v60, %v4037_v26  ;;  %925 = vadd.xlane.f32.xlu0 %v924_v57  ;;  %v677_v4 = vpop.xlane.xlu1 %676  ;;  %v310_v57 = vld [vmem:[%s3782_s28 + $0x438] sm:$0xff]  ;;  %v309_v60 = vld [vmem:[%s3782_s28 + $0x430] sm:$0xff] }
 0x148   : > { %v1281_v8 = vmul.f32 0.015625, %v677_v4  ;;  %v674_v9 = vpop.xlane.xlu0 %673  ;;  %v1829_v13 = vunpack.c.l.b16 %v1495_v3  ;;  %v1830_v14 = vunpack.c.h.b16 %v1495_v3 }
 0x149   : > { %v2418_v12 = vsel %vm2095_vm12, %v2417_v63, %v2413_v59  ;;  %v1280_v15 = vmul.f32 0.015625, %v674_v9  ;;  %v358_v9 = vld [vmem:[%s3782_s28 + $0x5b8] sm:$0xff] }
 0x14a   : > { %v2423_v19 = vsel %vm2102_vm13, %v2422_v2, %v2418_v12  ;;  %1072 = vadd.xlane.f32.xlu1 %v1071_v7  ;;  %v2427_v21 = vrot.slane %v1829_v13, %v4047_v46  ;;  %v2432_v55 = vrot.slane %v1830_v14, %v4050_v47  ;;  %v837_v2 = vsel %vm431_vm0, %v310_v57, 0.0  ;;  %v357_v14 = vld [vmem:[%s3782_s28 + $0x5b0] sm:$0xff] }
 0x14b   : > { %v1496_v22 = vpack.c.bf16 %v1281_v8, %v1280_v15  ;;  %1069 = vadd.xlane.f32.xlu0 %v1068_v10  ;;  %v683_v23 = vpop.xlane.xlu1 %682  ;;  %v834_v8 = vsel %vm431_vm0, %v309_v60, 0.0 }
 0x14c   : > { %v1283_v27 = vmul.f32 0.015625, %v683_v23  ;;  %v680_v28 = vpop.xlane.xlu0 %679  ;;  %v2428_v18 = vsel %vm2109_vm14, %v2427_v21, %v2423_v19 }
 0x14d   : > { %v1831_v34 = vunpack.c.l.b16 %v1496_v22  ;;  %v1832_v35 = vunpack.c.h.b16 %v1496_v22  ;;  %v1282_v38 = vmul.f32 0.015625, %v680_v28  ;;  %v2433_v41 = vsel %vm2116_vm15, %v2432_v55, %v2428_v18  ;;  %v372_v28 = vld [vmem:[%s3782_s28 + $0x628] sm:$0xff] }
 0x14e   : > { %1114 = vadd.xlane.f32.xlu1 %v1113_v24  ;;  %v4336_v48 = vsel %vm3305_vm9, %v2433_v41, %v4201_v32  ;;  %v981_v22 = vsel %vm431_vm0, %v358_v9, 0.0 }
 0x14f   : > { %v1497_v42 = vpack.c.bf16 %v1283_v27, %v1282_v38  ;;  %1111 = vadd.xlane.f32.xlu0 %v1110_v29  ;;  %v689_v43 = vpop.xlane.xlu1 %688  ;;  %v2437_v17 = vrot.slane %v1831_v34, %v3943_v30  ;;  %v2441_v49 = vrot.slane %v1832_v35, %v3957_v39  ;;  %v978_v27 = vsel %vm431_vm0, %v357_v14, 0.0  ;;  %v371_v35 = vld [vmem:[%s3782_s28 + $0x620] sm:$0xff] }
 0x150   : > { %v1285_v50 = vmul.f32 0.015625, %v689_v43  ;;  %v686_v53 = vpop.xlane.xlu0 %685 }
 0x151   : > { %v1833_v58 = vunpack.c.l.b16 %v1497_v42  ;;  %v1834_v59 = vunpack.c.h.b16 %v1497_v42  ;;  %v1284_v20 = vmul.f32 0.015625, %v686_v53  ;;  %v2442_v3 = vsel %vm2018_vm1, %v2441_v49, %v2437_v17  ;;  %v420_v53 = vld [vmem:[%s3782_s28 + $0x7a8] sm:$0xff] }
 0x152   : > { %796 = vadd.xlane.f32.xlu1 %v795_v45  ;;  %v1023_v45 = vsel %vm431_vm0, %v372_v28, 0.0 }
 0x153   : > { %v2446_v61 = vrot.slane %v1833_v58, %v3951_v36  ;;  %v2451_v32 = vrot.slane %v1834_v59, %v3954_v37  ;;  %v1498_v62 = vpack.c.bf16 %v1285_v50, %v1284_v20  ;;  %793 = vadd.xlane.f32.xlu0 %v792_v54  ;;  %v695_v63 = vpop.xlane.xlu1 %694  ;;  %v1020_v50 = vsel %vm431_vm0, %v371_v35, 0.0  ;;  %v419_v20 = vld [vmem:[%s3782_s28 + $0x7a0] sm:$0xff] }
 0x154   : > { %v1287_v4 = vmul.f32 0.015625, %v695_v63  ;;  %v692_v7 = vpop.xlane.xlu0 %691 }
 0x155   : > { %v2447_v10 = vsel %vm2025_vm2, %v2446_v61, %v2442_v3  ;;  %v1835_v11 = vunpack.c.l.b16 %v1498_v62  ;;  %v1836_v12 = vunpack.c.h.b16 %v1498_v62  ;;  %v1286_v13 = vmul.f32 0.015625, %v692_v7 }
 0x156   : > { %v2452_v15 = vsel %vm2032_vm3, %v2451_v32, %v2447_v10  ;;  %838 = vadd.xlane.f32.xlu1 %v837_v2  ;;  %v1167_v2 = vsel %vm431_vm0, %v420_v53, 0.0  ;;  %v1164_v7 = vsel %vm431_vm0, %v419_v20, 0.0 }
 0x157   : > { %v2456_v16 = vrot.slane %v1835_v11, %v3965_v52  ;;  %v2461_v19 = vrot.slane %v1836_v12, %v3970_v56  ;;  %v1499_v21 = vpack.c.bf16 %v1287_v4, %v1286_v13  ;;  %835 = vadd.xlane.f32.xlu0 %v834_v8  ;;  %v701_v55 = vpop.xlane.xlu1 %700  ;;  %v280_v8 = vld [vmem:[%s3782_s28 + $0x348] sm:$0xff]  ;;  %v279_v13 = vld [vmem:[%s3782_s28 + $0x340] sm:$0xff] }
 0x158   : > { %v1289_v23 = vmul.f32 0.015625, %v701_v55  ;;  %v698_v24 = vpop.xlane.xlu0 %697  ;;  %v747_v55 = vsel %vm431_vm0, %v280_v8, 0.0 }
 0x159   : > { %v2457_v29 = vsel %vm2039_vm4, %v2456_v16, %v2452_v15  ;;  %v1837_v33 = vunpack.c.l.b16 %v1499_v21  ;;  %v1838_v18 = vunpack.c.h.b16 %v1499_v21  ;;  %v1288_v34 = vmul.f32 0.015625, %v698_v24 }
 0x15a   : > { %v2462_v38 = vsel %vm2046_vm5, %v2461_v19, %v2457_v29  ;;  %982 = vadd.xlane.f32.xlu1 %v981_v22  ;;  %v744_v24 = vsel %vm431_vm0, %v279_v13, 0.0 }
 0x15b   : > { %v2466_v40 = vrot.slane %v1837_v33, %v3974_v1  ;;  %v2471_v41 = vrot.slane %v1838_v18, %v3981_v6  ;;  %v1500_v42 = vpack.c.bf16 %v1289_v23, %v1288_v34  ;;  %979 = vadd.xlane.f32.xlu0 %v978_v27  ;;  %v707_v43 = vpop.xlane.xlu1 %706  ;;  %v328_v27 = vld [vmem:[%s3782_s28 + $0x4c8] sm:$0xff]  ;;  %v327_v34 = vld [vmem:[%s3782_s28 + $0x4c0] sm:$0xff] }
 0x15c   : > { %v1291_v17 = vmul.f32 0.015625, %v707_v43  ;;  %v704_v49 = vpop.xlane.xlu0 %703  ;;  %v891_v43 = vsel %vm431_vm0, %v328_v27, 0.0  ;;  %v403_v27 = vld [vmem:[%s3782_s28 + $0x720] sm:$0xff] }
 0x15d   : > { %v2467_v54 = vsel %vm2053_vm6, %v2466_v40, %v2462_v38  ;;  %v1839_v57 = vunpack.c.l.b16 %v1500_v42  ;;  %v1840_v58 = vunpack.c.h.b16 %v1500_v42  ;;  %v1290_v59 = vmul.f32 0.015625, %v704_v49 }
 0x15e   : > { %v2472_v60 = vsel %vm2060_vm7, %v2471_v41, %v2467_v54  ;;  %1024 = vadd.xlane.f32.xlu1 %v1023_v45  ;;  %v888_v49 = vsel %vm431_vm0, %v327_v34, 0.0 }
 0x15f   : > { %v2476_v61 = vrot.slane %v1839_v57, %v3996_v31  ;;  %v2481_v32 = vrot.slane %v1840_v58, %v4003_v44  ;;  %v1501_v62 = vpack.c.bf16 %v1291_v17, %v1290_v59  ;;  %1021 = vadd.xlane.f32.xlu0 %v1020_v50  ;;  %v713_v63 = vpop.xlane.xlu1 %712  ;;  %v342_v50 = vld [vmem:[%s3782_s28 + $0x538] sm:$0xff]  ;;  %v341_v59 = vld [vmem:[%s3782_s28 + $0x530] sm:$0xff] }
 0x160   : > { %v1293_v3 = vmul.f32 0.015625, %v713_v63  ;;  %v710_v4 = vpop.xlane.xlu0 %709  ;;  %v933_v63 = vsel %vm431_vm0, %v342_v50, 0.0 }
 0x161   : > { %v2477_v9 = vsel %vm2067_vm8, %v2476_v61, %v2472_v60  ;;  %v1841_v10 = vunpack.c.l.b16 %v1501_v62  ;;  %v1842_v11 = vunpack.c.h.b16 %v1501_v62  ;;  %v1292_v12 = vmul.f32 0.015625, %v710_v4 }
 0x162   : > { %v2482_v14 = vsel %vm5202_vm11, %v2481_v32, %v2477_v9  ;;  %1168 = vadd.xlane.f32.xlu1 %v1167_v2  ;;  %vm5203_vm11 = vcmask 786112   ;;  %v930_v4 = vsel %vm431_vm0, %v341_v59, 0.0 }
 0x163   : > { %v2486_v15 = vrot.slane %v1841_v10, %v4010_v51  ;;  %v2491_v16 = vrot.slane %v1842_v11, %v4019_v0  ;;  %v1502_v19 = vpack.c.bf16 %v1293_v3, %v1292_v12  ;;  %1165 = vadd.xlane.f32.xlu0 %v1164_v7  ;;  %v719_v21 = vpop.xlane.xlu1 %718  ;;  %v390_v7 = vld [vmem:[%s3782_s28 + $0x6b8] sm:$0xff]  ;;  %v389_v10 = vld [vmem:[%s3782_s28 + $0x6b0] sm:$0xff] }
 0x164   : > { %v1295_v22 = vmul.f32 0.015625, %v719_v21  ;;  %v716_v23 = vpop.xlane.xlu0 %715 }
 0x165   : > { %v2487_v28 = vsel %vm2081_vm10, %v2486_v15, %v2482_v14  ;;  %v1843_v29 = vunpack.c.l.b16 %v1502_v19  ;;  %v1844_v33 = vunpack.c.h.b16 %v1502_v19  ;;  %v1294_v18 = vmul.f32 0.015625, %v716_v23  ;;  %v404_v23 = vld [vmem:[%s3782_s28 + $0x728] sm:$0xff] }
 0x166   : > { %v2492_v35 = vsel %vm5203_vm11, %v2491_v16, %v2487_v28  ;;  %748 = vadd.xlane.f32.xlu1 %v747_v55  ;;  %v1077_v14 = vsel %vm431_vm0, %v390_v7, 0.0 }
 0x167   : > { %v2496_v38 = vrot.slane %v1843_v29, %v4034_v25  ;;  %v2501_v40 = vrot.slane %v1844_v33, %v4037_v26  ;;  %v1503_v41 = vpack.c.bf16 %v1295_v22, %v1294_v18  ;;  %745 = vadd.xlane.f32.xlu0 %v744_v24  ;;  %v773_v42 = vpop.xlane.xlu1 %772  ;;  %v1074_v22 = vsel %vm431_vm0, %v389_v10, 0.0  ;;  %v298_v18 = vld [vmem:[%s3782_s28 + $0x3d8] sm:$0xff] }
 0x168   : > { %v1313_v45 = vmul.f32 0.015625, %v773_v42  ;;  %v770_v17 = vpop.xlane.xlu0 %769  ;;  %v1119_v33 = vsel %vm431_vm0, %v404_v23, 0.0 }
 0x169   : > { %v2497_v53 = vsel %vm2095_vm12, %v2496_v38, %v2492_v35  ;;  %v1845_v54 = vunpack.c.l.b16 %v1503_v41  ;;  %v1846_v57 = vunpack.c.h.b16 %v1503_v41  ;;  %v1312_v58 = vmul.f32 0.015625, %v770_v17  ;;  %v297_v41 = vld [vmem:[%s3782_s28 + $0x3d0] sm:$0xff] }
 0x16a   : > { %v2502_v20 = vsel %vm2102_vm13, %v2501_v40, %v2497_v53  ;;  %892 = vadd.xlane.f32.xlu1 %v891_v43  ;;  %v1116_v40 = vsel %vm431_vm0, %v403_v27, 0.0  ;;  %v801_v17 = vsel %vm431_vm0, %v298_v18, 0.0 }
 0x16b   : > { %v2506_v60 = vrot.slane %v1845_v54, %v4047_v46  ;;  %v2511_v61 = vrot.slane %v1846_v57, %v4050_v47  ;;  %v1512_v32 = vpack.c.bf16 %v1313_v45, %v1312_v58  ;;  %889 = vadd.xlane.f32.xlu0 %v888_v49  ;;  %v725_v62 = vpop.xlane.xlu1 %724  ;;  %v798_v57 = vsel %vm431_vm0, %v297_v41, 0.0 }
 0x16c   : > { %v1297_v2 = vmul.f32 0.015625, %v725_v62  ;;  %v722_v3 = vpop.xlane.xlu0 %721 }
 0x16d   : > { %v2507_v8 = vsel %vm2109_vm14, %v2506_v60, %v2502_v20  ;;  %v1296_v9 = vmul.f32 0.015625, %v722_v3  ;;  %v1863_v16 = vunpack.c.l.b16 %v1512_v32  ;;  %v1864_v19 = vunpack.c.h.b16 %v1512_v32  ;;  %v312_v32 = vld [vmem:[%s3782_s28 + $0x448] sm:$0xff] }
 0x16e   : > { %v2512_v11 = vsel %vm2116_vm15, %v2511_v61, %v2507_v8  ;;  %934 = vadd.xlane.f32.xlu1 %v933_v63  ;;  %v843_v8 = vsel %vm431_vm0, %v312_v32, 0.0  ;;  %v421_v32 = vld [vmem:[%s3782_s28 + $0x7b0] sm:$0xff] }
 0x16f   : > { %v1504_v12 = vpack.c.bf16 %v1297_v2, %v1296_v9  ;;  %931 = vadd.xlane.f32.xlu0 %v930_v4  ;;  %v779_v13 = vpop.xlane.xlu1 %778  ;;  %v4403_v15 = vsel %vm3305_vm9, %v2512_v11, %v4268_v5  ;;  %v2595_v5 = vrot.slane %v1863_v16, %v3943_v30  ;;  %v2599_v34 = vrot.slane %v1864_v19, %v3957_v39  ;;  %v311_v2 = vld [vmem:[%s3782_s28 + $0x440] sm:$0xff]  ;;  %v360_v9 = vld [vmem:[%s3782_s28 + $0x5c8] sm:$0xff] }
 0x170   : > { %v1315_v21 = vmul.f32 0.015625, %v779_v13  ;;  %v776_v55 = vpop.xlane.xlu0 %775  ;;  %v359_v16 = vld [vmem:[%s3782_s28 + $0x5c0] sm:$0xff] }
 0x171   : > { %v1314_v24 = vmul.f32 0.015625, %v776_v55  ;;  %v2600_v58 = vsel %vm2018_vm1, %v2599_v34, %v2595_v5  ;;  %v1847_v59 = vunpack.c.l.b16 %v1504_v12  ;;  %v1848_v20 = vunpack.c.h.b16 %v1504_v12 }
 0x172   : > { %1078 = vadd.xlane.f32.xlu1 %v1077_v14  ;;  %v840_v14 = vsel %vm431_vm0, %v311_v2, 0.0 }
 0x173   : > { %v1513_v28 = vpack.c.bf16 %v1315_v21, %v1314_v24  ;;  %1075 = vadd.xlane.f32.xlu0 %v1074_v22  ;;  %v869_v29 = vpop.xlane.xlu1 %868  ;;  %v2516_v10 = vrot.slane %v1847_v59, %v3943_v30  ;;  %v2520_v11 = vrot.slane %v1848_v20, %v3957_v39  ;;  %v987_v22 = vsel %vm431_vm0, %v360_v9, 0.0  ;;  %v422_v59 = vld [vmem:[%s3782_s28 + $0x7b8] sm:$0xff] }
 0x174   : > { %v1345_v35 = vmul.f32 0.015625, %v869_v29  ;;  %v866_v38 = vpop.xlane.xlu0 %865  ;;  %v984_v29 = vsel %vm431_vm0, %v359_v16, 0.0  ;;  %v281_v16 = vld [vmem:[%s3782_s28 + $0x350] sm:$0xff] }
 0x175   : > { %v1865_v42 = vunpack.c.l.b16 %v1513_v28  ;;  %v1866_v43 = vunpack.c.h.b16 %v1513_v28  ;;  %v1344_v45 = vmul.f32 0.015625, %v866_v38  ;;  %v374_v38 = vld [vmem:[%s3782_s28 + $0x638] sm:$0xff] }
 0x176   : > { %1120 = vadd.xlane.f32.xlu1 %v1119_v33  ;;  %v2521_v33 = vsel %vm2018_vm1, %v2520_v11, %v2516_v10  ;;  %v1170_v11 = vsel %vm431_vm0, %v421_v32, 0.0 }
 0x177   : > { %v2604_v49 = vrot.slane %v1865_v42, %v3951_v36  ;;  %v2609_v50 = vrot.slane %v1866_v43, %v3954_v37  ;;  %v1528_v53 = vpack.c.bf16 %v1345_v35, %v1344_v45  ;;  %1117 = vadd.xlane.f32.xlu0 %v1116_v40  ;;  %v731_v54 = vpop.xlane.xlu1 %730  ;;  %v373_v42 = vld [vmem:[%s3782_s28 + $0x630] sm:$0xff] }
 0x178   : > { %v1299_v60 = vmul.f32 0.015625, %v731_v54  ;;  %v728_v61 = vpop.xlane.xlu0 %727 }
 0x179   : > { %v2605_v62 = vsel %vm2025_vm2, %v2604_v49, %v2600_v58  ;;  %v1298_v63 = vmul.f32 0.015625, %v728_v61  ;;  %v1895_v18 = vunpack.c.l.b16 %v1528_v53  ;;  %v1896_v5 = vunpack.c.h.b16 %v1528_v53 }
 0x17a   : > { %v4423_v3 = vsel %vm2032_vm3, %v2609_v50, %v2605_v62  ;;  %802 = vadd.xlane.f32.xlu1 %v801_v17  ;;  %v1029_v49 = vsel %vm431_vm0, %v374_v38, 0.0  ;;  %v1026_v58 = vsel %vm431_vm0, %v373_v42, 0.0  ;;  %v329_v38 = vld [vmem:[%s3782_s28 + $0x4d0] sm:$0xff] }
 0x17b   : > { %v1505_v4 = vpack.c.bf16 %v1299_v60, %v1298_v63  ;;  %799 = vadd.xlane.f32.xlu0 %v798_v57  ;;  %v821_v7 = vpop.xlane.xlu1 %820  ;;  %v2753_v50 = vrot.slane %v1895_v18, %v3943_v30  ;;  %v2757_v53 = vrot.slane %v1896_v5, %v3957_v39  ;;  %v330_v18 = vld [vmem:[%s3782_s28 + $0x4d8] sm:$0xff] }
 0x17c   : > { %v1329_v12 = vmul.f32 0.015625, %v821_v7  ;;  %v818_v13 = vpop.xlane.xlu0 %817  ;;  %v1173_v7 = vsel %vm431_vm0, %v422_v59, 0.0 }
 0x17d   : > { %v1849_v19 = vunpack.c.l.b16 %v1505_v4  ;;  %v1850_v21 = vunpack.c.h.b16 %v1505_v4  ;;  %v1328_v55 = vmul.f32 0.015625, %v818_v13 }
 0x17e   : > { %844 = vadd.xlane.f32.xlu1 %v843_v8  ;;  %v2758_v8 = vsel %vm2018_vm1, %v2757_v53, %v2753_v50 }
 0x17f   : > { %v2525_v23 = vrot.slane %v1849_v19, %v3951_v36  ;;  %v2530_v24 = vrot.slane %v1850_v21, %v3954_v37  ;;  %v4434_v27 = vpack.c.bf16 %v1329_v12, %v1328_v55  ;;  %841 = vadd.xlane.f32.xlu0 %v840_v14  ;;  %v875_v28 = vpop.xlane.xlu1 %874  ;;  %v282_v12 = vld [vmem:[%s3782_s28 + $0x358] sm:$0xff] }
 0x180   : > { %v1347_v34 = vmul.f32 0.015625, %v875_v28  ;;  %v872_v35 = vpop.xlane.xlu0 %871 }
 0x181   : > { %v2526_v40 = vsel %vm2025_vm2, %v2525_v23, %v2521_v33  ;;  %v1346_v41 = vmul.f32 0.015625, %v872_v35  ;;  %v1879_v23 = vunpack.c.l.b16 %v4434_v27  ;;  %v750_v33 = vsel %vm431_vm0, %v281_v16, 0.0 }
 0x182   : > { %v4442_v43 = vsel %vm2032_vm3, %v2530_v24, %v2526_v40  ;;  %988 = vadd.xlane.f32.xlu1 %v987_v22  ;;  %v753_v22 = vsel %vm431_vm0, %v282_v12, 0.0  ;;  %v1880_v24 = vunpack.c.h.b16 %v4434_v27  ;;  %v897_v27 = vsel %vm431_vm0, %v330_v18, 0.0 }
 0x183   : > { %v1529_v45 = vpack.c.bf16 %v1347_v34, %v1346_v41  ;;  %985 = vadd.xlane.f32.xlu0 %v984_v29  ;;  %v965_v17 = vpop.xlane.xlu1 %964 }
 0x184   : > { %v1377_v54 = vmul.f32 0.015625, %v965_v17  ;;  %v962_v57 = vpop.xlane.xlu0 %961  ;;  %v344_v17 = vld [vmem:[%s3782_s28 + $0x548] sm:$0xff]  ;;  %v2678_v50 = vrot.slane %v1880_v24, %v3957_v39 }
 0x185   : > { %v1897_v20 = vunpack.c.l.b16 %v1529_v45  ;;  %v1898_v60 = vunpack.c.h.b16 %v1529_v45  ;;  %v1376_v61 = vmul.f32 0.015625, %v962_v57  ;;  %v894_v57 = vsel %vm431_vm0, %v329_v38, 0.0 }
 0x186   : > { %1030 = vadd.xlane.f32.xlu1 %v1029_v49  ;;  %v2674_v49 = vrot.slane %v1879_v23, %v3943_v30 }
 0x187   : > { %v2762_v62 = vrot.slane %v1897_v20, %v3951_v36  ;;  %v2767_v63 = vrot.slane %v1898_v60, %v3954_v37  ;;  %v4452_v2 = vpack.c.bf16 %v1377_v54, %v1376_v61  ;;  %1027 = vadd.xlane.f32.xlu0 %v1026_v58  ;;  %v785_v4 = vpop.xlane.xlu1 %784  ;;  %v343_v58 = vld [vmem:[%s3782_s28 + $0x540] sm:$0xff] }
 0x188   : > { %v1317_v9 = vmul.f32 0.015625, %v785_v4  ;;  %v782_v10 = vpop.xlane.xlu0 %781 }
 0x189   : > { %v2763_v13 = vsel %vm2025_vm2, %v2762_v62, %v2758_v8  ;;  %v1316_v14 = vmul.f32 0.015625, %v782_v10  ;;  %v939_v62 = vsel %vm431_vm0, %v344_v17, 0.0  ;;  %v1927_v10 = vunpack.c.l.b16 %v4452_v2 }
 0x18a   : > { %v4461_v19 = vsel %vm2032_vm3, %v2767_v63, %v2763_v13  ;;  %1174 = vadd.xlane.f32.xlu1 %v1173_v7 }
 0x18b   : > { %v1514_v21 = vpack.c.bf16 %v1317_v9, %v1316_v14  ;;  %1171 = vadd.xlane.f32.xlu0 %v1170_v11  ;;  %v827_v55 = vpop.xlane.xlu1 %826  ;;  %v2679_v9 = vsel %vm2018_vm1, %v2678_v50, %v2674_v49  ;;  %v1928_v11 = vunpack.c.h.b16 %v4452_v2  ;;  %v392_v14 = vld [vmem:[%s3782_s28 + $0x6c8] sm:$0xff]  ;;  %v2911_v2 = vrot.slane %v1927_v10, %v3943_v30  ;;  %v314_v10 = vld [vmem:[%s3782_s28 + $0x458] sm:$0xff] }
 0x18c   : > { %v1331_v28 = vmul.f32 0.015625, %v827_v55  ;;  %v824_v29 = vpop.xlane.xlu0 %823  ;;  %v391_v55 = vld [vmem:[%s3782_s28 + $0x6c0] sm:$0xff] }
 0x18d   : > { %v1867_v5 = vunpack.c.l.b16 %v1514_v21  ;;  %v1868_v34 = vunpack.c.h.b16 %v1514_v21  ;;  %v1330_v35 = vmul.f32 0.015625, %v824_v29  ;;  %v2915_v29 = vrot.slane %v1928_v11, %v3957_v39 }
 0x18e   : > { %754 = vadd.xlane.f32.xlu1 %v753_v22 }
 0x18f   : > { %v2614_v40 = vrot.slane %v1867_v5, %v3965_v52  ;;  %v2619_v41 = vrot.slane %v1868_v34, %v3970_v56  ;;  %v1521_v42 = vpack.c.bf16 %v1331_v28, %v1330_v35  ;;  %751 = vadd.xlane.f32.xlu0 %v750_v33  ;;  %v917_v45 = vpop.xlane.xlu1 %916  ;;  %v1083_v28 = vsel %vm431_vm0, %v392_v14, 0.0  ;;  %v406_v34 = vld [vmem:[%s3782_s28 + $0x738] sm:$0xff]  ;;  %v313_v14 = vld [vmem:[%s3782_s28 + $0x450] sm:$0xff] }
 0x190   : > { %v1361_v53 = vmul.f32 0.015625, %v917_v45  ;;  %v914_v54 = vpop.xlane.xlu0 %913  ;;  %v1080_v5 = vsel %vm431_vm0, %v391_v55, 0.0  ;;  %v1125_v49 = vsel %vm431_vm0, %v406_v34, 0.0  ;;  %v2916_v50 = vsel %vm2018_vm1, %v2915_v29, %v2911_v2 }
 0x191   : > { %v2615_v59 = vsel %vm2039_vm4, %v2614_v40, %v4423_v3  ;;  %v1881_v20 = vunpack.c.l.b16 %v1521_v42  ;;  %v1882_v60 = vunpack.c.h.b16 %v1521_v42  ;;  %v1360_v61 = vmul.f32 0.015625, %v914_v54 }
 0x192   : > { %v4480_v32 = vsel %vm2046_vm5, %v2619_v41, %v2615_v59  ;;  %898 = vadd.xlane.f32.xlu1 %v897_v27  ;;  %v936_v3 = vsel %vm431_vm0, %v343_v58, 0.0  ;;  %v405_v41 = vld [vmem:[%s3782_s28 + $0x730] sm:$0xff]  ;;  %v300_v58 = vld [vmem:[%s3782_s28 + $0x3e8] sm:$0xff] }
 0x193   : > { %v2683_v63 = vrot.slane %v1881_v20, %v3951_v36  ;;  %v2688_v4 = vrot.slane %v1882_v60, %v3954_v37  ;;  %v4485_v7 = vpack.c.bf16 %v1361_v53, %v1360_v61  ;;  %895 = vadd.xlane.f32.xlu0 %v894_v57  ;;  %v971_v8 = vpop.xlane.xlu1 %970  ;;  %v1122_v57 = vsel %vm431_vm0, %v405_v41, 0.0  ;;  %v299_v60 = vld [vmem:[%s3782_s28 + $0x3e0] sm:$0xff]  ;;  %v361_v41 = vld [vmem:[%s3782_s28 + $0x5d0] sm:$0xff] }
 0x194   : > { %v1379_v12 = vmul.f32 0.015625, %v971_v8  ;;  %v968_v13 = vpop.xlane.xlu0 %967 }
 0x195   : > { %v2684_v16 = vsel %vm2025_vm2, %v2683_v63, %v2679_v9  ;;  %v1378_v21 = vmul.f32 0.015625, %v968_v13  ;;  %v804_v9 = vsel %vm431_vm0, %v299_v60, 0.0  ;;  %v1912_v2 = vunpack.c.h.b16 %v4485_v7 }
 0x196   : > { %v4495_v22 = vsel %vm2032_vm3, %v2688_v4, %v2684_v16  ;;  %940 = vadd.xlane.f32.xlu1 %v939_v62  ;;  %v807_v4 = vsel %vm431_vm0, %v300_v58, 0.0 }
 0x197   : > { %v1545_v23 = vpack.c.bf16 %v1379_v12, %v1378_v21  ;;  %937 = vadd.xlane.f32.xlu0 %v936_v3  ;;  %v1061_v24 = vpop.xlane.xlu1 %1060 }
 0x198   : > { %v1409_v33 = vmul.f32 0.015625, %v1061_v24  ;;  %v1058_v18 = vpop.xlane.xlu0 %1057  ;;  %v849_v24 = vsel %vm431_vm0, %v314_v10, 0.0 }
 0x199   : > { %v1929_v35 = vunpack.c.l.b16 %v1545_v23  ;;  %v1930_v38 = vunpack.c.h.b16 %v1545_v23  ;;  %v1408_v40 = vmul.f32 0.015625, %v1058_v18  ;;  %v846_v18 = vsel %vm431_vm0, %v313_v14, 0.0 }
 0x19a   : > { %1084 = vadd.xlane.f32.xlu1 %v1083_v28  ;;  %v1911_v28 = vunpack.c.l.b16 %v4485_v7 }
 0x19b   : > { %v2920_v42 = vrot.slane %v1929_v35, %v3951_v36  ;;  %v2925_v45 = vrot.slane %v1930_v38, %v3954_v37  ;;  %v4505_v27 = vpack.c.bf16 %v1409_v33, %v1408_v40  ;;  %1081 = vadd.xlane.f32.xlu0 %v1080_v5  ;;  %v737_v17 = vpop.xlane.xlu1 %736  ;;  %v362_v5 = vld [vmem:[%s3782_s28 + $0x5d8] sm:$0xff] }
 0x19c   : > { %v1301_v53 = vmul.f32 0.015625, %v737_v17  ;;  %v734_v54 = vpop.xlane.xlu0 %733 }
 0x19d   : > { %v2921_v59 = vsel %vm2025_vm2, %v2920_v42, %v2916_v50  ;;  %v1300_v20 = vmul.f32 0.015625, %v734_v54  ;;  %v993_v50 = vsel %vm431_vm0, %v362_v5, 0.0  ;;  %v2836_v54 = vrot.slane %v1912_v2, %v3957_v39  ;;  %v423_v2 = vld [vmem:[%s3782_s28 + $0x7c0] sm:$0xff] }
 0x19e   : > { %v4514_v61 = vsel %vm2032_vm3, %v2925_v45, %v2921_v59  ;;  %1126 = vadd.xlane.f32.xlu1 %v1125_v49  ;;  %v990_v59 = vsel %vm431_vm0, %v361_v41, 0.0  ;;  %v1959_v14 = vunpack.c.l.b16 %v4505_v27  ;;  %v284_v41 = vld [vmem:[%s3782_s28 + $0x368] sm:$0xff] }
 0x19f   : > { %v1506_v62 = vpack.c.bf16 %v1301_v53, %v1300_v20  ;;  %1123 = vadd.xlane.f32.xlu0 %v1122_v57  ;;  %v881_v63 = vpop.xlane.xlu1 %880  ;;  %v376_v53 = vld [vmem:[%s3782_s28 + $0x648] sm:$0xff]  ;;  %v375_v20 = vld [vmem:[%s3782_s28 + $0x640] sm:$0xff] }
 0x1a0   : > { %v1349_v8 = vmul.f32 0.015625, %v881_v63  ;;  %v878_v3 = vpop.xlane.xlu0 %877 }
 0x1a1   : > { %v1851_v11 = vunpack.c.l.b16 %v1506_v62  ;;  %v1852_v12 = vunpack.c.h.b16 %v1506_v62  ;;  %v1348_v13 = vmul.f32 0.015625, %v878_v3  ;;  %v1035_v3 = vsel %vm431_vm0, %v376_v53, 0.0 }
 0x1a2   : > { %808 = vadd.xlane.f32.xlu1 %v807_v4 }
 0x1a3   : > { %v2535_v16 = vrot.slane %v1851_v11, %v3965_v52  ;;  %v2540_v21 = vrot.slane %v1852_v12, %v3970_v56  ;;  %v1530_v55 = vpack.c.bf16 %v1349_v8, %v1348_v13  ;;  %805 = vadd.xlane.f32.xlu0 %v804_v9  ;;  %v923_v23 = vpop.xlane.xlu1 %922 }
 0x1a4   : > { %v1363_v29 = vmul.f32 0.015625, %v923_v23  ;;  %v920_v33 = vpop.xlane.xlu0 %919  ;;  %v424_v23 = vld [vmem:[%s3782_s28 + $0x7c8] sm:$0xff] }
 0x1a5   : > { %v2536_v34 = vsel %vm2039_vm4, %v2535_v16, %v4442_v43  ;;  %v1899_v35 = vunpack.c.l.b16 %v1530_v55  ;;  %v1900_v38 = vunpack.c.h.b16 %v1530_v55  ;;  %v1362_v40 = vmul.f32 0.015625, %v920_v33 }
 0x1a6   : > { %v4531_v42 = vsel %vm2046_vm5, %v2540_v21, %v2536_v34  ;;  %850 = vadd.xlane.f32.xlu1 %v849_v24  ;;  %v2832_v43 = vrot.slane %v1911_v28, %v3943_v30  ;;  %v1960_v16 = vunpack.c.h.b16 %v4505_v27  ;;  %v1179_v5 = vsel %vm431_vm0, %v424_v23, 0.0 }
 0x1a7   : > { %v2772_v7 = vrot.slane %v1899_v35, %v3965_v52  ;;  %v2777_v45 = vrot.slane %v1900_v38, %v3970_v56  ;;  %v1537_v17 = vpack.c.bf16 %v1363_v29, %v1362_v40  ;;  %847 = vadd.xlane.f32.xlu0 %v846_v18  ;;  %v1013_v49 = vpop.xlane.xlu1 %1012  ;;  %v3069_v27 = vrot.slane %v1959_v14, %v3943_v30 }
 0x1a8   : > { %v1393_v57 = vmul.f32 0.015625, %v1013_v49  ;;  %v1010_v58 = vpop.xlane.xlu0 %1009  ;;  %v2837_v13 = vsel %vm2018_vm1, %v2836_v54, %v2832_v43  ;;  %v3073_v34 = vrot.slane %v1960_v16, %v3957_v39  ;;  %v1176_v40 = vsel %vm431_vm0, %v423_v2, 0.0  ;;  %v283_v49 = vld [vmem:[%s3782_s28 + $0x360] sm:$0xff] }
 0x1a9   : > { %v2773_v60 = vsel %vm2039_vm4, %v2772_v7, %v4461_v19  ;;  %v1913_v62 = vunpack.c.l.b16 %v1537_v17  ;;  %v1914_v63 = vunpack.c.h.b16 %v1537_v17  ;;  %v1392_v4 = vmul.f32 0.015625, %v1010_v58 }
 0x1aa   : > { %v4544_v8 = vsel %vm2046_vm5, %v2777_v45, %v2773_v60  ;;  %994 = vadd.xlane.f32.xlu1 %v993_v50  ;;  %v1032_v19 = vsel %vm431_vm0, %v375_v20, 0.0  ;;  %v3074_v58 = vsel %vm2018_vm1, %v3073_v34, %v3069_v27  ;;  %v756_v60 = vsel %vm431_vm0, %v283_v49, 0.0  ;;  %v393_v49 = vld [vmem:[%s3782_s28 + $0x6d0] sm:$0xff] }
 0x1ab   : > { %v2841_v9 = vrot.slane %v1913_v62, %v3951_v36  ;;  %v2846_v10 = vrot.slane %v1914_v63, %v3954_v37  ;;  %v4549_v11 = vpack.c.bf16 %v1393_v57, %v1392_v4  ;;  %991 = vadd.xlane.f32.xlu0 %v990_v59  ;;  %v1067_v12 = vpop.xlane.xlu1 %1066  ;;  %v759_v57 = vsel %vm431_vm0, %v284_v41, 0.0  ;;  %v332_v62 = vld [vmem:[%s3782_s28 + $0x4e8] sm:$0xff] }
 0x1ac   : > { %v1411_v21 = vmul.f32 0.015625, %v1067_v12  ;;  %v1064_v55 = vpop.xlane.xlu0 %1063 }
 0x1ad   : > { %v2842_v24 = vsel %vm2025_vm2, %v2841_v9, %v2837_v13  ;;  %v1410_v28 = vmul.f32 0.015625, %v1064_v55 }
 0x1ae   : > { %v4559_v29 = vsel %vm2032_vm3, %v2846_v10, %v2842_v24  ;;  %1036 = vadd.xlane.f32.xlu1 %v1035_v3  ;;  %v331_v3 = vld [vmem:[%s3782_s28 + $0x4e0] sm:$0xff] }
 0x1af   : > { %v1561_v33 = vpack.c.bf16 %v1411_v21, %v1410_v28  ;;  %1033 = vadd.xlane.f32.xlu0 %v1032_v19  ;;  %v1157_v18 = vpop.xlane.xlu1 %1156  ;;  %v903_v19 = vsel %vm431_vm0, %v332_v62, 0.0  ;;  %v900_v16 = vsel %vm431_vm0, %v331_v3, 0.0  ;;  %v346_v21 = vld [vmem:[%s3782_s28 + $0x558] sm:$0xff]  ;;  %v345_v28 = vld [vmem:[%s3782_s28 + $0x550] sm:$0xff] }
 0x1b0   : > { %v1441_v35 = vmul.f32 0.015625, %v1157_v18  ;;  %v1154_v38 = vpop.xlane.xlu0 %1153  ;;  %v945_v27 = vsel %vm431_vm0, %v346_v21, 0.0 }
 0x1b1   : > { %v1961_v7 = vunpack.c.l.b16 %v1561_v33  ;;  %v1962_v45 = vunpack.c.h.b16 %v1561_v33  ;;  %v1440_v17 = vmul.f32 0.015625, %v1154_v38  ;;  %v942_v38 = vsel %vm431_vm0, %v345_v28, 0.0 }
 0x1b2   : > { %1180 = vadd.xlane.f32.xlu1 %v1179_v5 }
 0x1b3   : > { %v3078_v50 = vrot.slane %v1961_v7, %v3951_v36  ;;  %v3083_v53 = vrot.slane %v1962_v45, %v3954_v37  ;;  %v4569_v43 = vpack.c.bf16 %v1441_v35, %v1440_v17  ;;  %1177 = vadd.xlane.f32.xlu0 %v1176_v40  ;;  %v791_v54 = vpop.xlane.xlu1 %790  ;;  %v394_v40 = vld [vmem:[%s3782_s28 + $0x6d8] sm:$0xff] }
 0x1b4   : > { %v1319_v59 = vmul.f32 0.015625, %v791_v54  ;;  %v788_v20 = vpop.xlane.xlu0 %787 }
 0x1b5   : > { %v3079_v63 = vsel %vm2025_vm2, %v3078_v50, %v3074_v58  ;;  %v1318_v4 = vmul.f32 0.015625, %v788_v20  ;;  %v1944_v20 = vunpack.c.h.b16 %v4549_v11 }
 0x1b6   : > { %v4578_v9 = vsel %vm2032_vm3, %v3083_v53, %v3079_v63  ;;  %760 = vadd.xlane.f32.xlu1 %v759_v57  ;;  %v1086_v63 = vsel %vm431_vm0, %v393_v49, 0.0 }
 0x1b7   : > { %v1515_v10 = vpack.c.bf16 %v1319_v59, %v1318_v4  ;;  %757 = vadd.xlane.f32.xlu0 %v756_v60  ;;  %v833_v12 = vpop.xlane.xlu1 %832  ;;  %v1089_v59 = vsel %vm431_vm0, %v394_v40, 0.0  ;;  %v408_v4 = vld [vmem:[%s3782_s28 + $0x748] sm:$0xff]  ;;  %v2994_v28 = vrot.slane %v1944_v20, %v3957_v39 }
 0x1b8   : > { %v1333_v13 = vmul.f32 0.015625, %v833_v12  ;;  %v830_v14 = vpop.xlane.xlu0 %829 }
 0x1b9   : > { %v1869_v55 = vunpack.c.l.b16 %v1515_v10  ;;  %v1870_v23 = vunpack.c.h.b16 %v1515_v10  ;;  %v1332_v24 = vmul.f32 0.015625, %v830_v14 }
 0x1ba   : > { %904 = vadd.xlane.f32.xlu1 %v903_v19 }
 0x1bb   : > { %v2624_v2 = vrot.slane %v1869_v55, %v3974_v1  ;;  %v2629_v33 = vrot.slane %v1870_v23, %v3981_v6  ;;  %v1522_v18 = vpack.c.bf16 %v1333_v13, %v1332_v24  ;;  %901 = vadd.xlane.f32.xlu0 %v900_v16  ;;  %v977_v5 = vpop.xlane.xlu1 %976  ;;  %v407_v13 = vld [vmem:[%s3782_s28 + $0x740] sm:$0xff]  ;;  %v1131_v23 = vsel %vm431_vm0, %v408_v4, 0.0  ;;  %v302_v24 = vld [vmem:[%s3782_s28 + $0x3f8] sm:$0xff] }
 0x1bc   : > { %v1381_v34 = vmul.f32 0.015625, %v977_v5  ;;  %v974_v35 = vpop.xlane.xlu0 %973  ;;  %v301_v5 = vld [vmem:[%s3782_s28 + $0x3f0] sm:$0xff] }
 0x1bd   : > { %v2625_v41 = vsel %vm2053_vm6, %v2624_v2, %v4480_v32  ;;  %v1883_v7 = vunpack.c.l.b16 %v1522_v18  ;;  %v1884_v45 = vunpack.c.h.b16 %v1522_v18  ;;  %v1380_v17 = vmul.f32 0.015625, %v974_v35 }
 0x1be   : > { %v4593_v50 = vsel %vm2060_vm7, %v2629_v33, %v2625_v41  ;;  %946 = vadd.xlane.f32.xlu1 %v945_v27  ;;  %v1943_v32 = vunpack.c.l.b16 %v4549_v11  ;;  %v1128_v18 = vsel %vm431_vm0, %v407_v13, 0.0  ;;  %v813_v41 = vsel %vm431_vm0, %v302_v24, 0.0  ;;  %v363_v24 = vld [vmem:[%s3782_s28 + $0x5e0] sm:$0xff] }
 0x1bf   : > { %v2693_v53 = vrot.slane %v1883_v7, %v3965_v52  ;;  %v2698_v54 = vrot.slane %v1884_v45, %v3970_v56  ;;  %v1546_v57 = vpack.c.bf16 %v1381_v34, %v1380_v17  ;;  %943 = vadd.xlane.f32.xlu0 %v942_v38  ;;  %v1019_v58 = vpop.xlane.xlu1 %1018 }
 0x1c0   : > { %v1395_v60 = vmul.f32 0.015625, %v1019_v58  ;;  %v1016_v62 = vpop.xlane.xlu0 %1015 }
 0x1c1   : > { %v2694_v3 = vsel %vm2039_vm4, %v2693_v53, %v4495_v22  ;;  %v1931_v10 = vunpack.c.l.b16 %v1546_v57  ;;  %v1932_v12 = vunpack.c.h.b16 %v1546_v57  ;;  %v1394_v19 = vmul.f32 0.015625, %v1016_v62  ;;  %v315_v62 = vld [vmem:[%s3782_s28 + $0x460] sm:$0xff] }
 0x1c2   : > { %v4606_v14 = vsel %vm2046_vm5, %v2698_v54, %v2694_v3  ;;  %1090 = vadd.xlane.f32.xlu1 %v1089_v59  ;;  %v2990_v22 = vrot.slane %v1943_v32, %v3943_v30  ;;  %v1991_v54 = vunpack.c.l.b16 %v4569_v43  ;;  %v1992_v57 = vunpack.c.h.b16 %v4569_v43  ;;  %v316_v32 = vld [vmem:[%s3782_s28 + $0x468] sm:$0xff] }
 0x1c3   : > { %v2930_v11 = vrot.slane %v1931_v10, %v3965_v52  ;;  %v2935_v16 = vrot.slane %v1932_v12, %v3970_v56  ;;  %v1553_v21 = vpack.c.bf16 %v1395_v60, %v1394_v19  ;;  %1087 = vadd.xlane.f32.xlu0 %v1086_v63  ;;  %v1109_v55 = vpop.xlane.xlu1 %1108  ;;  %v855_v10 = vsel %vm431_vm0, %v316_v32, 0.0 }
 0x1c4   : > { %v1425_v2 = vmul.f32 0.015625, %v1109_v55  ;;  %v1106_v33 = vpop.xlane.xlu0 %1105  ;;  %v2995_v53 = vsel %vm2018_vm1, %v2994_v28, %v2990_v22  ;;  %v3227_v43 = vrot.slane %v1991_v54, %v3943_v30  ;;  %v3231_v12 = vrot.slane %v1992_v57, %v3957_v39 }
 0x1c5   : > { %v2931_v27 = vsel %vm2039_vm4, %v2930_v11, %v4514_v61  ;;  %v1945_v34 = vunpack.c.l.b16 %v1553_v21  ;;  %v1946_v35 = vunpack.c.h.b16 %v1553_v21  ;;  %v1424_v38 = vmul.f32 0.015625, %v1106_v33 }
 0x1c6   : > { %v4619_v40 = vsel %vm2046_vm5, %v2935_v16, %v2931_v27  ;;  %1132 = vadd.xlane.f32.xlu1 %v1131_v23  ;;  %v810_v61 = vsel %vm431_vm0, %v301_v5, 0.0  ;;  %v852_v11 = vsel %vm431_vm0, %v315_v62, 0.0  ;;  %v364_v16 = vld [vmem:[%s3782_s28 + $0x5e8] sm:$0xff]  ;;  %v3232_v5 = vsel %vm2018_vm1, %v3231_v12, %v3227_v43 }
 0x1c7   : > { %v2999_v7 = vrot.slane %v1945_v34, %v3951_v36  ;;  %v3004_v45 = vrot.slane %v1946_v35, %v3954_v37  ;;  %v4624_v17 = vpack.c.bf16 %v1425_v2, %v1424_v38  ;;  %1129 = vadd.xlane.f32.xlu0 %v1128_v18  ;;  %v1163_v49 = vpop.xlane.xlu1 %1162  ;;  %v999_v18 = vsel %vm431_vm0, %v364_v16, 0.0  ;;  %v378_v38 = vld [vmem:[%s3782_s28 + $0x658] sm:$0xff] }
 0x1c8   : > { %v1443_v58 = vmul.f32 0.015625, %v1163_v49  ;;  %v1160_v59 = vpop.xlane.xlu0 %1159  ;;  %v996_v35 = vsel %vm431_vm0, %v363_v24, 0.0  ;;  %v1041_v32 = vsel %vm431_vm0, %v378_v38, 0.0 }
 0x1c9   : > { %v3000_v20 = vsel %vm2025_vm2, %v2999_v7, %v2995_v53  ;;  %v1442_v60 = vmul.f32 0.015625, %v1160_v59 }
 0x1ca   : > { %v4634_v63 = vsel %vm2032_vm3, %v3004_v45, %v3000_v20  ;;  %814 = vadd.xlane.f32.xlu1 %v813_v41 }
 0x1cb   : > { %v1577_v4 = vpack.c.bf16 %v1443_v58, %v1442_v60  ;;  %811 = vadd.xlane.f32.xlu0 %v810_v61  ;;  %v743_v3 = vpop.xlane.xlu1 %742  ;;  %v377_v61 = vld [vmem:[%s3782_s28 + $0x650] sm:$0xff] }
 0x1cc   : > { %v1303_v19 = vmul.f32 0.015625, %v743_v3  ;;  %v740_v13 = vpop.xlane.xlu0 %739  ;;  %v1038_v62 = vsel %vm431_vm0, %v377_v61, 0.0 }
 0x1cd   : > { %v1993_v21 = vunpack.c.l.b16 %v1577_v4  ;;  %v1994_v55 = vunpack.c.h.b16 %v1577_v4  ;;  %v1302_v23 = vmul.f32 0.015625, %v740_v13  ;;  %v426_v4 = vld [vmem:[%s3782_s28 + $0x7d8] sm:$0xff] }
 0x1ce   : > { %856 = vadd.xlane.f32.xlu1 %v855_v10 }
 0x1cf   : > { %v3236_v22 = vrot.slane %v1993_v21, %v3951_v36  ;;  %v3241_v28 = vrot.slane %v1994_v55, %v3954_v37  ;;  %v1507_v2 = vpack.c.bf16 %v1303_v19, %v1302_v23  ;;  %853 = vadd.xlane.f32.xlu0 %v852_v11  ;;  %v887_v33 = vpop.xlane.xlu1 %886  ;;  %v425_v19 = vld [vmem:[%s3782_s28 + $0x7d0] sm:$0xff]  ;;  %v1185_v23 = vsel %vm431_vm0, %v426_v4, 0.0 }
 0x1d0   : > { %v1351_v27 = vmul.f32 0.015625, %v887_v33  ;;  %v884_v34 = vpop.xlane.xlu0 %883 }
 0x1d1   : > { %v3237_v41 = vsel %vm2025_vm2, %v3236_v22, %v3232_v5  ;;  %v1853_v7 = vunpack.c.l.b16 %v1507_v2  ;;  %v1854_v45 = vunpack.c.h.b16 %v1507_v2  ;;  %v1350_v49 = vmul.f32 0.015625, %v884_v34 }
 0x1d2   : > { %v4651_v53 = vsel %vm2032_vm3, %v3241_v28, %v3237_v41  ;;  %1000 = vadd.xlane.f32.xlu1 %v999_v18  ;;  %v1182_v22 = vsel %vm431_vm0, %v425_v19, 0.0  ;;  %v286_v28 = vld [vmem:[%s3782_s28 + $0x378] sm:$0xff] }
 0x1d3   : > { %v2545_v54 = vrot.slane %v1853_v7, %v3974_v1  ;;  %v2550_v57 = vrot.slane %v1854_v45, %v3981_v6  ;;  %v1531_v58 = vpack.c.bf16 %v1351_v27, %v1350_v49  ;;  %997 = vadd.xlane.f32.xlu0 %v996_v35  ;;  %v929_v59 = vpop.xlane.xlu1 %928  ;;  %v285_v27 = vld [vmem:[%s3782_s28 + $0x370] sm:$0xff]  ;;  %v765_v45 = vsel %vm431_vm0, %v286_v28, 0.0  ;;  %v347_v28 = vld [vmem:[%s3782_s28 + $0x560] sm:$0xff] }
 0x1d4   : > { %v1365_v20 = vmul.f32 0.015625, %v929_v59  ;;  %v926_v60 = vpop.xlane.xlu0 %925  ;;  %v1976_v49 = vunpack.c.h.b16 %v4624_v17 }
 0x1d5   : > { %v2546_v3 = vsel %vm2053_vm6, %v2545_v54, %v4531_v42  ;;  %v1901_v10 = vunpack.c.l.b16 %v1531_v58  ;;  %v1902_v43 = vunpack.c.h.b16 %v1531_v58  ;;  %v1364_v12 = vmul.f32 0.015625, %v926_v60  ;;  %v334_v58 = vld [vmem:[%s3782_s28 + $0x4f8] sm:$0xff] }
 0x1d6   : > { %v4662_v13 = vsel %vm2060_vm7, %v2550_v57, %v2546_v3  ;;  %1042 = vadd.xlane.f32.xlu1 %v1041_v32  ;;  %v762_v57 = vsel %vm431_vm0, %v285_v27, 0.0  ;;  %v3152_v19 = vrot.slane %v1976_v49, %v3957_v39  ;;  %v395_v49 = vld [vmem:[%s3782_s28 + $0x6e0] sm:$0xff] }
 0x1d7   : > { %v2782_v11 = vrot.slane %v1901_v10, %v3974_v1  ;;  %v2787_v16 = vrot.slane %v1902_v43, %v3981_v6  ;;  %v1538_v21 = vpack.c.bf16 %v1365_v20, %v1364_v12  ;;  %1039 = vadd.xlane.f32.xlu0 %v1038_v62  ;;  %v1073_v55 = vpop.xlane.xlu1 %1072  ;;  %v333_v62 = vld [vmem:[%s3782_s28 + $0x4f0] sm:$0xff]  ;;  %v909_v12 = vsel %vm431_vm0, %v334_v58, 0.0 }
 0x1d8   : > { %v1413_v42 = vmul.f32 0.015625, %v1073_v55  ;;  %v1070_v24 = vpop.xlane.xlu0 %1069  ;;  %v348_v55 = vld [vmem:[%s3782_s28 + $0x568] sm:$0xff] }
 0x1d9   : > { %v2783_v2 = vsel %vm2053_vm6, %v2782_v11, %v4544_v8  ;;  %v1915_v33 = vunpack.c.l.b16 %v1538_v21  ;;  %v1916_v18 = vunpack.c.h.b16 %v1538_v21  ;;  %v1412_v5 = vmul.f32 0.015625, %v1070_v24 }
 0x1da   : > { %v4673_v34 = vsel %vm2060_vm7, %v2787_v16, %v2783_v2  ;;  %1186 = vadd.xlane.f32.xlu1 %v1185_v23  ;;  %v1975_v8 = vunpack.c.l.b16 %v4624_v17  ;;  %v906_v21 = vsel %vm431_vm0, %v333_v62, 0.0  ;;  %v410_v62 = vld [vmem:[%s3782_s28 + $0x758] sm:$0xff] }
 0x1db   : > { %v2851_v35 = vrot.slane %v1915_v33, %v3965_v52  ;;  %v2856_v38 = vrot.slane %v1916_v18, %v3970_v56  ;;  %v1562_v41 = vpack.c.bf16 %v1413_v42, %v1412_v5  ;;  %1183 = vadd.xlane.f32.xlu0 %v1182_v22  ;;  %v1115_v7 = vpop.xlane.xlu1 %1114  ;;  %v951_v5 = vsel %vm431_vm0, %v348_v55, 0.0 }
 0x1dc   : > { %v1427_v61 = vmul.f32 0.015625, %v1115_v7  ;;  %v1112_v54 = vpop.xlane.xlu0 %1111  ;;  %v1137_v55 = vsel %vm431_vm0, %v410_v62, 0.0 }
 0x1dd   : > { %v2852_v59 = vsel %vm2039_vm4, %v2851_v35, %v4559_v29  ;;  %v1963_v32 = vunpack.c.l.b16 %v1562_v41  ;;  %v1964_v20 = vunpack.c.h.b16 %v1562_v41  ;;  %v1426_v60 = vmul.f32 0.015625, %v1112_v54  ;;  %v396_v41 = vld [vmem:[%s3782_s28 + $0x6e8] sm:$0xff] }
 0x1de   : > { %v4686_v4 = vsel %vm2046_vm5, %v2856_v38, %v2852_v59  ;;  %766 = vadd.xlane.f32.xlu1 %v765_v45  ;;  %v3148_v29 = vrot.slane %v1975_v8, %v3943_v30  ;;  %v948_v38 = vsel %vm431_vm0, %v347_v28, 0.0  ;;  %v1095_v59 = vsel %vm431_vm0, %v396_v41, 0.0 }
 0x1df   : > { %v3088_v3 = vrot.slane %v1963_v32, %v3965_v52  ;;  %v3093_v17 = vrot.slane %v1964_v20, %v3970_v56  ;;  %v1569_v10 = vpack.c.bf16 %v1427_v61, %v1426_v60  ;;  %763 = vadd.xlane.f32.xlu0 %v762_v57  ;;  %v797_v43 = vpop.xlane.xlu1 %796  ;;  %v1092_v60 = vsel %vm431_vm0, %v395_v49, 0.0 }
 0x1e0   : > { %v1321_v11 = vmul.f32 0.015625, %v797_v43  ;;  %v794_v16 = vpop.xlane.xlu0 %793 }
 0x1e1   : > { %v3089_v23 = vsel %vm2039_vm4, %v3088_v3, %v4578_v9  ;;  %v1977_v42 = vunpack.c.l.b16 %v1569_v10  ;;  %v1978_v24 = vunpack.c.h.b16 %v1569_v10  ;;  %v1320_v22 = vmul.f32 0.015625, %v794_v16 }
 0x1e2   : > { %v4699_v2 = vsel %vm2046_vm5, %v3093_v17, %v3089_v23  ;;  %910 = vadd.xlane.f32.xlu1 %v909_v12  ;;  %v3153_v9 = vsel %vm2018_vm1, %v3152_v19, %v3148_v29  ;;  %v409_v12 = vld [vmem:[%s3782_s28 + $0x750] sm:$0xff]  ;;  %vm5204_vm1 = vcmask 654912  }
 0x1e3   : > { %v3157_v30 = vrot.slane %v1977_v42, %v3951_v36  ;;  %v3162_v39 = vrot.slane %v1978_v24, %v3954_v37  ;;  %v1516_v33 = vpack.c.bf16 %v1321_v11, %v1320_v22  ;;  %907 = vadd.xlane.f32.xlu0 %v906_v21  ;;  %v839_v18 = vpop.xlane.xlu1 %838  ;;  %v1134_v42 = vsel %vm431_vm0, %v409_v12, 0.0  ;;  %v318_v24 = vld [vmem:[%s3782_s28 + $0x478] sm:$0xff] }
 0x1e4   : > { %v1335_v27 = vmul.f32 0.015625, %v839_v18  ;;  %v836_v35 = vpop.xlane.xlu0 %835 }
 0x1e5   : > { %v3158_v7 = vsel %vm2025_vm2, %v3157_v30, %v3153_v9  ;;  %v1871_v45 = vunpack.c.l.b16 %v1516_v33  ;;  %v1872_v8 = vunpack.c.h.b16 %v1516_v33  ;;  %v1334_v36 = vmul.f32 0.015625, %v836_v35  ;;  %v317_v33 = vld [vmem:[%s3782_s28 + $0x470] sm:$0xff]  ;;  %vm5205_vm2 = vmmov %vm5204_vm1 }
 0x1e6   : > { %v4710_v37 = vsel %vm2032_vm3, %v3162_v39, %v3158_v7  ;;  %952 = vadd.xlane.f32.xlu1 %v951_v5  ;;  %v858_v7 = vsel %vm431_vm0, %v317_v33, 0.0  ;;  %vm5206_vm3 = vmmov %vm5204_vm1 }
 0x1e7   : > { %v2634_v61 = vrot.slane %v1871_v45, %v3996_v31  ;;  %v2639_v54 = vrot.slane %v1872_v8, %v4003_v44  ;;  %v1523_v57 = vpack.c.bf16 %v1335_v27, %v1334_v36  ;;  %949 = vadd.xlane.f32.xlu0 %v948_v38  ;;  %v983_v58 = vpop.xlane.xlu1 %982  ;;  %v861_v38 = vsel %vm431_vm0, %v318_v24, 0.0  ;;  %v366_v45 = vld [vmem:[%s3782_s28 + $0x5f8] sm:$0xff] }
 0x1e8   : > { %v1383_v32 = vmul.f32 0.015625, %v983_v58  ;;  %v980_v20 = vpop.xlane.xlu0 %979 }
 0x1e9   : > { %v2635_v3 = vsel %vm2067_vm8, %v2634_v61, %v4593_v50  ;;  %v1885_v17 = vunpack.c.l.b16 %v1523_v57  ;;  %v1886_v10 = vunpack.c.h.b16 %v1523_v57  ;;  %v1382_v43 = vmul.f32 0.015625, %v980_v20 }
 0x1ea   : > { %v4721_v29 = vsel %vm5204_vm1, %v2639_v54, %v2635_v3  ;;  %1096 = vadd.xlane.f32.xlu1 %v1095_v59  ;;  %v365_v54 = vld [vmem:[%s3782_s28 + $0x5f0] sm:$0xff] }
 0x1eb   : > { %v2703_v19 = vrot.slane %v1885_v17, %v3974_v1  ;;  %v2708_v11 = vrot.slane %v1886_v10, %v3981_v6  ;;  %v1547_v16 = vpack.c.bf16 %v1383_v32, %v1382_v43  ;;  %1093 = vadd.xlane.f32.xlu0 %v1092_v60  ;;  %v1025_v21 = vpop.xlane.xlu1 %1024  ;;  %v1005_v60 = vsel %vm431_vm0, %v366_v45, 0.0  ;;  %v380_v17 = vld [vmem:[%s3782_s28 + $0x668] sm:$0xff] }
 0x1ec   : > { %v1397_v50 = vmul.f32 0.015625, %v1025_v21  ;;  %v1022_v23 = vpop.xlane.xlu0 %1021  ;;  %v1002_v3 = vsel %vm431_vm0, %v365_v54, 0.0 }
 0x1ed   : > { %v2704_v22 = vsel %vm2053_vm6, %v2703_v19, %v4606_v14  ;;  %v1933_v28 = vunpack.c.l.b16 %v1547_v16  ;;  %v1934_v30 = vunpack.c.h.b16 %v1547_v16  ;;  %v1396_v39 = vmul.f32 0.015625, %v1022_v23 }
 0x1ee   : > { %v4732_v18 = vsel %vm2060_vm7, %v2708_v11, %v2704_v22  ;;  %1138 = vadd.xlane.f32.xlu1 %v1137_v55  ;;  %v379_v11 = vld [vmem:[%s3782_s28 + $0x660] sm:$0xff] }
 0x1ef   : > { %v2940_v5 = vrot.slane %v1933_v28, %v3974_v1  ;;  %v2945_v9 = vrot.slane %v1934_v30, %v3981_v6  ;;  %v1554_v27 = vpack.c.bf16 %v1397_v50, %v1396_v39  ;;  %1135 = vadd.xlane.f32.xlu0 %v1134_v42  ;;  %v1169_v35 = vpop.xlane.xlu1 %1168  ;;  %v1047_v42 = vsel %vm431_vm0, %v380_v17, 0.0  ;;  %v428_v28 = vld [vmem:[%s3782_s28 + $0x7e8] sm:$0xff] }
 0x1f0   : > { %v1445_v14 = vmul.f32 0.015625, %v1169_v35  ;;  %v1166_v41 = vpop.xlane.xlu0 %1165  ;;  %v1044_v22 = vsel %vm431_vm0, %v379_v11, 0.0 }
 0x1f1   : > { %v2941_v8 = vsel %vm2053_vm6, %v2940_v5, %v4619_v40  ;;  %v1947_v36 = vunpack.c.l.b16 %v1554_v27  ;;  %v1948_v49 = vunpack.c.h.b16 %v1554_v27  ;;  %v1444_v61 = vmul.f32 0.015625, %v1166_v41 }
 0x1f2   : > { %v4743_v57 = vsel %vm2060_vm7, %v2945_v9, %v2941_v8  ;;  %862 = vadd.xlane.f32.xlu1 %v861_v38  ;;  %v427_v9 = vld [vmem:[%s3782_s28 + $0x7e0] sm:$0xff] }
 0x1f3   : > { %v3009_v58 = vrot.slane %v1947_v36, %v3965_v52  ;;  %v3014_v59 = vrot.slane %v1948_v49, %v3970_v56  ;;  %v1578_v32 = vpack.c.bf16 %v1445_v14, %v1444_v61  ;;  %859 = vadd.xlane.f32.xlu0 %v858_v7  ;;  %v749_v20 = vpop.xlane.xlu1 %748  ;;  %v1191_v7 = vsel %vm431_vm0, %v428_v28, 0.0  ;;  %v350_v36 = vld [vmem:[%s3782_s28 + $0x578] sm:$0xff] }
 0x1f4   : > { %v1305_v40 = vmul.f32 0.015625, %v749_v20  ;;  %v746_v62 = vpop.xlane.xlu0 %745  ;;  %v1188_v8 = vsel %vm431_vm0, %v427_v9, 0.0 }
 0x1f5   : > { %v3010_v10 = vsel %vm2039_vm4, %v3009_v58, %v4634_v63  ;;  %v1995_v43 = vunpack.c.l.b16 %v1578_v32  ;;  %v1996_v12 = vunpack.c.h.b16 %v1578_v32  ;;  %v1304_v19 = vmul.f32 0.015625, %v746_v62 }
 0x1f6   : > { %v4754_v16 = vsel %vm2046_vm5, %v3014_v59, %v3010_v10  ;;  %1006 = vadd.xlane.f32.xlu1 %v1005_v60  ;;  %v349_v59 = vld [vmem:[%s3782_s28 + $0x570] sm:$0xff] }
 0x1f7   : > { %v3246_v21 = vrot.slane %v1995_v43, %v3965_v52  ;;  %v3251_v55 = vrot.slane %v1996_v12, %v3970_v56  ;;  %v1508_v50 = vpack.c.bf16 %v1305_v40, %v1304_v19  ;;  %1003 = vadd.xlane.f32.xlu0 %v1002_v3  ;;  %v893_v23 = vpop.xlane.xlu1 %892  ;;  %v957_v3 = vsel %vm431_vm0, %v350_v36, 0.0  ;;  %v398_v43 = vld [vmem:[%s3782_s28 + $0x6f8] sm:$0xff] }
 0x1f8   : > { %v1353_v63 = vmul.f32 0.015625, %v893_v23  ;;  %v890_v24 = vpop.xlane.xlu0 %889  ;;  %v954_v10 = vsel %vm431_vm0, %v349_v59, 0.0 }
 0x1f9   : > { %v3247_v30 = vsel %vm2039_vm4, %v3246_v21, %v4651_v53  ;;  %v1855_v39 = vunpack.c.l.b16 %v1508_v50  ;;  %v1856_v33 = vunpack.c.h.b16 %v1508_v50  ;;  %v1352_v5 = vmul.f32 0.015625, %v890_v24 }
 0x1fa   : > { %v4765_v27 = vsel %vm2046_vm5, %v3251_v55, %v3247_v30  ;;  %1048 = vadd.xlane.f32.xlu1 %v1047_v42  ;;  %v397_v55 = vld [vmem:[%s3782_s28 + $0x6f0] sm:$0xff] }
 0x1fb   : > { %v2555_v35 = vrot.slane %v1855_v39, %v3996_v31  ;;  %v2560_v38 = vrot.slane %v1856_v33, %v4003_v44  ;;  %v1532_v14 = vpack.c.bf16 %v1353_v63, %v1352_v5  ;;  %1045 = vadd.xlane.f32.xlu0 %v1044_v22  ;;  %v935_v41 = vpop.xlane.xlu1 %934  ;;  %v1101_v22 = vsel %vm431_vm0, %v398_v43, 0.0  ;;  %v412_v39 = vld [vmem:[%s3782_s28 + $0x768] sm:$0xff] }
 0x1fc   : > { %v1367_v53 = vmul.f32 0.015625, %v935_v41  ;;  %v932_v45 = vpop.xlane.xlu0 %931  ;;  %v1098_v30 = vsel %vm431_vm0, %v397_v55, 0.0 }
 0x1fd   : > { %v2556_v49 = vsel %vm2067_vm8, %v2555_v35, %v4662_v13  ;;  %v1903_v61 = vunpack.c.l.b16 %v1532_v14  ;;  %v1904_v54 = vunpack.c.h.b16 %v1532_v14  ;;  %v1366_v58 = vmul.f32 0.015625, %v932_v45 }
 0x1fe   : > { %v4776_v32 = vsel %vm5205_vm2, %v2560_v38, %v2556_v49  ;;  %1192 = vadd.xlane.f32.xlu1 %v1191_v7  ;;  %v411_v38 = vld [vmem:[%s3782_s28 + $0x760] sm:$0xff] }
 0x1ff   : > { %v2792_v20 = vrot.slane %v1903_v61, %v3996_v31  ;;  %v2797_v60 = vrot.slane %v1904_v54, %v4003_v44  ;;  %v1539_v40 = vpack.c.bf16 %v1367_v53, %v1366_v58  ;;  %1189 = vadd.xlane.f32.xlu0 %v1188_v8  ;;  %v1079_v62 = vpop.xlane.xlu1 %1078  ;;  %v1143_v8 = vsel %vm431_vm0, %v412_v39, 0.0  ;;  %v382_v61 = vld [vmem:[%s3782_s28 + $0x678] sm:$0xff] }
 0x200   : > { %v1415_v13 = vmul.f32 0.015625, %v1079_v62  ;;  %v1076_v17 = vpop.xlane.xlu0 %1075  ;;  %v1140_v49 = vsel %vm431_vm0, %v411_v38, 0.0  ;;  %v414_v39 = vld [vmem:[%s3782_s28 + $0x778] sm:$0xff] }
 0x201   : > { %v2793_v12 = vsel %vm2067_vm8, %v2792_v20, %v4673_v34  ;;  %v1917_v19 = vunpack.c.l.b16 %v1539_v40  ;;  %v1918_v11 = vunpack.c.h.b16 %v1539_v40  ;;  %v1414_v21 = vmul.f32 0.015625, %v1076_v17 }
 0x202   : > { %v4787_v50 = vsel %vm5206_vm3, %v2797_v60, %v2793_v12  ;;  %958 = vadd.xlane.f32.xlu1 %v957_v3  ;;  %v381_v60 = vld [vmem:[%s3782_s28 + $0x670] sm:$0xff] }
 0x203   : > { %v2861_v23 = vrot.slane %v1917_v19, %v3974_v1  ;;  %v2866_v42 = vrot.slane %v1918_v11, %v3981_v6  ;;  %v1563_v63 = vpack.c.bf16 %v1415_v13, %v1414_v21  ;;  %955 = vadd.xlane.f32.xlu0 %v954_v10  ;;  %v1121_v24 = vpop.xlane.xlu1 %1120  ;;  %v1053_v10 = vsel %vm431_vm0, %v382_v61, 0.0  ;;  %v430_v19 = vld [vmem:[%s3782_s28 + $0x7f8] sm:$0xff] }
 0x204   : > { %v1429_v34 = vmul.f32 0.015625, %v1121_v24  ;;  %v1118_v28 = vpop.xlane.xlu0 %1117  ;;  %v1050_v12 = vsel %vm431_vm0, %v381_v60, 0.0 }
 0x205   : > { %v2862_v33 = vsel %vm2053_vm6, %v2861_v23, %v4686_v4  ;;  %v1965_v5 = vunpack.c.l.b16 %v1563_v63  ;;  %v1966_v9 = vunpack.c.h.b16 %v1563_v63  ;;  %v1428_v35 = vmul.f32 0.015625, %v1118_v28 }
 0x206   : > { %v4798_v14 = vsel %vm2060_vm7, %v2866_v42, %v2862_v33  ;;  %1102 = vadd.xlane.f32.xlu1 %v1101_v22  ;;  %v3629_v33 = vld [vmem:[%s5192_s1 + $0x40] sm:$0xff]  }
 0x207   : > { %v3098_v41 = vrot.slane %v1965_v5, %v3974_v1  ;;  %v3103_v7 = vrot.slane %v1966_v9, %v3981_v6  ;;  %v1570_v53 = vpack.c.bf16 %v1429_v34, %v1428_v35  ;;  %1099 = vadd.xlane.f32.xlu0 %v1098_v30  ;;  %v803_v45 = vpop.xlane.xlu1 %802  ;;  %v1197_v34 = vsel %vm431_vm0, %v430_v19, 0.0  ;;  %3568 = vmatprep.subr.bf16.mxu0 %v3629_v33  ;;  %v3633_v19 = vld [vmem:[%s5192_s1 + $0x50] sm:$0xff]  }
 0x208   : > { %v1323_v4 = vmul.f32 0.015625, %v803_v45  ;;  %v800_v36 = vpop.xlane.xlu0 %799 }
 0x209   : > { %v3099_v54 = vsel %vm2053_vm6, %v3098_v41, %v4699_v2  ;;  %v1979_v58 = vunpack.c.l.b16 %v1570_v53  ;;  %v1980_v59 = vunpack.c.h.b16 %v1570_v53  ;;  %v1322_v20 = vmul.f32 0.015625, %v800_v36  ;;  %v413_v41 = vld [vmem:[%s3782_s28 + $0x770] sm:$0xff] }
 0x20a   : > { %v4809_v40 = vsel %vm2060_vm7, %v3103_v7, %v3099_v54  ;;  %1144 = vadd.xlane.f32.xlu1 %v1143_v8  ;;  %v3630_v7 = vld [vmem:[%s5192_s1] sm:$0xff]   ;;  %v1149_v36 = vsel %vm431_vm0, %v414_v39, 0.0  ;;  %v1146_v54 = vsel %vm431_vm0, %v413_v41, 0.0 }
 0x20b   : > { %v3167_v62 = vrot.slane %v1979_v58, %v3965_v52  ;;  %v3172_v3 = vrot.slane %v1980_v59, %v3970_v56  ;;  %v1517_v13 = vpack.c.bf16 %v1323_v4, %v1322_v20  ;;  %1141 = vadd.xlane.f32.xlu0 %v1140_v49  ;;  %v845_v17 = vpop.xlane.xlu1 %844  ;;  %v429_v52 = vld [vmem:[%s3782_s28 + $0x7f0] sm:$0xff]  ;;  %3569 = vmatpush3.bf16.msra.mxu0 %v3630_v7  ;;  %v3631_v58 = vld [vmem:[%s5192_s1 + $0x48] sm:$0xff]  }
 0x20c   : > { %v1337_v2 = vmul.f32 0.015625, %v845_v17  ;;  %v842_v43 = vpop.xlane.xlu0 %841  ;;  %v1194_v30 = vsel %vm431_vm0, %v429_v52, 0.0  ;;  %3570 = vmatprep.subr.bf16.mxu0 %v3631_v58  ;;  %v3634_v52 = vld [vmem:[%s5192_s1 + $0x10] sm:$0xff]   ;;  %vm5209_vm0 = vmmov %vm5204_vm1 }
 0x20d   : > { %v3168_v11 = vsel %vm2039_vm4, %v3167_v62, %v4710_v37  ;;  %v1873_v21 = vunpack.c.l.b16 %v1517_v13  ;;  %v1874_v55 = vunpack.c.h.b16 %v1517_v13  ;;  %v1336_v23 = vmul.f32 0.015625, %v842_v43  ;;  %vm5207_vm4 = vmmov %vm5203_vm11 }
 0x20e   : > { %v4820_v56 = vsel %vm2046_vm5, %v3172_v3, %v3168_v11  ;;  %1054 = vadd.xlane.f32.xlu1 %v1053_v10  ;;  %v3632_v3 = vld [vmem:[%s5192_s1 + $0x8] sm:$0xff]   ;;  %vm5208_vm5 = vmmov %vm5204_vm1 }
 0x20f   : > { %v2644_v42 = vrot.slane %v1873_v21, %v4010_v51  ;;  %v2649_v63 = vrot.slane %v1874_v55, %v4019_v0  ;;  %v1524_v24 = vpack.c.bf16 %v1337_v2, %v1336_v23  ;;  %1051 = vadd.xlane.f32.xlu0 %v1050_v12  ;;  %v989_v22 = vpop.xlane.xlu1 %988  ;;  %3571 = vmatpush3.bf16.msra.mxu0 %v3632_v3  ;;  %vm5210_vm9 = vmmov %vm5207_vm4 }
 0x210   : > { %v1385_v37 = vmul.f32 0.015625, %v989_v22  ;;  %v986_v28 = vpop.xlane.xlu0 %985  ;;  %3572 = vmatprep.subr.bf16.mxu0 %v3633_v19  ;;  %vm5211_vm11 = vmmov %vm5207_vm4 }
 0x211   : > { %v2645_v5 = vsel %vm2081_vm10, %v2644_v42, %v4721_v29  ;;  %v1887_v9 = vunpack.c.l.b16 %v1524_v24  ;;  %v1888_v35 = vunpack.c.h.b16 %v1524_v24  ;;  %v1384_v38 = vmul.f32 0.015625, %v986_v28  ;;  %v3635_v28 = vld [vmem:[%s5192_s1 + $0x58] sm:$0xff]   ;;  %vm5212_vm1 = vmmov %vm5209_vm0 }
 0x212   : > { %v4837_v53 = vsel %vm5207_vm4, %v2649_v63, %v2645_v5  ;;  %1198 = vadd.xlane.f32.xlu1 %v1197_v34  ;;  %vm5213_vm2 = vmmov %vm5209_vm0 }
 0x213   : > { %v2713_v45 = vrot.slane %v1887_v9, %v3996_v31  ;;  %v2718_v8 = vrot.slane %v1888_v35, %v4003_v44  ;;  %v1548_v4 = vpack.c.bf16 %v1385_v37, %v1384_v38  ;;  %1195 = vadd.xlane.f32.xlu0 %v1194_v30  ;;  %v1031_v29 = vpop.xlane.xlu1 %1030  ;;  %3573 = vmatpush3.bf16.msra.mxu0 %v3634_v52  ;;  %v3636_v9 = vld [vmem:[%s5192_s1 + $0x18] sm:$0xff]   ;;  %vm5216_vm3 = vmmov %vm5209_vm0 }
 0x214   : > { %v1399_v49 = vmul.f32 0.015625, %v1031_v29  ;;  %v1028_v61 = vpop.xlane.xlu0 %1027  ;;  %3574 = vmatprep.subr.bf16.mxu0 %v3635_v28 }
 0x215   : > { %v2714_v59 = vsel %vm2067_vm8, %v2713_v45, %v4732_v18  ;;  %v1935_v20 = vunpack.c.l.b16 %v1548_v4  ;;  %v1936_v60 = vunpack.c.h.b16 %v1548_v4  ;;  %v1398_v62 = vmul.f32 0.015625, %v1028_v61  ;;  %v3637_v4 = vld [vmem:[%s5192_s1 + $0x60] sm:$0xff]  }
 0x216   : > { %v4852_v13 = vsel %vm5208_vm5, %v2718_v8, %v2714_v59  ;;  %1150 = vadd.xlane.f32.xlu1 %v1149_v36 }
 0x217   : > { %v2950_v17 = vrot.slane %v1935_v20, %v3996_v31  ;;  %v2955_v10 = vrot.slane %v1936_v60, %v4003_v44  ;;  %v1555_v2 = vpack.c.bf16 %v1399_v49, %v1398_v62  ;;  %1147 = vadd.xlane.f32.xlu0 %v1146_v54  ;;  %v1175_v43 = vpop.xlane.xlu1 %1174  ;;  %3575 = vmatpush3.bf16.msra.mxu0 %v3636_v9  ;;  %v3638_v54 = vld [vmem:[%s5192_s1 + $0x20] sm:$0xff]  }
 0x218   : > { %v1447_v18 = vmul.f32 0.015625, %v1175_v43  ;;  %v1172_v12 = vpop.xlane.xlu0 %1171  ;;  %3576 = vmatprep.subr.bf16.mxu0 %v3637_v4 }
 0x219   : > { %v2951_v11 = vsel %vm2067_vm8, %v2950_v17, %v4743_v57  ;;  %v1949_v21 = vunpack.c.l.b16 %v1555_v2  ;;  %v1950_v55 = vunpack.c.h.b16 %v1555_v2  ;;  %v1446_v23 = vmul.f32 0.015625, %v1172_v12  ;;  %v3639_v17 = vld [vmem:[%s5192_s1 + $0x68] sm:$0xff]  }
 0x21a   : > { %v4865_v42 = vsel %vm5209_vm0, %v2955_v10, %v2951_v11  ;;  %v3640_v12 = vld [vmem:[%s5192_s1 + $0x28] sm:$0xff]  }
 0x21b   : > { %v3019_v63 = vrot.slane %v1949_v21, %v3974_v1  ;;  %v3024_v24 = vrot.slane %v1950_v55, %v3981_v6  ;;  %v1579_v22 = vpack.c.bf16 %v1447_v18, %v1446_v23  ;;  %v755_v34 = vpop.xlane.xlu1 %754  ;;  %3577 = vmatpush3.bf16.msra.mxu0 %v3638_v54 }
 0x21c   : > { %v1307_v37 = vmul.f32 0.015625, %v755_v34  ;;  %v752_v57 = vpop.xlane.xlu0 %751  ;;  %3578 = vmatprep.subr.bf16.mxu0 %v3639_v17 }
 0x21d   : > { %v3020_v30 = vsel %vm2053_vm6, %v3019_v63, %v4754_v16  ;;  %v1997_v39 = vunpack.c.l.b16 %v1579_v22  ;;  %v1998_v33 = vunpack.c.h.b16 %v1579_v22  ;;  %v1306_v5 = vmul.f32 0.015625, %v752_v57  ;;  %v3641_v63 = vld [vmem:[%s5192_s1 + $0x70] sm:$0xff]  }
 0x21e   : > { %v4878_v35 = vsel %vm2060_vm7, %v3024_v24, %v3020_v30  ;;  %v3642_v57 = vld [vmem:[%s5192_s1 + $0x30] sm:$0xff]  }
 0x21f   : > { %v3256_v38 = vrot.slane %v1997_v39, %v3974_v1  ;;  %v3261_v41 = vrot.slane %v1998_v33, %v3981_v6  ;;  %v1509_v7 = vpack.c.bf16 %v1307_v37, %v1306_v5  ;;  %v899_v45 = vpop.xlane.xlu1 %898  ;;  %3579 = vmatpush3.bf16.msra.mxu0 %v3640_v12 }
 0x220   : > { %v1355_v8 = vmul.f32 0.015625, %v899_v45  ;;  %v896_v16 = vpop.xlane.xlu0 %895  ;;  %3580 = vmatprep.subr.bf16.mxu0 %v3641_v63 }
 0x221   : > { %v3257_v29 = vsel %vm2053_vm6, %v3256_v38, %v4765_v27  ;;  %v1857_v36 = vunpack.c.l.b16 %v1509_v7  ;;  %v1858_v49 = vunpack.c.h.b16 %v1509_v7  ;;  %v1354_v61 = vmul.f32 0.015625, %v896_v16  ;;  %v3644_v16 = vld [vmem:[%s5192_s1 + $0x38] sm:$0xff]  }
 0x222   : > { %v4891_v58 = vsel %vm2060_vm7, %v3261_v41, %v3257_v29 }
 0x223   : > { %v2565_v59 = vrot.slane %v1857_v36, %v4010_v51  ;;  %v2570_v20 = vrot.slane %v1858_v49, %v4019_v0  ;;  %v1533_v60 = vpack.c.bf16 %v1355_v8, %v1354_v61  ;;  %v941_v62 = vpop.xlane.xlu1 %940  ;;  %3581 = vmatpush3.bf16.msra.mxu0 %v3642_v57 }
 0x224   : > { %v1369_v3 = vmul.f32 0.015625, %v941_v62  ;;  %v938_v27 = vpop.xlane.xlu0 %937 }
 0x225   : > { %v2566_v10 = vsel %vm2081_vm10, %v2565_v59, %v4776_v32  ;;  %v1905_v2 = vunpack.c.l.b16 %v1533_v60  ;;  %v1906_v43 = vunpack.c.h.b16 %v1533_v60  ;;  %v1368_v18 = vmul.f32 0.015625, %v938_v27 }
 0x226   : > { %v4904_v19 = vsel %vm5210_vm9, %v2570_v20, %v2566_v10  ;;  %vm5220_vm9 = vmmov %vm5212_vm1 }
 0x227   : > { %v2802_v11 = vrot.slane %v1905_v2, %v4010_v51  ;;  %v2807_v21 = vrot.slane %v1906_v43, %v4019_v0  ;;  %v1540_v55 = vpack.c.bf16 %v1369_v3, %v1368_v18  ;;  %v1085_v23 = vpop.xlane.xlu1 %1084 }
 0x228   : > { %v1417_v52 = vmul.f32 0.015625, %v1085_v23  ;;  %v1082_v32 = vpop.xlane.xlu0 %1081 }
 0x229   : > { %v2803_v24 = vsel %vm2081_vm10, %v2802_v11, %v4787_v50  ;;  %v1919_v22 = vunpack.c.l.b16 %v1540_v55  ;;  %v1920_v34 = vunpack.c.h.b16 %v1540_v55  ;;  %v1416_v37 = vmul.f32 0.015625, %v1082_v32  ;;  %v3643_v50 = vld [vmem:[%s5192_s1 + $0x78] sm:$0xff]  }
 0x22a   : > { %v4917_v28 = vsel %vm5211_vm11, %v2807_v21, %v2803_v24  ;;  %3582 = vmatprep.subr.bf16.mxu0 %v3643_v50  ;;  %vm3307_vm11 = vcmask 1043459  }
 0x22b   : > { %v2871_v30 = vrot.slane %v1919_v22, %v3996_v31  ;;  %v2876_v39 = vrot.slane %v1920_v34, %v4003_v44  ;;  %v1564_v33 = vpack.c.bf16 %v1417_v52, %v1416_v37  ;;  %v1127_v5 = vpop.xlane.xlu1 %1126  ;;  %3583 = vmatpush3.bf16.msra.mxu0 %v3644_v16 }
 0x22c   : > { %v1431_v9 = vmul.f32 0.015625, %v1127_v5  ;;  %v1124_v38 = vpop.xlane.xlu0 %1123 }
 0x22d   : > { %v2872_v41 = vsel %vm2067_vm8, %v2871_v30, %v4798_v14  ;;  %v1967_v7 = vunpack.c.l.b16 %v1564_v33  ;;  %v1968_v45 = vunpack.c.h.b16 %v1564_v33  ;;  %v1430_v8 = vmul.f32 0.015625, %v1124_v38 }
 0x22e   : > { %v4930_v4 = vsel %vm5212_vm1, %v2876_v39, %v2872_v41  ;;  %vm3311_vm1 = vcmask 1045509  }
 0x22f   : > { %v3108_v29 = vrot.slane %v1967_v7, %v3996_v31  ;;  %v3113_v36 = vrot.slane %v1968_v45, %v4003_v44  ;;  %v1571_v49 = vpack.c.bf16 %v1431_v9, %v1430_v8  ;;  %v809_v61 = vpop.xlane.xlu1 %808 }
 0x230   : > { %v1325_v54 = vmul.f32 0.015625, %v809_v61  ;;  %v806_v14 = vpop.xlane.xlu0 %805 }
 0x231   : > { %v3109_v59 = vsel %vm2067_vm8, %v3108_v29, %v4809_v40  ;;  %v1981_v20 = vunpack.c.l.b16 %v1571_v49  ;;  %v1982_v60 = vunpack.c.h.b16 %v1571_v49  ;;  %v1324_v62 = vmul.f32 0.015625, %v806_v14 }
 0x232   : > { %v4937_v3 = vsel %vm5213_vm2, %v3113_v36, %v3109_v59  ;;  %vm3313_vm2 = vcmask 1046534  }
 0x233   : > { %v3177_v27 = vrot.slane %v1981_v20, %v3974_v1  ;;  %v3182_v17 = vrot.slane %v1982_v60, %v3981_v6  ;;  %v1518_v10 = vpack.c.bf16 %v1325_v54, %v1324_v62  ;;  %v851_v2 = vpop.xlane.xlu1 %850 }
 0x234   : > { %v1339_v43 = vmul.f32 0.015625, %v851_v2  ;;  %v848_v18 = vpop.xlane.xlu0 %847 }
 0x235   : > { %v3178_v12 = vsel %vm2053_vm6, %v3177_v27, %v4820_v56  ;;  %v1875_v11 = vunpack.c.l.b16 %v1518_v10  ;;  %v1876_v21 = vunpack.c.h.b16 %v1518_v10  ;;  %v1338_v40 = vmul.f32 0.015625, %v848_v18  ;;  %vm5214_vm6 = vmmov %vm5207_vm4 }
 0x236   : > { %v4944_v55 = vsel %vm2060_vm7, %v3182_v17, %v3178_v12  ;;  %vm5215_vm7 = vmmov %vm5207_vm4 }
 0x237   : > { %v2654_v23 = vrot.slane %v1875_v11, %v4034_v25  ;;  %v2659_v52 = vrot.slane %v1876_v21, %v4037_v26  ;;  %v1525_v1 = vpack.c.bf16 %v1339_v43, %v1338_v40  ;;  %v995_v32 = vpop.xlane.xlu1 %994  ;;  %vm5217_vm4 = vmmov %vm5209_vm0 }
 0x238   : > { %v1387_v6 = vmul.f32 0.015625, %v995_v32  ;;  %v992_v63 = vpop.xlane.xlu0 %991  ;;  %vm5218_vm5 = vmmov %vm5214_vm6 }
 0x239   : > { %v2655_v24 = vsel %vm2095_vm12, %v2654_v23, %v4837_v53  ;;  %v1889_v22 = vunpack.c.l.b16 %v1525_v1  ;;  %v1890_v34 = vunpack.c.h.b16 %v1525_v1  ;;  %v1386_v56 = vmul.f32 0.015625, %v992_v63  ;;  %vm5219_vm0 = vmmov %vm5218_vm5 }
 0x23a   : > { %v4951_v37 = vsel %vm2102_vm13, %v2659_v52, %v2655_v24 }
 0x23b   : > { %v2723_v57 = vrot.slane %v1889_v22, %v4010_v51  ;;  %v2728_v30 = vrot.slane %v1890_v34, %v4019_v0  ;;  %v1549_v39 = vpack.c.bf16 %v1387_v6, %v1386_v56  ;;  %v1037_v33 = vpop.xlane.xlu1 %1036 }
 0x23c   : > { %v1401_v5 = vmul.f32 0.015625, %v1037_v33  ;;  %v1034_v50 = vpop.xlane.xlu0 %1033 }
 0x23d   : > { %v2724_v9 = vsel %vm2081_vm10, %v2723_v57, %v4852_v13  ;;  %v1937_v38 = vunpack.c.l.b16 %v1549_v39  ;;  %v1938_v41 = vunpack.c.h.b16 %v1549_v39  ;;  %v1400_v53 = vmul.f32 0.015625, %v1034_v50 }
 0x23e   : > { %v4958_v7 = vsel %vm5214_vm6, %v2728_v30, %v2724_v9  ;;  %vm5221_vm6 = vmmov %vm5219_vm0 }
 0x23f   : > { %v2960_v45 = vrot.slane %v1937_v38, %v4010_v51  ;;  %v2965_v8 = vrot.slane %v1938_v41, %v4019_v0  ;;  %v1556_v16 = vpack.c.bf16 %v1401_v5, %v1400_v53  ;;  %v1181_v29 = vpop.xlane.xlu1 %1180 }
 0x240   : > { %v1449_v36 = vmul.f32 0.015625, %v1181_v29  ;;  %v1178_v49 = vpop.xlane.xlu0 %1177 }
 0x241   : > { %v2961_v61 = vsel %vm2081_vm10, %v2960_v45, %v4865_v42  ;;  %v1951_v54 = vunpack.c.l.b16 %v1556_v16  ;;  %v1952_v14 = vunpack.c.h.b16 %v1556_v16  ;;  %v1448_v13 = vmul.f32 0.015625, %v1178_v49 }
 0x242   : > { %v4965_v59 = vsel %vm5215_vm7, %v2965_v8, %v2961_v61  ;;  %vm5222_vm7 = vmmov %vm5219_vm0 }
 0x243   : > { %v3029_v20 = vrot.slane %v1951_v54, %v3996_v31  ;;  %v3034_v60 = vrot.slane %v1952_v14, %v4003_v44  ;;  %v1580_v62 = vpack.c.bf16 %v1449_v36, %v1448_v13  ;;  %v761_v27 = vpop.xlane.xlu1 %760 }
 0x244   : > { %v1309_v17 = vmul.f32 0.015625, %v761_v27  ;;  %v758_v10 = vpop.xlane.xlu0 %757 }
 0x245   : > { %v3030_v2 = vsel %vm2067_vm8, %v3029_v20, %v4878_v35  ;;  %v1999_v43 = vunpack.c.l.b16 %v1580_v62  ;;  %v2000_v18 = vunpack.c.h.b16 %v1580_v62  ;;  %v1308_v42 = vmul.f32 0.015625, %v758_v10 }
 0x246   : > { %v4972_v12 = vsel %vm5216_vm3, %v3034_v60, %v3030_v2  ;;  %vm3315_vm3 = vcmask 1047559  }
 0x247   : > { %v3266_v11 = vrot.slane %v1999_v43, %v3996_v31  ;;  %v3271_v21 = vrot.slane %v2000_v18, %v4003_v44  ;;  %v1510_v40 = vpack.c.bf16 %v1309_v17, %v1308_v42  ;;  %v905_v23 = vpop.xlane.xlu1 %904 }
 0x248   : > { %v1357_v52 = vmul.f32 0.015625, %v905_v23  ;;  %v902_v1 = vpop.xlane.xlu0 %901 }
 0x249   : > { %v3267_v32 = vsel %vm2067_vm8, %v3266_v11, %v4891_v58  ;;  %v1859_v6 = vunpack.c.l.b16 %v1510_v40  ;;  %v1860_v63 = vunpack.c.h.b16 %v1510_v40  ;;  %v1356_v35 = vmul.f32 0.015625, %v902_v1 }
 0x24a   : > { %v4979_v24 = vsel %vm5217_vm4, %v3271_v21, %v3267_v32 }
 0x24b   : > { %v2575_v22 = vrot.slane %v1859_v6, %v4034_v25  ;;  %v2580_v34 = vrot.slane %v1860_v63, %v4037_v26  ;;  %v1534_v56 = vpack.c.bf16 %v1357_v52, %v1356_v35  ;;  %v947_v57 = vpop.xlane.xlu1 %946 }
 0x24c   : > { %v1371_v30 = vmul.f32 0.015625, %v947_v57  ;;  %v944_v39 = vpop.xlane.xlu0 %943 }
 0x24d   : > { %v2576_v33 = vsel %vm2095_vm12, %v2575_v22, %v4904_v19  ;;  %v1907_v5 = vunpack.c.l.b16 %v1534_v56  ;;  %v1908_v50 = vunpack.c.h.b16 %v1534_v56  ;;  %v1370_v58 = vmul.f32 0.015625, %v944_v39 }
 0x24e   : > { %v4986_v9 = vsel %vm2102_vm13, %v2580_v34, %v2576_v33 }
 0x24f   : > { %v2812_v38 = vrot.slane %v1907_v5, %v4034_v25  ;;  %v2817_v41 = vrot.slane %v1908_v50, %v4037_v26  ;;  %v1541_v53 = vpack.c.bf16 %v1371_v30, %v1370_v58  ;;  %v1091_v45 = vpop.xlane.xlu1 %1090 }
 0x250   : > { %v1419_v8 = vmul.f32 0.015625, %v1091_v45  ;;  %v1088_v16 = vpop.xlane.xlu0 %1087 }
 0x251   : > { %v2813_v29 = vsel %vm2095_vm12, %v2812_v38, %v4917_v28  ;;  %v1921_v36 = vunpack.c.l.b16 %v1541_v53  ;;  %v1922_v49 = vunpack.c.h.b16 %v1541_v53  ;;  %v1418_v19 = vmul.f32 0.015625, %v1088_v16 }
 0x252   : > { %v4993_v61 = vsel %vm2102_vm13, %v2817_v41, %v2813_v29 }
 0x253   : > { %v2881_v54 = vrot.slane %v1921_v36, %v4010_v51  ;;  %v2886_v14 = vrot.slane %v1922_v49, %v4019_v0  ;;  %v1565_v13 = vpack.c.bf16 %v1419_v8, %v1418_v19  ;;  %v1133_v20 = vpop.xlane.xlu1 %1132 }
 0x254   : > { %v1433_v60 = vmul.f32 0.015625, %v1133_v20  ;;  %v1130_v62 = vpop.xlane.xlu0 %1129 }
 0x255   : > { %v2882_v27 = vsel %vm2081_vm10, %v2881_v54, %v4930_v4  ;;  %v1969_v17 = vunpack.c.l.b16 %v1565_v13  ;;  %v1970_v10 = vunpack.c.h.b16 %v1565_v13  ;;  %v1432_v28 = vmul.f32 0.015625, %v1130_v62 }
 0x256   : > { %v5000_v2 = vsel %vm5218_vm5, %v2886_v14, %v2882_v27 }
 0x257   : > { %v3118_v43 = vrot.slane %v1969_v17, %v4010_v51  ;;  %v3123_v18 = vrot.slane %v1970_v10, %v4019_v0  ;;  %v1572_v42 = vpack.c.bf16 %v1433_v60, %v1432_v28  ;;  %v815_v11 = vpop.xlane.xlu1 %814 }
 0x258   : > { %v1327_v21 = vmul.f32 0.015625, %v815_v11  ;;  %v812_v40 = vpop.xlane.xlu0 %811 }
 0x259   : > { %v3119_v23 = vsel %vm2081_vm10, %v3118_v43, %v4937_v3  ;;  %v1983_v52 = vunpack.c.l.b16 %v1572_v42  ;;  %v1984_v1 = vunpack.c.h.b16 %v1572_v42  ;;  %v1326_v4 = vmul.f32 0.015625, %v812_v40 }
 0x25a   : > { %v5007_v32 = vsel %vm5219_vm0, %v3123_v18, %v3119_v23 }
 0x25b   : > { %v3187_v6 = vrot.slane %v1983_v52, %v3996_v31  ;;  %v3192_v63 = vrot.slane %v1984_v1, %v4003_v44  ;;  %v1519_v35 = vpack.c.bf16 %v1327_v21, %v1326_v4  ;;  %v857_v22 = vpop.xlane.xlu1 %856 }
 0x25c   : > { %v1341_v34 = vmul.f32 0.015625, %v857_v22  ;;  %v854_v56 = vpop.xlane.xlu0 %853 }
 0x25d   : > { %v3188_v57 = vsel %vm2067_vm8, %v3187_v6, %v4944_v55  ;;  %v1877_v30 = vunpack.c.l.b16 %v1519_v35  ;;  %v1878_v39 = vunpack.c.h.b16 %v1519_v35  ;;  %v1340_v3 = vmul.f32 0.015625, %v854_v56 }
 0x25e   : > { %v5014_v33 = vsel %vm5220_vm9, %v3192_v63, %v3188_v57  ;;  %vm3309_vm8 = vcmask 1044484  }
 0x25f   : > { %v2664_v5 = vrot.slane %v1877_v30, %v4047_v46  ;;  %v2669_v50 = vrot.slane %v1878_v39, %v4050_v47  ;;  %v1526_v31 = vpack.c.bf16 %v1341_v34, %v1340_v3  ;;  %v1001_v58 = vpop.xlane.xlu1 %1000 }
 0x260   : > { %v998_v44 = vpop.xlane.xlu0 %997  ;;  %v1389_v34 = vmul.f32 0.015625, %v1001_v58 }
 0x261   : > { %v2665_v38 = vsel %vm2109_vm14, %v2664_v5, %v4951_v37  ;;  %v1891_v41 = vunpack.c.l.b16 %v1526_v31  ;;  %v1892_v53 = vunpack.c.h.b16 %v1526_v31  ;;  %v1388_v56 = vmul.f32 0.015625, %v998_v44 }
 0x262   : > { %v2670_v55 = vsel %vm2116_vm15, %v2669_v50, %v2665_v38 }
 0x263   : > { %v2733_v45 = vrot.slane %v1891_v41, %v4034_v25  ;;  %v2738_v8 = vrot.slane %v1892_v53, %v4037_v26  ;;  %v1043_v16 = vpop.xlane.xlu1 %1042  ;;  %v3319_v29 = vsel %vm3307_vm11, %v2670_v55, %v4403_v15  ;;  %v1550_v5 = vpack.c.bf16 %v1389_v34, %v1388_v56 }
 0x264   : > { %v1040_v36 = vpop.xlane.xlu0 %1039 }
 0x265   : > { %v2734_v49 = vsel %vm2095_vm12, %v2733_v45, %v4958_v7  ;;  %v1940_v45 = vunpack.c.h.b16 %v1550_v5 }
 0x266   : > { %v5028_v19 = vsel %vm2102_vm13, %v2738_v8, %v2734_v49  ;;  %v1402_v8 = vmul.f32 0.015625, %v1040_v36 }
 0x267   : > { %v5030_v37 = vpop.xlane.xlu1 %1186 }
 0x268   : > { %v5032_v54 = vpop.xlane.xlu0 %1183 }
 0x26b   : > { %v767_v14 = vpop.xlane.xlu1 %766 }
 0x26c   : > { %v1311_v13 = vmul.f32 0.015625, %v767_v14  ;;  %v764_v20 = vpop.xlane.xlu0 %763 }
 0x26d   : > { %v1310_v60 = vmul.f32 0.015625, %v764_v20 }
 0x26f   : > { %v1511_v62 = vpack.c.bf16 %v1311_v13, %v1310_v60  ;;  %v911_v27 = vpop.xlane.xlu1 %910 }
 0x270   : > { %v1359_v17 = vmul.f32 0.015625, %v911_v27  ;;  %v908_v10 = vpop.xlane.xlu0 %907 }
 0x271   : > { %v1861_v15 = vunpack.c.l.b16 %v1511_v62  ;;  %v1862_v28 = vunpack.c.h.b16 %v1511_v62  ;;  %v1358_v43 = vmul.f32 0.015625, %v908_v10 }
 0x273   : > { %v2585_v7 = vrot.slane %v1861_v15, %v4047_v46  ;;  %v2590_v18 = vrot.slane %v1862_v28, %v4050_v47  ;;  %v1535_v42 = vpack.c.bf16 %v1359_v17, %v1358_v43  ;;  %v953_v11 = vpop.xlane.xlu1 %952  ;;  %v2975_v28 = vrot.slane %v1940_v45, %v4037_v26 }
 0x274   : > { %v950_v21 = vpop.xlane.xlu0 %949  ;;  %v1373_v53 = vmul.f32 0.015625, %v953_v11 }
 0x275   : > { %v2586_v40 = vsel %vm2109_vm14, %v2585_v7, %v4986_v9  ;;  %v1909_v23 = vunpack.c.l.b16 %v1535_v42  ;;  %v1910_v52 = vunpack.c.h.b16 %v1535_v42  ;;  %v1372_v58 = vmul.f32 0.015625, %v950_v21 }
 0x276   : > { %v2591_v1 = vsel %vm2116_vm15, %v2590_v18, %v2586_v40  ;;  %v1451_v40 = vmul.f32 0.015625, %v5030_v37 }
 0x277   : > { %v2822_v4 = vrot.slane %v1909_v23, %v4047_v46  ;;  %v2827_v6 = vrot.slane %v1910_v52, %v4050_v47  ;;  %v1097_v63 = vpop.xlane.xlu1 %1096  ;;  %v3308_v35 = vsel %vm3307_vm11, %v2591_v1, %v4336_v48  ;;  %v1939_v48 = vunpack.c.l.b16 %v1550_v5 }
 0x278   : > { %v1094_v22 = vpop.xlane.xlu0 %1093  ;;  %v1542_v62 = vpack.c.bf16 %v1373_v53, %v1372_v58  ;;  %v1421_v7 = vmul.f32 0.015625, %v1097_v63  ;;  %v1450_v23 = vmul.f32 0.015625, %v5032_v54 }
 0x279   : > { %v2823_v57 = vsel %vm2109_vm14, %v2822_v4, %v4993_v61  ;;  %v1403_v61 = vmul.f32 0.015625, %v1043_v16  ;;  %v2970_v13 = vrot.slane %v1939_v48, %v4034_v25  ;;  %v1420_v16 = vmul.f32 0.015625, %v1094_v22 }
 0x27a   : > { %v2828_v9 = vsel %vm2116_vm15, %v2827_v6, %v2823_v57  ;;  %v1923_v1 = vunpack.c.l.b16 %v1542_v62  ;;  %v5069_v57 = vpack.c.bf16 %v1451_v40, %v1450_v23 }
 0x27b   : > { %v5046_v30 = vpop.xlane.xlu1 %1138  ;;  %v3320_v39 = vsel %vm3309_vm8, %v2828_v9, %v3319_v29  ;;  %v1557_v43 = vpack.c.bf16 %v1403_v61, %v1402_v8  ;;  %v2971_v18 = vsel %vm2095_vm12, %v2970_v13, %v4965_v59  ;;  %v1924_v9 = vunpack.c.h.b16 %v1542_v62 }
 0x27c   : > { %v5049_v3 = vpop.xlane.xlu0 %1135  ;;  %v2976_v59 = vsel %vm2102_vm13, %v2975_v28, %v2971_v18  ;;  %v2001_v61 = vunpack.c.l.b16 %v5069_v57 }
 0x27d   : > { %v1953_v56 = vunpack.c.l.b16 %v1557_v43  ;;  %v1954_v37 = vunpack.c.h.b16 %v1557_v43  ;;  %v2896_v8 = vrot.slane %v1924_v9, %v4037_v26 }
 0x27f   : > { %v863_v50 = vpop.xlane.xlu1 %862 }
 0x280   : > { %v1343_v31 = vmul.f32 0.015625, %v863_v50  ;;  %v860_v38 = vpop.xlane.xlu0 %859  ;;  %v2891_v50 = vrot.slane %v1923_v1, %v4034_v25 }
 0x281   : > { %v1342_v41 = vmul.f32 0.015625, %v860_v38 }
 0x283   : > { %v1527_v44 = vpack.c.bf16 %v1343_v31, %v1342_v41  ;;  %v1007_v55 = vpop.xlane.xlu1 %1006 }
 0x284   : > { %v1391_v49 = vmul.f32 0.015625, %v1007_v55  ;;  %v1004_v14 = vpop.xlane.xlu0 %1003  ;;  %v3044_v55 = vrot.slane %v1954_v37, %v4019_v0 }
 0x285   : > { %v1893_v29 = vunpack.c.l.b16 %v1527_v44  ;;  %v1894_v20 = vunpack.c.h.b16 %v1527_v44  ;;  %v1390_v60 = vmul.f32 0.015625, %v1004_v14  ;;  %v3039_v44 = vrot.slane %v1953_v56, %v4010_v51 }
 0x286   : > { %v1434_v14 = vmul.f32 0.015625, %v5049_v3 }
 0x287   : > { %v2743_v27 = vrot.slane %v1893_v29, %v4047_v46  ;;  %v2748_v17 = vrot.slane %v1894_v20, %v4050_v47  ;;  %v1551_v10 = vpack.c.bf16 %v1391_v49, %v1390_v60  ;;  %v1049_v15 = vpop.xlane.xlu1 %1048  ;;  %v1435_v49 = vmul.f32 0.015625, %v5046_v30 }
 0x288   : > { %v1046_v36 = vpop.xlane.xlu0 %1045  ;;  %v1405_v31 = vmul.f32 0.015625, %v1049_v15  ;;  %v3040_v28 = vsel %vm2081_vm10, %v3039_v44, %v4972_v12 }
 0x289   : > { %v2744_v42 = vsel %vm2109_vm14, %v2743_v27, %v5028_v19  ;;  %v1941_v11 = vunpack.c.l.b16 %v1551_v10  ;;  %v1942_v21 = vunpack.c.h.b16 %v1551_v10  ;;  %v1566_v19 = vpack.c.bf16 %v1421_v7, %v1420_v16 }
 0x28a   : > { %v2749_v52 = vsel %vm2116_vm15, %v2748_v17, %v2744_v42  ;;  %v1404_v38 = vmul.f32 0.015625, %v1046_v36  ;;  %v2002_v7 = vunpack.c.h.b16 %v5069_v57  ;;  %v1573_v36 = vpack.c.bf16 %v1435_v49, %v1434_v14 }
 0x28b   : > { %v2980_v4 = vrot.slane %v1941_v11, %v4047_v46  ;;  %v2985_v6 = vrot.slane %v1942_v21, %v4050_v47  ;;  %v1193_v63 = vpop.xlane.xlu1 %1192  ;;  %v5065_v22 = vsel %vm3309_vm8, %v2749_v52, %v3308_v35  ;;  %v1971_v41 = vunpack.c.l.b16 %v1566_v19 }
 0x28c   : > { %v1190_v34 = vpop.xlane.xlu0 %1189  ;;  %v1972_v13 = vunpack.c.h.b16 %v1566_v19  ;;  %v1558_v29 = vpack.c.bf16 %v1405_v31, %v1404_v38  ;;  %v1453_v27 = vmul.f32 0.015625, %v1193_v63  ;;  %v1985_v56 = vunpack.c.l.b16 %v1573_v36 }
 0x28d   : > { %v2981_v54 = vsel %vm2109_vm14, %v2980_v4, %v2976_v59  ;;  %v3128_v62 = vrot.slane %v1971_v41, %v4034_v25  ;;  %v1452_v17 = vmul.f32 0.015625, %v1190_v34  ;;  %v3045_v34 = vsel %vm5221_vm6, %v3044_v55, %v3040_v28 }
 0x28e   : > { %v2986_v5 = vsel %vm2116_vm15, %v2985_v6, %v2981_v54  ;;  %v1955_v18 = vunpack.c.l.b16 %v1558_v29  ;;  %v3133_v23 = vrot.slane %v1972_v13, %v4037_v26  ;;  %v1956_v37 = vunpack.c.h.b16 %v1558_v29 }
 0x28f   : > { %v959_v35 = vpop.xlane.xlu1 %958  ;;  %v5074_v48 = vsel %vm3311_vm1, %v2986_v5, %v3320_v39  ;;  %v2892_v39 = vsel %vm2095_vm12, %v2891_v50, %v5000_v2  ;;  %v3276_v2 = vrot.slane %v2001_v61, %v4010_v51  ;;  %v3129_v12 = vsel %vm2095_vm12, %v3128_v62, %v5007_v32 }
 0x290   : > { %v1375_v53 = vmul.f32 0.015625, %v959_v35  ;;  %v956_v58 = vpop.xlane.xlu0 %955  ;;  %v2897_v16 = vsel %vm2102_vm13, %v2896_v8, %v2892_v39  ;;  %v1582_v52 = vpack.c.bf16 %v1453_v27, %v1452_v17  ;;  %v3049_v57 = vrot.slane %v1955_v18, %v4034_v25 }
 0x291   : > { %v1374_v45 = vmul.f32 0.015625, %v956_v58  ;;  %v3277_v58 = vsel %vm2081_vm10, %v3276_v2, %v4979_v24  ;;  %v3281_v44 = vrot.slane %v2002_v7, %v4019_v0  ;;  %v1986_v61 = vunpack.c.h.b16 %v1573_v36 }
 0x292   : > { %v2003_v31 = vunpack.c.l.b16 %v1582_v52  ;;  %v3197_v8 = vrot.slane %v1985_v56, %v4010_v51  ;;  %v3054_v49 = vrot.slane %v1956_v37, %v4037_v26  ;;  %v3050_v14 = vsel %vm2095_vm12, %v3049_v57, %v3045_v34 }
 0x293   : > { %v1543_v20 = vpack.c.bf16 %v1375_v53, %v1374_v45  ;;  %v1103_v60 = vpop.xlane.xlu1 %1102  ;;  %v3134_v53 = vsel %vm2102_vm13, %v3133_v23, %v3129_v12  ;;  %v2004_v39 = vunpack.c.h.b16 %v1582_v52 }
 0x294   : > { %v1423_v10 = vmul.f32 0.015625, %v1103_v60  ;;  %v1100_v15 = vpop.xlane.xlu0 %1099  ;;  %v3198_v28 = vsel %vm2081_vm10, %v3197_v8, %v5014_v33  ;;  %vm5223_vm10 = vmmov %vm5219_vm0 }
 0x295   : > { %v1925_v30 = vunpack.c.l.b16 %v1543_v20  ;;  %v1926_v43 = vunpack.c.h.b16 %v1543_v20  ;;  %v1422_v3 = vmul.f32 0.015625, %v1100_v15  ;;  %v3286_v20 = vrot.slane %v2003_v31, %v4034_v25 }
 0x296   : > { %v3282_v15 = vsel %vm5222_vm7, %v3281_v44, %v3277_v58 }
 0x297   : > { %v2901_v42 = vrot.slane %v1925_v30, %v4047_v46  ;;  %v2906_v11 = vrot.slane %v1926_v43, %v4050_v47  ;;  %v1567_v21 = vpack.c.bf16 %v1423_v10, %v1422_v3  ;;  %v1145_v40 = vpop.xlane.xlu1 %1144  ;;  %v3202_v30 = vrot.slane %v1986_v61, %v4019_v0 }
 0x298   : > { %v1437_v1 = vmul.f32 0.015625, %v1145_v40  ;;  %v1142_v4 = vpop.xlane.xlu0 %1141  ;;  %v3055_v43 = vsel %vm2102_vm13, %v3054_v49, %v3050_v14  ;;  %v3291_v3 = vrot.slane %v2004_v39, %v4037_v26 }
 0x299   : > { %v2902_v6 = vsel %vm2109_vm14, %v2901_v42, %v2897_v16  ;;  %v1973_v63 = vunpack.c.l.b16 %v1567_v21  ;;  %v1974_v59 = vunpack.c.h.b16 %v1567_v21  ;;  %v1436_v19 = vmul.f32 0.015625, %v1142_v4 }
 0x29a   : > { %v2907_v54 = vsel %vm2116_vm15, %v2906_v11, %v2902_v6  ;;  %v3287_v21 = vsel %vm2095_vm12, %v3286_v20, %v3282_v15 }
 0x29b   : > { %v3138_v32 = vrot.slane %v1973_v63, %v4047_v46  ;;  %v3143_v9 = vrot.slane %v1974_v59, %v4050_v47  ;;  %v1055_v5 = vpop.xlane.xlu1 %1054  ;;  %v3312_v50 = vsel %vm3311_vm1, %v2907_v54, %v5065_v22  ;;  %v1574_v38 = vpack.c.bf16 %v1437_v1, %v1436_v19 }
 0x29c   : > { %v1407_v35 = vmul.f32 0.015625, %v1055_v5  ;;  %v1052_v41 = vpop.xlane.xlu0 %1051  ;;  %v3292_v59 = vsel %vm2102_vm13, %v3291_v3, %v3287_v21 }
 0x29d   : > { %v1406_v55 = vmul.f32 0.015625, %v1052_v41  ;;  %v3139_v45 = vsel %vm2109_vm14, %v3138_v32, %v3134_v53  ;;  %v1987_v60 = vunpack.c.l.b16 %v1574_v38  ;;  %v1988_v36 = vunpack.c.h.b16 %v1574_v38 }
 0x29e   : > { %v3144_v22 = vsel %vm2116_vm15, %v3143_v9, %v3139_v45 }
 0x29f   : > { %v1559_v13 = vpack.c.bf16 %v1407_v35, %v1406_v55  ;;  %v1199_v29 = vpop.xlane.xlu1 %1198  ;;  %v3322_v24 = vsel %vm3313_vm2, %v3144_v22, %v5074_v48  ;;  %v3207_v18 = vrot.slane %v1987_v60, %v4034_v25  ;;  %v3203_v25 = vsel %vm5223_vm10, %v3202_v30, %v3198_v28 }
 0x2a0   : > { %v1455_v62 = vmul.f32 0.015625, %v1199_v29  ;;  %v1196_v27 = vpop.xlane.xlu0 %1195  ;;  %v3212_v63 = vrot.slane %v1988_v36, %v4037_v26 }
 0x2a1   : > { %v1957_v17 = vunpack.c.l.b16 %v1559_v13  ;;  %v1958_v10 = vunpack.c.h.b16 %v1559_v13  ;;  %v1454_v51 = vmul.f32 0.015625, %v1196_v27  ;;  %v3208_v19 = vsel %vm2095_vm12, %v3207_v18, %v3203_v25 }
 0x2a2   : > { %v3213_v26 = vsel %vm2102_vm13, %v3212_v63, %v3208_v19 }
 0x2a3   : > { %v3059_v48 = vrot.slane %v1957_v17, %v4047_v46  ;;  %v3064_v7 = vrot.slane %v1958_v10, %v4050_v47  ;;  %v1583_v2 = vpack.c.bf16 %v1455_v62, %v1454_v51  ;;  %v1151_v16 = vpop.xlane.xlu1 %1150 }
 0x2a4   : > { %v1439_v42 = vmul.f32 0.015625, %v1151_v16  ;;  %v1148_v11 = vpop.xlane.xlu0 %1147 }
 0x2a5   : > { %v2005_v33 = vunpack.c.l.b16 %v1583_v2  ;;  %v2006_v40 = vunpack.c.h.b16 %v1583_v2  ;;  %v1438_v0 = vmul.f32 0.015625, %v1148_v11  ;;  %v3060_v12 = vsel %vm2109_vm14, %v3059_v48, %v3055_v43 }
 0x2a6   : > { %v3065_v23 = vsel %vm2116_vm15, %v3064_v7, %v3060_v12 }
 0x2a7   : > { %v3296_v52 = vrot.slane %v2005_v33, %v4047_v46  ;;  %v3301_v1 = vrot.slane %v2006_v40, %v4050_v47  ;;  %v1575_v4 = vpack.c.bf16 %v1439_v42, %v1438_v0  ;;  %v3314_v6 = vsel %vm3313_vm2, %v3065_v23, %v3312_v50 }
 0x2a9   : > { %v1989_v34 = vunpack.c.l.b16 %v1575_v4  ;;  %v1990_v56 = vunpack.c.h.b16 %v1575_v4  ;;  %v3297_v37 = vsel %vm2109_vm14, %v3296_v52, %v3292_v59 }
 0x2aa   : > { %v3302_v54 = vsel %vm2116_vm15, %v3301_v1, %v3297_v37 }
 0x2ab   : > { %v3217_v57 = vrot.slane %v1989_v34, %v4047_v46  ;;  %v3222_v32 = vrot.slane %v1990_v56, %v4050_v47  ;;  %v3323_v9 = vsel %vm3315_vm3, %v3302_v54, %v3322_v24  ;;  %v3546_v46 = vld [vmem:[%s5193_s2] ss:$0 sm:$0xff] }
 0x2ac   : > { %v3325_v5 = vpack.c.b16 %v3323_v9, %v3323_v9 }
 0x2ad   : > { %v3218_v50 = vsel %vm2109_vm14, %v3217_v57, %v3213_v26 }
 0x2ae   : > { %3456 = vmatprep.mubr.bf16.mxu0 %v3325_v5  ;;  %v3223_v31 = vsel %vm2116_vm15, %v3222_v32, %v3218_v50 }
 0x2af   : > { %v3316_v38 = vsel %vm3315_vm3, %v3223_v31, %v3314_v6 }
 0x2b0   : > { %v3324_v35 = vpack.c.b16 %v3316_v38, %v3316_v38 }
 0x2b2   : > { %3457 = vmatmul.mubr.bf16.vlgmr.msra.gmra.mrb[0].mxu0 %v3324_v35 }
 0x385   : > { %v3584_v41 = vpop.f32.mrb[0].mxu0 }
 0x386   : > { %v3585_v47 = vpop.f32.mrb[1].mxu0 }
 0x387   : > { %v3586_v53 = vadd.f32 %v3585_v47, %v3584_v41  ;;  %v3587_v58 = vpop.f32.mrb[2].mxu0 }
 0x388   : > { %v3588_v44 = vpop.f32.mrb[3].mxu0 }
 0x389   : > { %v3459_v55 = vadd.f32 %v3586_v53, %v3546_v46 }
 0x38b   : > { %3464 = vst [vmem:[%s166_s30] sm:$0xff] %v3459_v55 }
 0x38c   : > { %3658 = shalt.err (!%p3655_p3)
}
 0x38d   : > { %s3659_s17 = scalar_lea.hbm %s5149_s7, 128  ;;  %s3663_s24 = scalar_lea.hbm %s5194_s3, 256 }
 0x38e   : > { %p3660_p4 = scmp.ne.s32.totalorder %s5149_s7, %s3659_s17  ;;  %p3664_p9 = scmp.lt.u32.totalorder %s5149_s7, %s5194_s3 }
 0x38f   : > { %p3665_p10 = scmp.lt.u32.totalorder %s3663_s24, %s3659_s17  ;;  %p3667_p12 = scmp.lt.u32.totalorder %s3659_s17, %s5149_s7 }
 0x390   : > { %p3661_p7 = pnand %p3660_p4, %p3768_p5 }
 0x391   : > { %p3666_p11 = por %p3665_p10, %p3664_p9 }
 0x392   : > { %p3662_p8 = pneg %p3661_p7 }
 0x393   : > { %p3668_p13 = por %p3667_p12, %p3666_p11 }
 0x395   : > { %p3669_p0 = pnand %p3668_p13, %p3662_p8 }
 0x397   : > { %3672 = shalt.err (!%p3669_p0)
}
 0x398   : > { %3590 = dma.vmem_to_hbm [thread:$0]  (%p3768_p5), %s5151_s4, 128, %s5149_s7, %s3466_s8  }
 0x399 PF: > { %p3596_p1 = scmp.ge.s32.totalorder %s3707_s15, 2  ;;  %s3491_s27 = sand.u32 1, %s3695_s12  }
 0x39a   : > { %s3492_s28 = scalar_lea.sflag [#allocation3], %s3491_s27 }
 0x39b   : > { %p3593_p2 = pnand %p3596_p1, %p3772_p6 }
 0x39d   : > { %3690 = dma.done.wait (!%p3593_p2), %s3492_s28, 128  }
 0x39e   : > { %3692 = vsyncadd (!%p3593_p2), %s3492_s28, 4294967168  ;;  %p13_p3 = scmp.ge.s32.totalorder %s3755_s18, 4   ;;  %s5224_s12 = smov %s3699_s13 }
 0x39f   : > { %s5225_s13 = smov %s3703_s14  ;;  %s5226_s14 = smov %s3766_s21 }
 0x3a0   : > { %s5227_s15 = smov %s3755_s18  ;;  %15 = sbr.rel (!%p13_p3) target bundleno = 3 (0x3), region = 67 }
 0x3a7   :  { %3497 = vsyncpa [#allocation3], 1 }
 0x3a8   :  { %3499 = vsyncpa [#allocation3 + $0x1], 1 }

</bundles_post_ra>
